<compile_context>
chip_gen: v5e
topology: v5e:2x2
jax: 0.10.0
libtpu: 0.0.40
codegen_flags: <defaults>
</compile_context>

<pallas_src>
import numpy as np
import jax
import jax.numpy as jnp
from jax import lax
from jax.experimental import pallas as pl
from jax.experimental.pallas import tpu as pltpu

DEL_ID = 3
PAD_ID = 0
STOP_ID = 5

_VMEM_LIMIT_CACHE = None


def _vmem_limit():
    """Per-generation scoped-VMEM limit (~100 MiB v5e/v6e, ~56 MiB v7x)."""
    global _VMEM_LIMIT_CACHE
    if _VMEM_LIMIT_CACHE is None:
        cap = None
        try:
            cap = getattr(pltpu.get_tpu_info(), "vmem_capacity_bytes", None)
        except Exception:
            cap = None
        if not cap:
            cap = 64 * 1024 * 1024
        _VMEM_LIMIT_CACHE = int(min(cap - cap // 8, 100 * 1024 * 1024))
    return _VMEM_LIMIT_CACHE


def _batch_tile(B):
    # TODO(synk): production configs should pad B to a multiple of 8 (sublanes)
    #             and H to a multiple of 128 (lanes) so gate slices and the
    #             per-step (B,H) stores are lane-dense / unmasked.
    return 8 if (B > 8 and B % 8 == 0) else B


def _pick_vocab_tile(V):
    for tv in (2048, 1024, 512, 256, 128):
        if V % tv == 0:
            return tv
    return V                     # small vocab: single full-extent tile


# --------------------------------------------------------------------------
# Kernel 1: fused bidirectional encoder LSTM.  Input projections hoisted to
# XLA; only h @ W_hh in the serial loop.  Grid over batch tiles (parallel).
# --------------------------------------------------------------------------
def _bienc_lstm_kernel(xf_ref, xb_ref, m_ref,
                       wf_hh_ref, wb_hh_ref,
                       outf_ref, outb_ref,
                       hf_ref, cf_ref, hb_ref, cb_ref):
    T, B, _ = xf_ref.shape
    H = wf_hh_ref.shape[0]
    wf_hh = wf_hh_ref[...]                       # (H, 4H) bf16, resident
    wb_hh = wb_hh_ref[...]

    def gates_to_hc(gates, c):
        i_g = jax.nn.sigmoid(gates[:, 0 * H:1 * H])
        f_g = jax.nn.sigmoid(gates[:, 1 * H:2 * H])
        g_g = jnp.tanh(gates[:, 2 * H:3 * H])
        o_g = jax.nn.sigmoid(gates[:, 3 * H:4 * H])
        c_new = f_g * c + i_g * g_g
        h_new = o_g * jnp.tanh(c_new)
        return h_new, c_new

    def step(t, carry):
        hf, cf, hb, cb = carry
        # forward direction, timestep t (mask computed once, reused)
        mf = m_ref[t] > 0.0                                        # (B, 1) bool
        gf = xf_ref[t] + jnp.dot(hf.astype(jnp.bfloat16), wf_hh,
                                 preferred_element_type=jnp.float32)
        hfn, cfn = gates_to_hc(gf, cf)
        # backward direction, timestep T-1-t (independent chain — overlaps)
        tb = T - 1 - t
        mb = m_ref[tb] > 0.0
        gb = xb_ref[tb] + jnp.dot(hb.astype(jnp.bfloat16), wb_hh,
                                  preferred_element_type=jnp.float32)
        hbn, cbn = gates_to_hc(gb, cb)
        outf_ref[t] = jnp.where(mf, hfn, 0.0)      # pad_packed pads with 0
        outb_ref[tb] = jnp.where(mb, hbn, 0.0)
        return (jnp.where(mf, hfn, hf), jnp.where(mf, cfn, cf),
                jnp.where(mb, hbn, hb), jnp.where(mb, cbn, cb))

    z = jnp.zeros((B, H), jnp.float32)             # initHidden -> zeros
    hf, cf, hb, cb = lax.fori_loop(0, T, step, (z, z, z, z), unroll=(T <= 16))
    hf_ref[...] = hf
    cf_ref[...] = cf
    hb_ref[...] = hb
    cb_ref[...] = cb


def encoder_bilstm(xproj_f, xproj_b, mask_tm, wf_hh_bf, wb_hh_bf):
    """xproj_*: (T,B,4H) f32 hoisted input projections; mask_tm: (T,B,1)."""
    T, B, G = xproj_f.shape
    H = wf_hh_bf.shape[0]
    TB = _batch_tile(B)
    nb = B // TB
    bmap3 = lambda b: (0, b, 0)
    bmap2 = lambda b: (b, 0)
    fixed2 = lambda b: (0, 0)
    out_shape = (jax.ShapeDtypeStruct((T, B, H), jnp.float32),
                 jax.ShapeDtypeStruct((T, B, H), jnp.float32),
                 jax.ShapeDtypeStruct((B, H), jnp.float32),
                 jax.ShapeDtypeStruct((B, H), jnp.float32),
                 jax.ShapeDtypeStruct((B, H), jnp.float32),
                 jax.ShapeDtypeStruct((B, H), jnp.float32))
    return pl.pallas_call(
        _bienc_lstm_kernel,
        out_shape=out_shape,
        grid_spec=pltpu.PrefetchScalarGridSpec(
            num_scalar_prefetch=0,
            grid=(nb,),
            in_specs=[
                pl.BlockSpec((T, TB, G), bmap3),
                pl.BlockSpec((T, TB, G), bmap3),
                pl.BlockSpec((T, TB, 1), bmap3),
                pl.BlockSpec((H, G), fixed2),
                pl.BlockSpec((H, G), fixed2),
            ],
            out_specs=[
                pl.BlockSpec((T, TB, H), bmap3),
                pl.BlockSpec((T, TB, H), bmap3),
                pl.BlockSpec((TB, H), bmap2),
                pl.BlockSpec((TB, H), bmap2),
                pl.BlockSpec((TB, H), bmap2),
                pl.BlockSpec((TB, H), bmap2),
            ]),
        compiler_params=pltpu.CompilerParams(
            dimension_semantics=("parallel",),
            vmem_limit_bytes=_vmem_limit()),
    )(xproj_f, xproj_b, mask_tm, wf_hh_bf, wb_hh_bf)


# --------------------------------------------------------------------------
# Kernel 2: fused decoder LSTMs (rnn_edits + rnn_words), interleaved in one
# fori_loop over the common prefix.  Input projections hoisted to XLA.
# --------------------------------------------------------------------------
def _dec_lstm_kernel(xe_ref, xw_ref, h0_ref, c0_ref,
                     we_hh_ref, ww_hh_ref,
                     oute_ref, outw_ref):
    Ne = xe_ref.shape[0]
    Nw = xw_ref.shape[0]
    H2 = h0_ref.shape[-1]
    we_hh = we_hh_ref[...]                         # (H2, 4H2) bf16
    ww_hh = ww_hh_ref[...]

    def gates_to_hc(gates, c):
        i_g = jax.nn.sigmoid(gates[:, 0 * H2:1 * H2])
        f_g = jax.nn.sigmoid(gates[:, 1 * H2:2 * H2])
        g_g = jnp.tanh(gates[:, 2 * H2:3 * H2])
        o_g = jax.nn.sigmoid(gates[:, 3 * H2:4 * H2])
        c_new = f_g * c + i_g * g_g
        h_new = o_g * jnp.tanh(c_new)
        return h_new, c_new

    def cell(xproj_t, h, c, whh):
        gates = xproj_t + jnp.dot(h.astype(jnp.bfloat16), whh,
                                  preferred_element_type=jnp.float32)
        return gates_to_hc(gates, c)

    h0 = h0_ref[...]
    c0 = c0_ref[...]
    n_common = min(Ne, Nw)

    def step_both(t, carry):
        he, ce, hw, cw = carry
        he, ce = cell(xe_ref[t], he, ce, we_hh)    # two independent chains:
        hw, cw = cell(xw_ref[t], hw, cw, ww_hh)    # MXU/EUP latency hidden
        oute_ref[t] = he
        outw_ref[t] = hw
        return he, ce, hw, cw

    he, ce, hw, cw = lax.fori_loop(0, n_common, step_both, (h0, c0, h0, c0),
                                   unroll=(n_common <= 16))

    if Ne > Nw:                                    # static tail
        def step_e(t, carry):
            h, c = carry
            h, c = cell(xe_ref[t], h, c, we_hh)
            oute_ref[t] = h
            return h, c
        lax.fori_loop(n_common, Ne, step_e, (he, ce),
                      unroll=((Ne - n_common) <= 16))
    elif Nw > Ne:
        def step_w(t, carry):
            h, c = carry
            h, c = cell(xw_ref[t], h, c, ww_hh)
            outw_ref[t] = h
            return h, c
        lax.fori_loop(n_common, Nw, step_w, (hw, cw),
                      unroll=((Nw - n_common) <= 16))


def decoder_lstms(xproj_e, xproj_w, h0, c0, we_hh_bf, ww_hh_bf):
    Ne, B, G2 = xproj_e.shape
    Nw = xproj_w.shape[0]
    H2 = h0.shape[-1]
    TB = _batch_tile(B)
    nb = B // TB
    bmap3 = lambda b: (0, b, 0)
    bmap2 = lambda b: (b, 0)
    fixed2 = lambda b: (0, 0)
    out_shape = (jax.ShapeDtypeStruct((Ne, B, H2), jnp.float32),
                 jax.ShapeDtypeStruct((Nw, B, H2), jnp.float32))
    return pl.pallas_call(
        _dec_lstm_kernel,
        out_shape=out_shape,
        grid_spec=pltpu.PrefetchScalarGridSpec(
            num_scalar_prefetch=0,
            grid=(nb,),
            in_specs=[
                pl.BlockSpec((Ne, TB, G2), bmap3),
                pl.BlockSpec((Nw, TB, G2), bmap3),
                pl.BlockSpec((TB, H2), bmap2),
                pl.BlockSpec((TB, H2), bmap2),
                pl.BlockSpec((H2, G2), fixed2),
                pl.BlockSpec((H2, G2), fixed2),
            ],
            out_specs=[
                pl.BlockSpec((Ne, TB, H2), bmap3),
                pl.BlockSpec((Nw, TB, H2), bmap3),
            ]),
        compiler_params=pltpu.CompilerParams(
            dimension_semantics=("parallel",),
            vmem_limit_bytes=_vmem_limit()),
    )(xproj_e, xproj_w, h0, c0, we_hh_bf, ww_hh_bf)


# --------------------------------------------------------------------------
# Kernel 3: attention + MLP + output projection + online logsumexp, fused,
# grid = (batch ["parallel"], vocab tiles ["arbitrary"]).  Attention/MLP are
# computed once per batch element (pl.when v==0) into VMEM scratch; wout is
# blocked along vocab so the resident footprint is bounded on v7x (64 MiB).
# Final log-softmax = logits - lse (one XLA broadcast-subtract).
# --------------------------------------------------------------------------
def _attn_out_kernel(edits_ref, enc_ref, enct_ref, cdel_ref, cins_ref,
                     wp_ref, wmlp_ref, bmlp_ref, wout_ref, bout_ref,
                     logits_ref, lse_ref,
                     mlp_sc, m_sc, l_sc):
    vtile = pl.program_id(1)
    H2 = edits_ref.shape[-1]

    @pl.when(vtile == 0)
    def _():
        e = edits_ref[0]                                            # (T,H2) bf16
        # attention over encoder outputs (no padding mask, matches PyTorch)
        key = jnp.dot(e, wp_ref[...], preferred_element_type=jnp.float32)
        logits_att = jnp.dot(key.astype(jnp.bfloat16), enct_ref[0],
                             preferred_element_type=jnp.float32)    # (T,S)
        mx = jnp.max(logits_att, axis=-1, keepdims=True)
        ex = jnp.exp(logits_att - mx)
        w = ex / jnp.sum(ex, axis=-1, keepdims=True)
        applied = jnp.dot(w.astype(jnp.bfloat16), enc_ref[0],
                          preferred_element_type=jnp.float32)       # (T,H2)
        # MLP without materializing the (T,8H) concat: four K=2H matmuls
        wmlp = wmlp_ref[...]                                        # (4H2,E) bf16
        pre = (jnp.dot(e, wmlp[0 * H2:1 * H2],
                       preferred_element_type=jnp.float32)
               + jnp.dot(applied.astype(jnp.bfloat16), wmlp[1 * H2:2 * H2],
                         preferred_element_type=jnp.float32)
               + jnp.dot(cdel_ref[0], wmlp[2 * H2:3 * H2],
                         preferred_element_type=jnp.float32)
               + jnp.dot(cins_ref[0], wmlp[3 * H2:4 * H2],
                         preferred_element_type=jnp.float32)
               + bmlp_ref[...])
        mlp_sc[...] = jnp.tanh(pre).astype(jnp.bfloat16)
        m_sc[...] = jnp.full(m_sc.shape, -jnp.inf, dtype=jnp.float32)
        l_sc[...] = jnp.zeros(l_sc.shape, dtype=jnp.float32)

    # output projection for this vocab tile (lane-dense store) + online lse
    lo = (jnp.dot(mlp_sc[...], wout_ref[...],
                  preferred_element_type=jnp.float32) + bout_ref[...])   # (T,TV)
    logits_ref[0] = lo
    m_prev = m_sc[...]
    m_new = jnp.maximum(m_prev, jnp.max(lo, axis=-1, keepdims=True))
    l_sc[...] = (l_sc[...] * jnp.exp(m_prev - m_new)
                 + jnp.sum(jnp.exp(lo - m_new), axis=-1, keepdims=True))
    m_sc[...] = m_new

    @pl.when(vtile == pl.num_programs(1) - 1)
    def _():
        lse_ref[0] = m_sc[...] + jnp.log(l_sc[...])


def decoder_attn_output(edits_b, enc_b, enct_b, c_del_b, c_ins_b,
                        wp_t, wmlp_t, bmlp, wout_t, bout):
    B, T, H2 = edits_b.shape
    S = enc_b.shape[1]
    E = wmlp_t.shape[1]
    V = wout_t.shape[1]
    TV = _pick_vocab_tile(V)
    NV = V // TV
    per_b = lambda b, v: (b, 0, 0)
    fixed2 = lambda b, v: (0, 0)
    logits, lse = pl.pallas_call(
        _attn_out_kernel,
        out_shape=(jax.ShapeDtypeStruct((B, T, V), jnp.float32),
                   jax.ShapeDtypeStruct((B, T, 1), jnp.float32)),
        grid_spec=pltpu.PrefetchScalarGridSpec(
            num_scalar_prefetch=0,
            grid=(B, NV),
            in_specs=[
                pl.BlockSpec((1, T, H2), per_b),          # output_edits
                pl.BlockSpec((1, S, H2), per_b),          # encoder outputs
                pl.BlockSpec((1, H2, S), per_b),          # pre-transposed enc
                pl.BlockSpec((1, T, H2), per_b),          # gathered c (keep/del)
                pl.BlockSpec((1, T, H2), per_b),          # gathered c_word
                pl.BlockSpec((H2, H2), fixed2),           # attn projection^T
                pl.BlockSpec((4 * H2, E), fixed2),        # attn_MLP weight^T
                pl.BlockSpec((1, E), fixed2),             # attn_MLP bias
                pl.BlockSpec((E, TV), lambda b, v: (0, v)),   # out weight^T tile
                pl.BlockSpec((1, TV), lambda b, v: (0, v)),   # out bias tile
            ],
            out_specs=[
                pl.BlockSpec((1, T, TV), lambda b, v: (b, 0, v)),
                pl.BlockSpec((1, T, 1), per_b),
            ],
            scratch_shapes=[
                pltpu.VMEM((T, E), jnp.bfloat16),         # mlp activations
                pltpu.VMEM((T, 1), jnp.float32),          # running max
                pltpu.VMEM((T, 1), jnp.float32),          # running sum-exp
            ]),
        compiler_params=pltpu.CompilerParams(
            dimension_semantics=("parallel", "arbitrary"),
            vmem_limit_bytes=_vmem_limit()),
    )(edits_b, enc_b, enct_b, c_del_b, c_ins_b, wp_t, wmlp_t, bmlp, wout_t, bout)
    return logits - lse                                   # log_softmax


# --------------------------------------------------------------------------
# Parameter init (deterministic, synthetic) and full EditNTS forward
# --------------------------------------------------------------------------
def init_params(key, V, E, Pv, Ep, H):
    H2 = 2 * H
    In = E + Ep
    ks = jax.random.split(key, 22)
    nrm = lambda k, s: 0.1 * jax.random.normal(k, s, jnp.float32)
    p = {
        'emb': nrm(ks[0], (V, E)),
        'emb_pos': nrm(ks[1], (Pv, Ep)),
        'enc_f': dict(w_ih=nrm(ks[2], (4 * H, In)), w_hh=nrm(ks[3], (4 * H, H)),
                      b_ih=nrm(ks[4], (4 * H,)), b_hh=nrm(ks[5], (4 * H,))),
        'enc_b': dict(w_ih=nrm(ks[6], (4 * H, In)), w_hh=nrm(ks[7], (4 * H, H)),
                      b_ih=nrm(ks[8], (4 * H,)), b_hh=nrm(ks[9], (4 * H,))),
        'dec_edit': dict(w_ih=nrm(ks[10], (4 * H2, E)), w_hh=nrm(ks[11], (4 * H2, H2)),
                         b_ih=nrm(ks[12], (4 * H2,)), b_hh=nrm(ks[13], (4 * H2,))),
        'dec_word': dict(w_ih=nrm(ks[14], (4 * H2, E)), w_hh=nrm(ks[15], (4 * H2, H2)),
                         b_ih=nrm(ks[16], (4 * H2,)), b_hh=nrm(ks[17], (4 * H2,))),
        'attn_proj_w': nrm(ks[18], (H2, H2)),
        'mlp_w': nrm(ks[19], (E, 4 * H2)),
        'mlp_b': nrm(ks[20], (E,)),
        'out_b': nrm(ks[21], (V,)),
    }
    p['out_w'] = p['emb'][:V]      # self.out.weight.data = embedding.weight[:V]
    return p


def editnts_forward(params, org_tokens, org_lengths, org_sort_order,
                    input_edits, org_ids, org_pos_tokens, simp_sent):
    B, S = org_tokens.shape
    M = simp_sent.shape[1]
    n_total = input_edits.shape[1] - 1
    bf16 = jnp.bfloat16

    # ---- keep/del & keep/ins counters + early-break condition (device) ----
    actions = input_edits[:, 1:]
    ind_del = ((actions == 2) | (actions == 3)).astype(jnp.int32)
    ind_ins = ((actions != DEL_ID) & (actions != STOP_ID)
               & (actions != PAD_ID)).astype(jnp.int32)
    del_after = jnp.cumsum(ind_del, axis=1)
    ins_after = jnp.cumsum(ind_ins, axis=1)
    zcol = jnp.zeros((B, 1), jnp.int32)
    del_before = jnp.concatenate([zcol, del_after[:, :-1]], axis=1)
    ins_before = jnp.concatenate([zcol, ins_after[:, :-1]], axis=1)
    overflow = (jnp.any(del_after >= org_ids.shape[1], axis=0)
                | jnp.any(ins_after >= M, axis=0))        # (n_total,) bool

    # ---------------- EncoderRNN.forward ----------------
    emb = params['emb'][org_tokens]                       # (B,S,E)
    emb_pos = params['emb_pos'][org_pos_tokens]           # (B,S,Ep)
    x_tm = jnp.transpose(jnp.concatenate([emb, emb_pos], axis=-1), (1, 0, 2))
    mask = (jnp.arange(S)[:, None] < org_lengths[None, :]
            ).astype(jnp.float32)[:, :, None]             # (S,B,1)

    pf, pb = params['enc_f'], params['enc_b']
    # hoisted input->gate projections: one big matmul per direction (XLA)
    xproj_f = jnp.einsum('tbi,gi->tbg', x_tm, pf['w_ih']) + (pf['b_ih'] + pf['b_hh'])
    xproj_b = jnp.einsum('tbi,gi->tbg', x_tm, pb['w_ih']) + (pb['b_ih'] + pb['b_hh'])

    out_f, out_b, hf, cf, hb, cb = encoder_bilstm(
        xproj_f, xproj_b, mask,
        pf['w_hh'].T.astype(bf16), pb['w_hh'].T.astype(bf16))

    memory = jnp.concatenate([out_f, out_b], axis=-1)             # (S,B,2H)
    order = org_sort_order
    memory_u = jnp.zeros_like(memory).at[:, order, :].set(memory)  # unsort
    h_enc = jnp.stack([hf, hb], axis=0)                           # (2,B,H)
    c_enc = jnp.stack([cf, cb], axis=0)
    h_enc_u = jnp.zeros_like(h_enc).at[:, order, :].set(h_enc)
    c_enc_u = jnp.zeros_like(c_enc).at[:, order, :].set(c_enc)
    encoder_outputs = jnp.transpose(memory_u, (1, 0, 2))          # (B,S,2H)

    # transform_hidden: concat fwd/bwd final states
    h_dec = jnp.concatenate([h_enc_u[0], h_enc_u[1]], axis=-1)    # (B,2H)
    c_dec = jnp.concatenate([c_enc_u[0], c_enc_u[1]], axis=-1)

    # ------------- EditDecoderRNN.forward (teacher forcing) -------------
    pe, pw = params['dec_edit'], params['dec_word']
    emb_edits_tm = jnp.transpose(params['emb'][input_edits], (1, 0, 2))   # (N,B,E)
    emb_words_tm = jnp.transpose(params['emb'][simp_sent], (1, 0, 2))     # (M,B,E)
    xproj_e = jnp.einsum('tbi,gi->tbg', emb_edits_tm, pe['w_ih']) + (pe['b_ih'] + pe['b_hh'])
    xproj_w = jnp.einsum('tbi,gi->tbg', emb_words_tm, pw['w_ih']) + (pw['b_ih'] + pw['b_hh'])

    out_edits_tm, out_words_tm = decoder_lstms(
        xproj_e, xproj_w, h_dec, c_dec,
        pe['w_hh'].T.astype(bf16), pw['w_hh'].T.astype(bf16))
    out_edits_b = jnp.transpose(out_edits_tm, (1, 0, 2))[:, :n_total, :]  # (B,T,2H)
    out_words_b = jnp.transpose(out_words_tm, (1, 0, 2))                  # (B,M,2H)

    # keep/del and keep/ins gathers in XLA (prefix cumsums of gold edits are
    # always in-bounds at kept steps; steps past the PyTorch `break` use
    # clamped indices and are sliced away below)
    c_del = jnp.take_along_axis(encoder_outputs, del_before[:, :, None], axis=1)
    c_ins = jnp.take_along_axis(out_words_b, ins_before[:, :, None], axis=1)

    logp_full = decoder_attn_output(
        out_edits_b.astype(bf16),
        encoder_outputs.astype(bf16),
        jnp.transpose(encoder_outputs, (0, 2, 1)).astype(bf16),
        c_del.astype(bf16), c_ins.astype(bf16),
        params['attn_proj_w'].T.astype(bf16),
        params['mlp_w'].T.astype(bf16), params['mlp_b'][None, :],
        params['out_w'].T.astype(bf16), params['out_b'][None, :])

    # All Pallas kernels above are compiled at the STATIC n_total shape and
    # already enqueued; only now resolve the data-dependent early `break` with
    # a single small host sync + trailing slice (training code would instead
    # keep the full tensor and mask the loss).
    ov = np.asarray(overflow)
    n_steps = int(np.argmax(ov)) + 1 if bool(ov.any()) else n_total
    return logp_full[:, :n_steps, :]                              # (B, n_steps, V)


if __name__ == "__main__":
    key = jax.random.PRNGKey(0)
    V, E, Pv, Ep, H = 64, 32, 16, 16, 32          # decoder hidden = 2H = 64
    B, S, N, M = 2, 8, 6, 8

    kp, k1, k2, k3, k4 = jax.random.split(key, 5)
    params = init_params(kp, V, E, Pv, Ep, H)

    org_tokens = jax.random.randint(k1, (B, S), 1, V, dtype=jnp.int32)
    org_pos = jax.random.randint(k2, (B, S), 1, Pv, dtype=jnp.int32)
    org_lengths = jnp.array([S, S - 2], dtype=jnp.int32)      # sorted descending
    sort_order = jnp.arange(B, dtype=jnp.int32)
    org_ids = jax.random.randint(k3, (B, S), 1, V, dtype=jnp.int32)
    simp_sent = jax.random.randint(k4, (B, M), 1, V, dtype=jnp.int32)
    # gold edit sequences (values < vocab); chosen so the loop runs to the end
    input_edits = jnp.array([[4, 1, 2, 4, 1, 5],
                             [4, 2, 1, 4, 3, 5]], dtype=jnp.int32)

    logp = editnts_forward(params, org_tokens, org_lengths, sort_order,
                           input_edits, org_ids, org_pos, simp_sent)
    logp = jax.block_until_ready(logp)

    assert logp.shape[0] == B and logp.shape[2] == V
    assert bool(jnp.all(jnp.isfinite(logp)))
    print("KERNEL_OK")
</pallas_src>

<mosaic_0001>
module attributes {stable_mosaic.version = 11 : i64} {
  func.func @_bienc_lstm_kernel(%arg0: i32, %arg1: memref<8x2x128xf32, #tpu.memory_space<vmem>>, %arg2: memref<8x2x128xf32, #tpu.memory_space<vmem>>, %arg3: memref<8x2x1xf32, #tpu.memory_space<vmem>>, %arg4: memref<32x128xbf16, #tpu.memory_space<vmem>>, %arg5: memref<32x128xbf16, #tpu.memory_space<vmem>>, %arg6: memref<8x2x32xf32, #tpu.memory_space<vmem>>, %arg7: memref<8x2x32xf32, #tpu.memory_space<vmem>>, %arg8: memref<2x32xf32, #tpu.memory_space<vmem>>, %arg9: memref<2x32xf32, #tpu.memory_space<vmem>>, %arg10: memref<2x32xf32, #tpu.memory_space<vmem>>, %arg11: memref<2x32xf32, #tpu.memory_space<vmem>>) attributes {dimension_semantics = [#tpu.dimension_semantics<parallel>], iteration_bounds = array<i64: 1>, scalar_prefetch = 0 : i64, scratch_operands = 0 : i64, tpu.core_type = #tpu.core_type<tc>, window_params = [{transform_indices = @transform_0, window_bounds = array<i64: 8, 2, 128>}, {transform_indices = @transform_1, window_bounds = array<i64: 8, 2, 128>}, {transform_indices = @transform_2, window_bounds = array<i64: 8, 2, 1>}, {pipeline_mode = #tpu.pipeline_mode<synchronous>, transform_indices = @transform_3, window_bounds = array<i64: 32, 128>}, {pipeline_mode = #tpu.pipeline_mode<synchronous>, transform_indices = @transform_4, window_bounds = array<i64: 32, 128>}, {transform_indices = @transform_5, window_bounds = array<i64: 8, 2, 32>}, {transform_indices = @transform_6, window_bounds = array<i64: 8, 2, 32>}, {transform_indices = @transform_7, window_bounds = array<i64: 2, 32>}, {transform_indices = @transform_8, window_bounds = array<i64: 2, 32>}, {transform_indices = @transform_9, window_bounds = array<i64: 2, 32>}, {transform_indices = @transform_10, window_bounds = array<i64: 2, 32>}]} {
    %c0 = arith.constant 0 : index
    %c0_0 = arith.constant 0 : index
    %0 = vector.load %arg4[%c0, %c0_0] : memref<32x128xbf16, #tpu.memory_space<vmem>>, vector<32x128xbf16>
    %c0_1 = arith.constant 0 : index
    %c0_2 = arith.constant 0 : index
    %1 = vector.load %arg5[%c0_1, %c0_2] : memref<32x128xbf16, #tpu.memory_space<vmem>>, vector<32x128xbf16>
    %cst = arith.constant 0.000000e+00 : f32
    %2 = vector.broadcast %cst : f32 to vector<2x32xf32>
    %c0_i32 = arith.constant 0 : i32
    %3 = arith.index_cast %c0_i32 : i32 to index
    %c0_3 = arith.constant 0 : index
    %c0_4 = arith.constant 0 : index
    %4 = vector.load %arg3[%3, %c0_3, %c0_4] : memref<8x2x1xf32, #tpu.memory_space<vmem>>, vector<1x2x1xf32>
    %5 = vector.shape_cast %4 : vector<1x2x1xf32> to vector<2x1xf32>
    %cst_5 = arith.constant 0.000000e+00 : f32
    %6 = vector.broadcast %cst_5 : f32 to vector<2x1xf32>
    %7 = arith.cmpf ogt, %5, %6 : vector<2x1xf32>
    %8 = arith.index_cast %c0_i32 : i32 to index
    %c0_6 = arith.constant 0 : index
    %c0_7 = arith.constant 0 : index
    %9 = vector.load %arg1[%8, %c0_6, %c0_7] : memref<8x2x128xf32, #tpu.memory_space<vmem>>, vector<1x2x128xf32>
    %10 = vector.shape_cast %9 : vector<1x2x128xf32> to vector<2x128xf32>
    %11 = arith.truncf %2 : vector<2x32xf32> to vector<2x32xbf16>
    %cst_8 = arith.constant dense<0.000000e+00> : vector<2x128xf32>
    %12 = tpu.matmul %11, %0, %cst_8 {dimension_numbers = #tpu.dot_dimension_numbers<[1], [0], [0], [1], [0, 0, 1, 1], [], []>} : vector<2x32xbf16>, vector<32x128xbf16>, vector<2x128xf32> -> vector<2x128xf32>
    %13 = arith.addf %10, %12 : vector<2x128xf32>
    %14 = vector.extract_strided_slice %13 {offsets = [0, 0], sizes = [2, 32], strides = [1, 1]} : vector<2x128xf32> to vector<2x32xf32>
    %15 = arith.negf %14 : vector<2x32xf32>
    %16 = math.exp %15 : vector<2x32xf32>
    %cst_9 = arith.constant 1.000000e+00 : f32
    %17 = vector.broadcast %cst_9 : f32 to vector<2x32xf32>
    %18 = arith.addf %17, %16 : vector<2x32xf32>
    %19 = arith.divf %17, %18 : vector<2x32xf32>
    %20 = vector.extract_strided_slice %13 {offsets = [0, 32], sizes = [2, 32], strides = [1, 1]} : vector<2x128xf32> to vector<2x32xf32>
    %21 = arith.negf %20 : vector<2x32xf32>
    %22 = math.exp %21 : vector<2x32xf32>
    %cst_10 = arith.constant 1.000000e+00 : f32
    %23 = vector.broadcast %cst_10 : f32 to vector<2x32xf32>
    %24 = arith.addf %23, %22 : vector<2x32xf32>
    %25 = arith.divf %23, %24 : vector<2x32xf32>
    %26 = vector.extract_strided_slice %13 {offsets = [0, 64], sizes = [2, 32], strides = [1, 1]} : vector<2x128xf32> to vector<2x32xf32>
    %27 = math.tanh %26 : vector<2x32xf32>
    %28 = vector.extract_strided_slice %13 {offsets = [0, 96], sizes = [2, 32], strides = [1, 1]} : vector<2x128xf32> to vector<2x32xf32>
    %29 = arith.negf %28 : vector<2x32xf32>
    %30 = math.exp %29 : vector<2x32xf32>
    %cst_11 = arith.constant 1.000000e+00 : f32
    %31 = vector.broadcast %cst_11 : f32 to vector<2x32xf32>
    %32 = arith.addf %31, %30 : vector<2x32xf32>
    %33 = arith.divf %31, %32 : vector<2x32xf32>
    %34 = arith.mulf %25, %2 : vector<2x32xf32>
    %35 = arith.mulf %19, %27 : vector<2x32xf32>
    %36 = arith.addf %34, %35 : vector<2x32xf32>
    %37 = math.tanh %36 : vector<2x32xf32>
    %38 = arith.mulf %33, %37 : vector<2x32xf32>
    %c7_i32 = arith.constant 7 : i32
    %39 = arith.subi %c7_i32, %c0_i32 : i32
    %40 = arith.index_cast %39 : i32 to index
    %c0_12 = arith.constant 0 : index
    %c0_13 = arith.constant 0 : index
    %41 = vector.load %arg3[%40, %c0_12, %c0_13] : memref<8x2x1xf32, #tpu.memory_space<vmem>>, vector<1x2x1xf32>
    %42 = vector.shape_cast %41 : vector<1x2x1xf32> to vector<2x1xf32>
    %cst_14 = arith.constant 0.000000e+00 : f32
    %43 = vector.broadcast %cst_14 : f32 to vector<2x1xf32>
    %44 = arith.cmpf ogt, %42, %43 : vector<2x1xf32>
    %45 = arith.index_cast %39 : i32 to index
    %c0_15 = arith.constant 0 : index
    %c0_16 = arith.constant 0 : index
    %46 = vector.load %arg2[%45, %c0_15, %c0_16] : memref<8x2x128xf32, #tpu.memory_space<vmem>>, vector<1x2x128xf32>
    %47 = vector.shape_cast %46 : vector<1x2x128xf32> to vector<2x128xf32>
    %48 = arith.truncf %2 : vector<2x32xf32> to vector<2x32xbf16>
    %cst_17 = arith.constant dense<0.000000e+00> : vector<2x128xf32>
    %49 = tpu.matmul %48, %1, %cst_17 {dimension_numbers = #tpu.dot_dimension_numbers<[1], [0], [0], [1], [0, 0, 1, 1], [], []>} : vector<2x32xbf16>, vector<32x128xbf16>, vector<2x128xf32> -> vector<2x128xf32>
    %50 = arith.addf %47, %49 : vector<2x128xf32>
    %51 = vector.extract_strided_slice %50 {offsets = [0, 0], sizes = [2, 32], strides = [1, 1]} : vector<2x128xf32> to vector<2x32xf32>
    %52 = arith.negf %51 : vector<2x32xf32>
    %53 = math.exp %52 : vector<2x32xf32>
    %cst_18 = arith.constant 1.000000e+00 : f32
    %54 = vector.broadcast %cst_18 : f32 to vector<2x32xf32>
    %55 = arith.addf %54, %53 : vector<2x32xf32>
    %56 = arith.divf %54, %55 : vector<2x32xf32>
    %57 = vector.extract_strided_slice %50 {offsets = [0, 32], sizes = [2, 32], strides = [1, 1]} : vector<2x128xf32> to vector<2x32xf32>
    %58 = arith.negf %57 : vector<2x32xf32>
    %59 = math.exp %58 : vector<2x32xf32>
    %cst_19 = arith.constant 1.000000e+00 : f32
    %60 = vector.broadcast %cst_19 : f32 to vector<2x32xf32>
    %61 = arith.addf %60, %59 : vector<2x32xf32>
    %62 = arith.divf %60, %61 : vector<2x32xf32>
    %63 = vector.extract_strided_slice %50 {offsets = [0, 64], sizes = [2, 32], strides = [1, 1]} : vector<2x128xf32> to vector<2x32xf32>
    %64 = math.tanh %63 : vector<2x32xf32>
    %65 = vector.extract_strided_slice %50 {offsets = [0, 96], sizes = [2, 32], strides = [1, 1]} : vector<2x128xf32> to vector<2x32xf32>
    %66 = arith.negf %65 : vector<2x32xf32>
    %67 = math.exp %66 : vector<2x32xf32>
    %cst_20 = arith.constant 1.000000e+00 : f32
    %68 = vector.broadcast %cst_20 : f32 to vector<2x32xf32>
    %69 = arith.addf %68, %67 : vector<2x32xf32>
    %70 = arith.divf %68, %69 : vector<2x32xf32>
    %71 = arith.mulf %62, %2 : vector<2x32xf32>
    %72 = arith.mulf %56, %64 : vector<2x32xf32>
    %73 = arith.addf %71, %72 : vector<2x32xf32>
    %74 = math.tanh %73 : vector<2x32xf32>
    %75 = arith.mulf %70, %74 : vector<2x32xf32>
    %cst_21 = arith.constant 0.000000e+00 : f32
    %76 = vector.shape_cast %7 : vector<2x1xi1> to vector<2x1xi1>
    %77 = vector.broadcast %76 : vector<2x1xi1> to vector<2x32xi1>
    %78 = vector.broadcast %cst_21 : f32 to vector<2x32xf32>
    %79 = arith.select %77, %38, %78 : vector<2x32xi1>, vector<2x32xf32>
    %80 = arith.index_cast %c0_i32 : i32 to index
    %c0_22 = arith.constant 0 : index
    %c0_23 = arith.constant 0 : index
    %81 = vector.load %arg6[%80, %c0_22, %c0_23] : memref<8x2x32xf32, #tpu.memory_space<vmem>>, vector<1x2x32xf32>
    %82 = vector.shape_cast %81 : vector<1x2x32xf32> to vector<2x32xf32>
    %83 = vector.shape_cast %79 : vector<2x32xf32> to vector<1x2x32xf32>
    tpu.vector_store %arg6[%80, %c0_22, %c0_23], %83 {strides = array<i32>} : memref<8x2x32xf32, #tpu.memory_space<vmem>>, vector<1x2x32xf32>,
    %cst_24 = arith.constant 0.000000e+00 : f32
    %84 = vector.shape_cast %44 : vector<2x1xi1> to vector<2x1xi1>
    %85 = vector.broadcast %84 : vector<2x1xi1> to vector<2x32xi1>
    %86 = vector.broadcast %cst_24 : f32 to vector<2x32xf32>
    %87 = arith.select %85, %75, %86 : vector<2x32xi1>, vector<2x32xf32>
    %88 = arith.index_cast %39 : i32 to index
    %c0_25 = arith.constant 0 : index
    %c0_26 = arith.constant 0 : index
    %89 = vector.load %arg7[%88, %c0_25, %c0_26] : memref<8x2x32xf32, #tpu.memory_space<vmem>>, vector<1x2x32xf32>
    %90 = vector.shape_cast %89 : vector<1x2x32xf32> to vector<2x32xf32>
    %91 = vector.shape_cast %87 : vector<2x32xf32> to vector<1x2x32xf32>
    tpu.vector_store %arg7[%88, %c0_25, %c0_26], %91 {strides = array<i32>} : memref<8x2x32xf32, #tpu.memory_space<vmem>>, vector<1x2x32xf32>,
    %92 = vector.shape_cast %7 : vector<2x1xi1> to vector<2x1xi1>
    %93 = vector.broadcast %92 : vector<2x1xi1> to vector<2x32xi1>
    %94 = arith.select %93, %38, %2 : vector<2x32xi1>, vector<2x32xf32>
    %95 = vector.shape_cast %7 : vector<2x1xi1> to vector<2x1xi1>
    %96 = vector.broadcast %95 : vector<2x1xi1> to vector<2x32xi1>
    %97 = arith.select %96, %36, %2 : vector<2x32xi1>, vector<2x32xf32>
    %98 = vector.shape_cast %44 : vector<2x1xi1> to vector<2x1xi1>
    %99 = vector.broadcast %98 : vector<2x1xi1> to vector<2x32xi1>
    %100 = arith.select %99, %75, %2 : vector<2x32xi1>, vector<2x32xf32>
    %101 = vector.shape_cast %44 : vector<2x1xi1> to vector<2x1xi1>
    %102 = vector.broadcast %101 : vector<2x1xi1> to vector<2x32xi1>
    %103 = arith.select %102, %73, %2 : vector<2x32xi1>, vector<2x32xf32>
    %c1_i32 = arith.constant 1 : i32
    %104 = arith.index_cast %c1_i32 : i32 to index
    %c0_27 = arith.constant 0 : index
    %c0_28 = arith.constant 0 : index
    %105 = vector.load %arg3[%104, %c0_27, %c0_28] : memref<8x2x1xf32, #tpu.memory_space<vmem>>, vector<1x2x1xf32>
    %106 = vector.shape_cast %105 : vector<1x2x1xf32> to vector<2x1xf32>
    %cst_29 = arith.constant 0.000000e+00 : f32
    %107 = vector.broadcast %cst_29 : f32 to vector<2x1xf32>
    %108 = arith.cmpf ogt, %106, %107 : vector<2x1xf32>
    %109 = arith.index_cast %c1_i32 : i32 to index
    %c0_30 = arith.constant 0 : index
    %c0_31 = arith.constant 0 : index
    %110 = vector.load %arg1[%109, %c0_30, %c0_31] : memref<8x2x128xf32, #tpu.memory_space<vmem>>, vector<1x2x128xf32>
    %111 = vector.shape_cast %110 : vector<1x2x128xf32> to vector<2x128xf32>
    %112 = arith.truncf %94 : vector<2x32xf32> to vector<2x32xbf16>
    %cst_32 = arith.constant dense<0.000000e+00> : vector<2x128xf32>
    %113 = tpu.matmul %112, %0, %cst_32 {dimension_numbers = #tpu.dot_dimension_numbers<[1], [0], [0], [1], [0, 0, 1, 1], [], []>} : vector<2x32xbf16>, vector<32x128xbf16>, vector<2x128xf32> -> vector<2x128xf32>
    %114 = arith.addf %111, %113 : vector<2x128xf32>
    %115 = vector.extract_strided_slice %114 {offsets = [0, 0], sizes = [2, 32], strides = [1, 1]} : vector<2x128xf32> to vector<2x32xf32>
    %116 = arith.negf %115 : vector<2x32xf32>
    %117 = math.exp %116 : vector<2x32xf32>
    %cst_33 = arith.constant 1.000000e+00 : f32
    %118 = vector.broadcast %cst_33 : f32 to vector<2x32xf32>
    %119 = arith.addf %118, %117 : vector<2x32xf32>
    %120 = arith.divf %118, %119 : vector<2x32xf32>
    %121 = vector.extract_strided_slice %114 {offsets = [0, 32], sizes = [2, 32], strides = [1, 1]} : vector<2x128xf32> to vector<2x32xf32>
    %122 = arith.negf %121 : vector<2x32xf32>
    %123 = math.exp %122 : vector<2x32xf32>
    %cst_34 = arith.constant 1.000000e+00 : f32
    %124 = vector.broadcast %cst_34 : f32 to vector<2x32xf32>
    %125 = arith.addf %124, %123 : vector<2x32xf32>
    %126 = arith.divf %124, %125 : vector<2x32xf32>
    %127 = vector.extract_strided_slice %114 {offsets = [0, 64], sizes = [2, 32], strides = [1, 1]} : vector<2x128xf32> to vector<2x32xf32>
    %128 = math.tanh %127 : vector<2x32xf32>
    %129 = vector.extract_strided_slice %114 {offsets = [0, 96], sizes = [2, 32], strides = [1, 1]} : vector<2x128xf32> to vector<2x32xf32>
    %130 = arith.negf %129 : vector<2x32xf32>
    %131 = math.exp %130 : vector<2x32xf32>
    %cst_35 = arith.constant 1.000000e+00 : f32
    %132 = vector.broadcast %cst_35 : f32 to vector<2x32xf32>
    %133 = arith.addf %132, %131 : vector<2x32xf32>
    %134 = arith.divf %132, %133 : vector<2x32xf32>
    %135 = arith.mulf %126, %97 : vector<2x32xf32>
    %136 = arith.mulf %120, %128 : vector<2x32xf32>
    %137 = arith.addf %135, %136 : vector<2x32xf32>
    %138 = math.tanh %137 : vector<2x32xf32>
    %139 = arith.mulf %134, %138 : vector<2x32xf32>
    %c7_i32_36 = arith.constant 7 : i32
    %140 = arith.subi %c7_i32_36, %c1_i32 : i32
    %141 = arith.index_cast %140 : i32 to index
    %c0_37 = arith.constant 0 : index
    %c0_38 = arith.constant 0 : index
    %142 = vector.load %arg3[%141, %c0_37, %c0_38] : memref<8x2x1xf32, #tpu.memory_space<vmem>>, vector<1x2x1xf32>
    %143 = vector.shape_cast %142 : vector<1x2x1xf32> to vector<2x1xf32>
    %cst_39 = arith.constant 0.000000e+00 : f32
    %144 = vector.broadcast %cst_39 : f32 to vector<2x1xf32>
    %145 = arith.cmpf ogt, %143, %144 : vector<2x1xf32>
    %146 = arith.index_cast %140 : i32 to index
    %c0_40 = arith.constant 0 : index
    %c0_41 = arith.constant 0 : index
    %147 = vector.load %arg2[%146, %c0_40, %c0_41] : memref<8x2x128xf32, #tpu.memory_space<vmem>>, vector<1x2x128xf32>
    %148 = vector.shape_cast %147 : vector<1x2x128xf32> to vector<2x128xf32>
    %149 = arith.truncf %100 : vector<2x32xf32> to vector<2x32xbf16>
    %cst_42 = arith.constant dense<0.000000e+00> : vector<2x128xf32>
    %150 = tpu.matmul %149, %1, %cst_42 {dimension_numbers = #tpu.dot_dimension_numbers<[1], [0], [0], [1], [0, 0, 1, 1], [], []>} : vector<2x32xbf16>, vector<32x128xbf16>, vector<2x128xf32> -> vector<2x128xf32>
    %151 = arith.addf %148, %150 : vector<2x128xf32>
    %152 = vector.extract_strided_slice %151 {offsets = [0, 0], sizes = [2, 32], strides = [1, 1]} : vector<2x128xf32> to vector<2x32xf32>
    %153 = arith.negf %152 : vector<2x32xf32>
    %154 = math.exp %153 : vector<2x32xf32>
    %cst_43 = arith.constant 1.000000e+00 : f32
    %155 = vector.broadcast %cst_43 : f32 to vector<2x32xf32>
    %156 = arith.addf %155, %154 : vector<2x32xf32>
    %157 = arith.divf %155, %156 : vector<2x32xf32>
    %158 = vector.extract_strided_slice %151 {offsets = [0, 32], sizes = [2, 32], strides = [1, 1]} : vector<2x128xf32> to vector<2x32xf32>
    %159 = arith.negf %158 : vector<2x32xf32>
    %160 = math.exp %159 : vector<2x32xf32>
    %cst_44 = arith.constant 1.000000e+00 : f32
    %161 = vector.broadcast %cst_44 : f32 to vector<2x32xf32>
    %162 = arith.addf %161, %160 : vector<2x32xf32>
    %163 = arith.divf %161, %162 : vector<2x32xf32>
    %164 = vector.extract_strided_slice %151 {offsets = [0, 64], sizes = [2, 32], strides = [1, 1]} : vector<2x128xf32> to vector<2x32xf32>
    %165 = math.tanh %164 : vector<2x32xf32>
    %166 = vector.extract_strided_slice %151 {offsets = [0, 96], sizes = [2, 32], strides = [1, 1]} : vector<2x128xf32> to vector<2x32xf32>
    %167 = arith.negf %166 : vector<2x32xf32>
    %168 = math.exp %167 : vector<2x32xf32>
    %cst_45 = arith.constant 1.000000e+00 : f32
    %169 = vector.broadcast %cst_45 : f32 to vector<2x32xf32>
    %170 = arith.addf %169, %168 : vector<2x32xf32>
    %171 = arith.divf %169, %170 : vector<2x32xf32>
    %172 = arith.mulf %163, %103 : vector<2x32xf32>
    %173 = arith.mulf %157, %165 : vector<2x32xf32>
    %174 = arith.addf %172, %173 : vector<2x32xf32>
    %175 = math.tanh %174 : vector<2x32xf32>
    %176 = arith.mulf %171, %175 : vector<2x32xf32>
    %cst_46 = arith.constant 0.000000e+00 : f32
    %177 = vector.shape_cast %108 : vector<2x1xi1> to vector<2x1xi1>
    %178 = vector.broadcast %177 : vector<2x1xi1> to vector<2x32xi1>
    %179 = vector.broadcast %cst_46 : f32 to vector<2x32xf32>
    %180 = arith.select %178, %139, %179 : vector<2x32xi1>, vector<2x32xf32>
    %181 = arith.index_cast %c1_i32 : i32 to index
    %c0_47 = arith.constant 0 : index
    %c0_48 = arith.constant 0 : index
    %182 = vector.load %arg6[%181, %c0_47, %c0_48] : memref<8x2x32xf32, #tpu.memory_space<vmem>>, vector<1x2x32xf32>
    %183 = vector.shape_cast %182 : vector<1x2x32xf32> to vector<2x32xf32>
    %184 = vector.shape_cast %180 : vector<2x32xf32> to vector<1x2x32xf32>
    tpu.vector_store %arg6[%181, %c0_47, %c0_48], %184 {strides = array<i32>} : memref<8x2x32xf32, #tpu.memory_space<vmem>>, vector<1x2x32xf32>,
    %cst_49 = arith.constant 0.000000e+00 : f32
    %185 = vector.shape_cast %145 : vector<2x1xi1> to vector<2x1xi1>
    %186 = vector.broadcast %185 : vector<2x1xi1> to vector<2x32xi1>
    %187 = vector.broadcast %cst_49 : f32 to vector<2x32xf32>
    %188 = arith.select %186, %176, %187 : vector<2x32xi1>, vector<2x32xf32>
    %189 = arith.index_cast %140 : i32 to index
    %c0_50 = arith.constant 0 : index
    %c0_51 = arith.constant 0 : index
    %190 = vector.load %arg7[%189, %c0_50, %c0_51] : memref<8x2x32xf32, #tpu.memory_space<vmem>>, vector<1x2x32xf32>
    %191 = vector.shape_cast %190 : vector<1x2x32xf32> to vector<2x32xf32>
    %192 = vector.shape_cast %188 : vector<2x32xf32> to vector<1x2x32xf32>
    tpu.vector_store %arg7[%189, %c0_50, %c0_51], %192 {strides = array<i32>} : memref<8x2x32xf32, #tpu.memory_space<vmem>>, vector<1x2x32xf32>,
    %193 = vector.shape_cast %108 : vector<2x1xi1> to vector<2x1xi1>
    %194 = vector.broadcast %193 : vector<2x1xi1> to vector<2x32xi1>
    %195 = arith.select %194, %139, %94 : vector<2x32xi1>, vector<2x32xf32>
    %196 = vector.shape_cast %108 : vector<2x1xi1> to vector<2x1xi1>
    %197 = vector.broadcast %196 : vector<2x1xi1> to vector<2x32xi1>
    %198 = arith.select %197, %137, %97 : vector<2x32xi1>, vector<2x32xf32>
    %199 = vector.shape_cast %145 : vector<2x1xi1> to vector<2x1xi1>
    %200 = vector.broadcast %199 : vector<2x1xi1> to vector<2x32xi1>
    %201 = arith.select %200, %176, %100 : vector<2x32xi1>, vector<2x32xf32>
    %202 = vector.shape_cast %145 : vector<2x1xi1> to vector<2x1xi1>
    %203 = vector.broadcast %202 : vector<2x1xi1> to vector<2x32xi1>
    %204 = arith.select %203, %174, %103 : vector<2x32xi1>, vector<2x32xf32>
    %c2_i32 = arith.constant 2 : i32
    %205 = arith.index_cast %c2_i32 : i32 to index
    %c0_52 = arith.constant 0 : index
    %c0_53 = arith.constant 0 : index
    %206 = vector.load %arg3[%205, %c0_52, %c0_53] : memref<8x2x1xf32, #tpu.memory_space<vmem>>, vector<1x2x1xf32>
    %207 = vector.shape_cast %206 : vector<1x2x1xf32> to vector<2x1xf32>
    %cst_54 = arith.constant 0.000000e+00 : f32
    %208 = vector.broadcast %cst_54 : f32 to vector<2x1xf32>
    %209 = arith.cmpf ogt, %207, %208 : vector<2x1xf32>
    %210 = arith.index_cast %c2_i32 : i32 to index
    %c0_55 = arith.constant 0 : index
    %c0_56 = arith.constant 0 : index
    %211 = vector.load %arg1[%210, %c0_55, %c0_56] : memref<8x2x128xf32, #tpu.memory_space<vmem>>, vector<1x2x128xf32>
    %212 = vector.shape_cast %211 : vector<1x2x128xf32> to vector<2x128xf32>
    %213 = arith.truncf %195 : vector<2x32xf32> to vector<2x32xbf16>
    %cst_57 = arith.constant dense<0.000000e+00> : vector<2x128xf32>
    %214 = tpu.matmul %213, %0, %cst_57 {dimension_numbers = #tpu.dot_dimension_numbers<[1], [0], [0], [1], [0, 0, 1, 1], [], []>} : vector<2x32xbf16>, vector<32x128xbf16>, vector<2x128xf32> -> vector<2x128xf32>
    %215 = arith.addf %212, %214 : vector<2x128xf32>
    %216 = vector.extract_strided_slice %215 {offsets = [0, 0], sizes = [2, 32], strides = [1, 1]} : vector<2x128xf32> to vector<2x32xf32>
    %217 = arith.negf %216 : vector<2x32xf32>
    %218 = math.exp %217 : vector<2x32xf32>
    %cst_58 = arith.constant 1.000000e+00 : f32
    %219 = vector.broadcast %cst_58 : f32 to vector<2x32xf32>
    %220 = arith.addf %219, %218 : vector<2x32xf32>
    %221 = arith.divf %219, %220 : vector<2x32xf32>
    %222 = vector.extract_strided_slice %215 {offsets = [0, 32], sizes = [2, 32], strides = [1, 1]} : vector<2x128xf32> to vector<2x32xf32>
    %223 = arith.negf %222 : vector<2x32xf32>
    %224 = math.exp %223 : vector<2x32xf32>
    %cst_59 = arith.constant 1.000000e+00 : f32
    %225 = vector.broadcast %cst_59 : f32 to vector<2x32xf32>
    %226 = arith.addf %225, %224 : vector<2x32xf32>
    %227 = arith.divf %225, %226 : vector<2x32xf32>
    %228 = vector.extract_strided_slice %215 {offsets = [0, 64], sizes = [2, 32], strides = [1, 1]} : vector<2x128xf32> to vector<2x32xf32>
    %229 = math.tanh %228 : vector<2x32xf32>
    %230 = vector.extract_strided_slice %215 {offsets = [0, 96], sizes = [2, 32], strides = [1, 1]} : vector<2x128xf32> to vector<2x32xf32>
    %231 = arith.negf %230 : vector<2x32xf32>
    %232 = math.exp %231 : vector<2x32xf32>
    %cst_60 = arith.constant 1.000000e+00 : f32
    %233 = vector.broadcast %cst_60 : f32 to vector<2x32xf32>
    %234 = arith.addf %233, %232 : vector<2x32xf32>
    %235 = arith.divf %233, %234 : vector<2x32xf32>
    %236 = arith.mulf %227, %198 : vector<2x32xf32>
    %237 = arith.mulf %221, %229 : vector<2x32xf32>
    %238 = arith.addf %236, %237 : vector<2x32xf32>
    %239 = math.tanh %238 : vector<2x32xf32>
    %240 = arith.mulf %235, %239 : vector<2x32xf32>
    %c7_i32_61 = arith.constant 7 : i32
    %241 = arith.subi %c7_i32_61, %c2_i32 : i32
    %242 = arith.index_cast %241 : i32 to index
    %c0_62 = arith.constant 0 : index
    %c0_63 = arith.constant 0 : index
    %243 = vector.load %arg3[%242, %c0_62, %c0_63] : memref<8x2x1xf32, #tpu.memory_space<vmem>>, vector<1x2x1xf32>
    %244 = vector.shape_cast %243 : vector<1x2x1xf32> to vector<2x1xf32>
    %cst_64 = arith.constant 0.000000e+00 : f32
    %245 = vector.broadcast %cst_64 : f32 to vector<2x1xf32>
    %246 = arith.cmpf ogt, %244, %245 : vector<2x1xf32>
    %247 = arith.index_cast %241 : i32 to index
    %c0_65 = arith.constant 0 : index
    %c0_66 = arith.constant 0 : index
    %248 = vector.load %arg2[%247, %c0_65, %c0_66] : memref<8x2x128xf32, #tpu.memory_space<vmem>>, vector<1x2x128xf32>
    %249 = vector.shape_cast %248 : vector<1x2x128xf32> to vector<2x128xf32>
    %250 = arith.truncf %201 : vector<2x32xf32> to vector<2x32xbf16>
    %cst_67 = arith.constant dense<0.000000e+00> : vector<2x128xf32>
    %251 = tpu.matmul %250, %1, %cst_67 {dimension_numbers = #tpu.dot_dimension_numbers<[1], [0], [0], [1], [0, 0, 1, 1], [], []>} : vector<2x32xbf16>, vector<32x128xbf16>, vector<2x128xf32> -> vector<2x128xf32>
    %252 = arith.addf %249, %251 : vector<2x128xf32>
    %253 = vector.extract_strided_slice %252 {offsets = [0, 0], sizes = [2, 32], strides = [1, 1]} : vector<2x128xf32> to vector<2x32xf32>
    %254 = arith.negf %253 : vector<2x32xf32>
    %255 = math.exp %254 : vector<2x32xf32>
    %cst_68 = arith.constant 1.000000e+00 : f32
    %256 = vector.broadcast %cst_68 : f32 to vector<2x32xf32>
    %257 = arith.addf %256, %255 : vector<2x32xf32>
    %258 = arith.divf %256, %257 : vector<2x32xf32>
    %259 = vector.extract_strided_slice %252 {offsets = [0, 32], sizes = [2, 32], strides = [1, 1]} : vector<2x128xf32> to vector<2x32xf32>
    %260 = arith.negf %259 : vector<2x32xf32>
    %261 = math.exp %260 : vector<2x32xf32>
    %cst_69 = arith.constant 1.000000e+00 : f32
    %262 = vector.broadcast %cst_69 : f32 to vector<2x32xf32>
    %263 = arith.addf %262, %261 : vector<2x32xf32>
    %264 = arith.divf %262, %263 : vector<2x32xf32>
    %265 = vector.extract_strided_slice %252 {offsets = [0, 64], sizes = [2, 32], strides = [1, 1]} : vector<2x128xf32> to vector<2x32xf32>
    %266 = math.tanh %265 : vector<2x32xf32>
    %267 = vector.extract_strided_slice %252 {offsets = [0, 96], sizes = [2, 32], strides = [1, 1]} : vector<2x128xf32> to vector<2x32xf32>
    %268 = arith.negf %267 : vector<2x32xf32>
    %269 = math.exp %268 : vector<2x32xf32>
    %cst_70 = arith.constant 1.000000e+00 : f32
    %270 = vector.broadcast %cst_70 : f32 to vector<2x32xf32>
    %271 = arith.addf %270, %269 : vector<2x32xf32>
    %272 = arith.divf %270, %271 : vector<2x32xf32>
    %273 = arith.mulf %264, %204 : vector<2x32xf32>
    %274 = arith.mulf %258, %266 : vector<2x32xf32>
    %275 = arith.addf %273, %274 : vector<2x32xf32>
    %276 = math.tanh %275 : vector<2x32xf32>
    %277 = arith.mulf %272, %276 : vector<2x32xf32>
    %cst_71 = arith.constant 0.000000e+00 : f32
    %278 = vector.shape_cast %209 : vector<2x1xi1> to vector<2x1xi1>
    %279 = vector.broadcast %278 : vector<2x1xi1> to vector<2x32xi1>
    %280 = vector.broadcast %cst_71 : f32 to vector<2x32xf32>
    %281 = arith.select %279, %240, %280 : vector<2x32xi1>, vector<2x32xf32>
    %282 = arith.index_cast %c2_i32 : i32 to index
    %c0_72 = arith.constant 0 : index
    %c0_73 = arith.constant 0 : index
    %283 = vector.load %arg6[%282, %c0_72, %c0_73] : memref<8x2x32xf32, #tpu.memory_space<vmem>>, vector<1x2x32xf32>
    %284 = vector.shape_cast %283 : vector<1x2x32xf32> to vector<2x32xf32>
    %285 = vector.shape_cast %281 : vector<2x32xf32> to vector<1x2x32xf32>
    tpu.vector_store %arg6[%282, %c0_72, %c0_73], %285 {strides = array<i32>} : memref<8x2x32xf32, #tpu.memory_space<vmem>>, vector<1x2x32xf32>,
    %cst_74 = arith.constant 0.000000e+00 : f32
    %286 = vector.shape_cast %246 : vector<2x1xi1> to vector<2x1xi1>
    %287 = vector.broadcast %286 : vector<2x1xi1> to vector<2x32xi1>
    %288 = vector.broadcast %cst_74 : f32 to vector<2x32xf32>
    %289 = arith.select %287, %277, %288 : vector<2x32xi1>, vector<2x32xf32>
    %290 = arith.index_cast %241 : i32 to index
    %c0_75 = arith.constant 0 : index
    %c0_76 = arith.constant 0 : index
    %291 = vector.load %arg7[%290, %c0_75, %c0_76] : memref<8x2x32xf32, #tpu.memory_space<vmem>>, vector<1x2x32xf32>
    %292 = vector.shape_cast %291 : vector<1x2x32xf32> to vector<2x32xf32>
    %293 = vector.shape_cast %289 : vector<2x32xf32> to vector<1x2x32xf32>
    tpu.vector_store %arg7[%290, %c0_75, %c0_76], %293 {strides = array<i32>} : memref<8x2x32xf32, #tpu.memory_space<vmem>>, vector<1x2x32xf32>,
    %294 = vector.shape_cast %209 : vector<2x1xi1> to vector<2x1xi1>
    %295 = vector.broadcast %294 : vector<2x1xi1> to vector<2x32xi1>
    %296 = arith.select %295, %240, %195 : vector<2x32xi1>, vector<2x32xf32>
    %297 = vector.shape_cast %209 : vector<2x1xi1> to vector<2x1xi1>
    %298 = vector.broadcast %297 : vector<2x1xi1> to vector<2x32xi1>
    %299 = arith.select %298, %238, %198 : vector<2x32xi1>, vector<2x32xf32>
    %300 = vector.shape_cast %246 : vector<2x1xi1> to vector<2x1xi1>
    %301 = vector.broadcast %300 : vector<2x1xi1> to vector<2x32xi1>
    %302 = arith.select %301, %277, %201 : vector<2x32xi1>, vector<2x32xf32>
    %303 = vector.shape_cast %246 : vector<2x1xi1> to vector<2x1xi1>
    %304 = vector.broadcast %303 : vector<2x1xi1> to vector<2x32xi1>
    %305 = arith.select %304, %275, %204 : vector<2x32xi1>, vector<2x32xf32>
    %c3_i32 = arith.constant 3 : i32
    %306 = arith.index_cast %c3_i32 : i32 to index
    %c0_77 = arith.constant 0 : index
    %c0_78 = arith.constant 0 : index
    %307 = vector.load %arg3[%306, %c0_77, %c0_78] : memref<8x2x1xf32, #tpu.memory_space<vmem>>, vector<1x2x1xf32>
    %308 = vector.shape_cast %307 : vector<1x2x1xf32> to vector<2x1xf32>
    %cst_79 = arith.constant 0.000000e+00 : f32
    %309 = vector.broadcast %cst_79 : f32 to vector<2x1xf32>
    %310 = arith.cmpf ogt, %308, %309 : vector<2x1xf32>
    %311 = arith.index_cast %c3_i32 : i32 to index
    %c0_80 = arith.constant 0 : index
    %c0_81 = arith.constant 0 : index
    %312 = vector.load %arg1[%311, %c0_80, %c0_81] : memref<8x2x128xf32, #tpu.memory_space<vmem>>, vector<1x2x128xf32>
    %313 = vector.shape_cast %312 : vector<1x2x128xf32> to vector<2x128xf32>
    %314 = arith.truncf %296 : vector<2x32xf32> to vector<2x32xbf16>
    %cst_82 = arith.constant dense<0.000000e+00> : vector<2x128xf32>
    %315 = tpu.matmul %314, %0, %cst_82 {dimension_numbers = #tpu.dot_dimension_numbers<[1], [0], [0], [1], [0, 0, 1, 1], [], []>} : vector<2x32xbf16>, vector<32x128xbf16>, vector<2x128xf32> -> vector<2x128xf32>
    %316 = arith.addf %313, %315 : vector<2x128xf32>
    %317 = vector.extract_strided_slice %316 {offsets = [0, 0], sizes = [2, 32], strides = [1, 1]} : vector<2x128xf32> to vector<2x32xf32>
    %318 = arith.negf %317 : vector<2x32xf32>
    %319 = math.exp %318 : vector<2x32xf32>
    %cst_83 = arith.constant 1.000000e+00 : f32
    %320 = vector.broadcast %cst_83 : f32 to vector<2x32xf32>
    %321 = arith.addf %320, %319 : vector<2x32xf32>
    %322 = arith.divf %320, %321 : vector<2x32xf32>
    %323 = vector.extract_strided_slice %316 {offsets = [0, 32], sizes = [2, 32], strides = [1, 1]} : vector<2x128xf32> to vector<2x32xf32>
    %324 = arith.negf %323 : vector<2x32xf32>
    %325 = math.exp %324 : vector<2x32xf32>
    %cst_84 = arith.constant 1.000000e+00 : f32
    %326 = vector.broadcast %cst_84 : f32 to vector<2x32xf32>
    %327 = arith.addf %326, %325 : vector<2x32xf32>
    %328 = arith.divf %326, %327 : vector<2x32xf32>
    %329 = vector.extract_strided_slice %316 {offsets = [0, 64], sizes = [2, 32], strides = [1, 1]} : vector<2x128xf32> to vector<2x32xf32>
    %330 = math.tanh %329 : vector<2x32xf32>
    %331 = vector.extract_strided_slice %316 {offsets = [0, 96], sizes = [2, 32], strides = [1, 1]} : vector<2x128xf32> to vector<2x32xf32>
    %332 = arith.negf %331 : vector<2x32xf32>
    %333 = math.exp %332 : vector<2x32xf32>
    %cst_85 = arith.constant 1.000000e+00 : f32
    %334 = vector.broadcast %cst_85 : f32 to vector<2x32xf32>
    %335 = arith.addf %334, %333 : vector<2x32xf32>
    %336 = arith.divf %334, %335 : vector<2x32xf32>
    %337 = arith.mulf %328, %299 : vector<2x32xf32>
    %338 = arith.mulf %322, %330 : vector<2x32xf32>
    %339 = arith.addf %337, %338 : vector<2x32xf32>
    %340 = math.tanh %339 : vector<2x32xf32>
    %341 = arith.mulf %336, %340 : vector<2x32xf32>
    %c7_i32_86 = arith.constant 7 : i32
    %342 = arith.subi %c7_i32_86, %c3_i32 : i32
    %343 = arith.index_cast %342 : i32 to index
    %c0_87 = arith.constant 0 : index
    %c0_88 = arith.constant 0 : index
    %344 = vector.load %arg3[%343, %c0_87, %c0_88] : memref<8x2x1xf32, #tpu.memory_space<vmem>>, vector<1x2x1xf32>
    %345 = vector.shape_cast %344 : vector<1x2x1xf32> to vector<2x1xf32>
    %cst_89 = arith.constant 0.000000e+00 : f32
    %346 = vector.broadcast %cst_89 : f32 to vector<2x1xf32>
    %347 = arith.cmpf ogt, %345, %346 : vector<2x1xf32>
    %348 = arith.index_cast %342 : i32 to index
    %c0_90 = arith.constant 0 : index
    %c0_91 = arith.constant 0 : index
    %349 = vector.load %arg2[%348, %c0_90, %c0_91] : memref<8x2x128xf32, #tpu.memory_space<vmem>>, vector<1x2x128xf32>
    %350 = vector.shape_cast %349 : vector<1x2x128xf32> to vector<2x128xf32>
    %351 = arith.truncf %302 : vector<2x32xf32> to vector<2x32xbf16>
    %cst_92 = arith.constant dense<0.000000e+00> : vector<2x128xf32>
    %352 = tpu.matmul %351, %1, %cst_92 {dimension_numbers = #tpu.dot_dimension_numbers<[1], [0], [0], [1], [0, 0, 1, 1], [], []>} : vector<2x32xbf16>, vector<32x128xbf16>, vector<2x128xf32> -> vector<2x128xf32>
    %353 = arith.addf %350, %352 : vector<2x128xf32>
    %354 = vector.extract_strided_slice %353 {offsets = [0, 0], sizes = [2, 32], strides = [1, 1]} : vector<2x128xf32> to vector<2x32xf32>
    %355 = arith.negf %354 : vector<2x32xf32>
    %356 = math.exp %355 : vector<2x32xf32>
    %cst_93 = arith.constant 1.000000e+00 : f32
    %357 = vector.broadcast %cst_93 : f32 to vector<2x32xf32>
    %358 = arith.addf %357, %356 : vector<2x32xf32>
    %359 = arith.divf %357, %358 : vector<2x32xf32>
    %360 = vector.extract_strided_slice %353 {offsets = [0, 32], sizes = [2, 32], strides = [1, 1]} : vector<2x128xf32> to vector<2x32xf32>
    %361 = arith.negf %360 : vector<2x32xf32>
    %362 = math.exp %361 : vector<2x32xf32>
    %cst_94 = arith.constant 1.000000e+00 : f32
    %363 = vector.broadcast %cst_94 : f32 to vector<2x32xf32>
    %364 = arith.addf %363, %362 : vector<2x32xf32>
    %365 = arith.divf %363, %364 : vector<2x32xf32>
    %366 = vector.extract_strided_slice %353 {offsets = [0, 64], sizes = [2, 32], strides = [1, 1]} : vector<2x128xf32> to vector<2x32xf32>
    %367 = math.tanh %366 : vector<2x32xf32>
    %368 = vector.extract_strided_slice %353 {offsets = [0, 96], sizes = [2, 32], strides = [1, 1]} : vector<2x128xf32> to vector<2x32xf32>
    %369 = arith.negf %368 : vector<2x32xf32>
    %370 = math.exp %369 : vector<2x32xf32>
    %cst_95 = arith.constant 1.000000e+00 : f32
    %371 = vector.broadcast %cst_95 : f32 to vector<2x32xf32>
    %372 = arith.addf %371, %370 : vector<2x32xf32>
    %373 = arith.divf %371, %372 : vector<2x32xf32>
    %374 = arith.mulf %365, %305 : vector<2x32xf32>
    %375 = arith.mulf %359, %367 : vector<2x32xf32>
    %376 = arith.addf %374, %375 : vector<2x32xf32>
    %377 = math.tanh %376 : vector<2x32xf32>
    %378 = arith.mulf %373, %377 : vector<2x32xf32>
    %cst_96 = arith.constant 0.000000e+00 : f32
    %379 = vector.shape_cast %310 : vector<2x1xi1> to vector<2x1xi1>
    %380 = vector.broadcast %379 : vector<2x1xi1> to vector<2x32xi1>
    %381 = vector.broadcast %cst_96 : f32 to vector<2x32xf32>
    %382 = arith.select %380, %341, %381 : vector<2x32xi1>, vector<2x32xf32>
    %383 = arith.index_cast %c3_i32 : i32 to index
    %c0_97 = arith.constant 0 : index
    %c0_98 = arith.constant 0 : index
    %384 = vector.load %arg6[%383, %c0_97, %c0_98] : memref<8x2x32xf32, #tpu.memory_space<vmem>>, vector<1x2x32xf32>
    %385 = vector.shape_cast %384 : vector<1x2x32xf32> to vector<2x32xf32>
    %386 = vector.shape_cast %382 : vector<2x32xf32> to vector<1x2x32xf32>
    tpu.vector_store %arg6[%383, %c0_97, %c0_98], %386 {strides = array<i32>} : memref<8x2x32xf32, #tpu.memory_space<vmem>>, vector<1x2x32xf32>,
    %cst_99 = arith.constant 0.000000e+00 : f32
    %387 = vector.shape_cast %347 : vector<2x1xi1> to vector<2x1xi1>
    %388 = vector.broadcast %387 : vector<2x1xi1> to vector<2x32xi1>
    %389 = vector.broadcast %cst_99 : f32 to vector<2x32xf32>
    %390 = arith.select %388, %378, %389 : vector<2x32xi1>, vector<2x32xf32>
    %391 = arith.index_cast %342 : i32 to index
    %c0_100 = arith.constant 0 : index
    %c0_101 = arith.constant 0 : index
    %392 = vector.load %arg7[%391, %c0_100, %c0_101] : memref<8x2x32xf32, #tpu.memory_space<vmem>>, vector<1x2x32xf32>
    %393 = vector.shape_cast %392 : vector<1x2x32xf32> to vector<2x32xf32>
    %394 = vector.shape_cast %390 : vector<2x32xf32> to vector<1x2x32xf32>
    tpu.vector_store %arg7[%391, %c0_100, %c0_101], %394 {strides = array<i32>} : memref<8x2x32xf32, #tpu.memory_space<vmem>>, vector<1x2x32xf32>,
    %395 = vector.shape_cast %310 : vector<2x1xi1> to vector<2x1xi1>
    %396 = vector.broadcast %395 : vector<2x1xi1> to vector<2x32xi1>
    %397 = arith.select %396, %341, %296 : vector<2x32xi1>, vector<2x32xf32>
    %398 = vector.shape_cast %310 : vector<2x1xi1> to vector<2x1xi1>
    %399 = vector.broadcast %398 : vector<2x1xi1> to vector<2x32xi1>
    %400 = arith.select %399, %339, %299 : vector<2x32xi1>, vector<2x32xf32>
    %401 = vector.shape_cast %347 : vector<2x1xi1> to vector<2x1xi1>
    %402 = vector.broadcast %401 : vector<2x1xi1> to vector<2x32xi1>
    %403 = arith.select %402, %378, %302 : vector<2x32xi1>, vector<2x32xf32>
    %404 = vector.shape_cast %347 : vector<2x1xi1> to vector<2x1xi1>
    %405 = vector.broadcast %404 : vector<2x1xi1> to vector<2x32xi1>
    %406 = arith.select %405, %376, %305 : vector<2x32xi1>, vector<2x32xf32>
    %c4_i32 = arith.constant 4 : i32
    %407 = arith.index_cast %c4_i32 : i32 to index
    %c0_102 = arith.constant 0 : index
    %c0_103 = arith.constant 0 : index
    %408 = vector.load %arg3[%407, %c0_102, %c0_103] : memref<8x2x1xf32, #tpu.memory_space<vmem>>, vector<1x2x1xf32>
    %409 = vector.shape_cast %408 : vector<1x2x1xf32> to vector<2x1xf32>
    %cst_104 = arith.constant 0.000000e+00 : f32
    %410 = vector.broadcast %cst_104 : f32 to vector<2x1xf32>
    %411 = arith.cmpf ogt, %409, %410 : vector<2x1xf32>
    %412 = arith.index_cast %c4_i32 : i32 to index
    %c0_105 = arith.constant 0 : index
    %c0_106 = arith.constant 0 : index
    %413 = vector.load %arg1[%412, %c0_105, %c0_106] : memref<8x2x128xf32, #tpu.memory_space<vmem>>, vector<1x2x128xf32>
    %414 = vector.shape_cast %413 : vector<1x2x128xf32> to vector<2x128xf32>
    %415 = arith.truncf %397 : vector<2x32xf32> to vector<2x32xbf16>
    %cst_107 = arith.constant dense<0.000000e+00> : vector<2x128xf32>
    %416 = tpu.matmul %415, %0, %cst_107 {dimension_numbers = #tpu.dot_dimension_numbers<[1], [0], [0], [1], [0, 0, 1, 1], [], []>} : vector<2x32xbf16>, vector<32x128xbf16>, vector<2x128xf32> -> vector<2x128xf32>
    %417 = arith.addf %414, %416 : vector<2x128xf32>
    %418 = vector.extract_strided_slice %417 {offsets = [0, 0], sizes = [2, 32], strides = [1, 1]} : vector<2x128xf32> to vector<2x32xf32>
    %419 = arith.negf %418 : vector<2x32xf32>
    %420 = math.exp %419 : vector<2x32xf32>
    %cst_108 = arith.constant 1.000000e+00 : f32
    %421 = vector.broadcast %cst_108 : f32 to vector<2x32xf32>
    %422 = arith.addf %421, %420 : vector<2x32xf32>
    %423 = arith.divf %421, %422 : vector<2x32xf32>
    %424 = vector.extract_strided_slice %417 {offsets = [0, 32], sizes = [2, 32], strides = [1, 1]} : vector<2x128xf32> to vector<2x32xf32>
    %425 = arith.negf %424 : vector<2x32xf32>
    %426 = math.exp %425 : vector<2x32xf32>
    %cst_109 = arith.constant 1.000000e+00 : f32
    %427 = vector.broadcast %cst_109 : f32 to vector<2x32xf32>
    %428 = arith.addf %427, %426 : vector<2x32xf32>
    %429 = arith.divf %427, %428 : vector<2x32xf32>
    %430 = vector.extract_strided_slice %417 {offsets = [0, 64], sizes = [2, 32], strides = [1, 1]} : vector<2x128xf32> to vector<2x32xf32>
    %431 = math.tanh %430 : vector<2x32xf32>
    %432 = vector.extract_strided_slice %417 {offsets = [0, 96], sizes = [2, 32], strides = [1, 1]} : vector<2x128xf32> to vector<2x32xf32>
    %433 = arith.negf %432 : vector<2x32xf32>
    %434 = math.exp %433 : vector<2x32xf32>
    %cst_110 = arith.constant 1.000000e+00 : f32
    %435 = vector.broadcast %cst_110 : f32 to vector<2x32xf32>
    %436 = arith.addf %435, %434 : vector<2x32xf32>
    %437 = arith.divf %435, %436 : vector<2x32xf32>
    %438 = arith.mulf %429, %400 : vector<2x32xf32>
    %439 = arith.mulf %423, %431 : vector<2x32xf32>
    %440 = arith.addf %438, %439 : vector<2x32xf32>
    %441 = math.tanh %440 : vector<2x32xf32>
    %442 = arith.mulf %437, %441 : vector<2x32xf32>
    %c7_i32_111 = arith.constant 7 : i32
    %443 = arith.subi %c7_i32_111, %c4_i32 : i32
    %444 = arith.index_cast %443 : i32 to index
    %c0_112 = arith.constant 0 : index
    %c0_113 = arith.constant 0 : index
    %445 = vector.load %arg3[%444, %c0_112, %c0_113] : memref<8x2x1xf32, #tpu.memory_space<vmem>>, vector<1x2x1xf32>
    %446 = vector.shape_cast %445 : vector<1x2x1xf32> to vector<2x1xf32>
    %cst_114 = arith.constant 0.000000e+00 : f32
    %447 = vector.broadcast %cst_114 : f32 to vector<2x1xf32>
    %448 = arith.cmpf ogt, %446, %447 : vector<2x1xf32>
    %449 = arith.index_cast %443 : i32 to index
    %c0_115 = arith.constant 0 : index
    %c0_116 = arith.constant 0 : index
    %450 = vector.load %arg2[%449, %c0_115, %c0_116] : memref<8x2x128xf32, #tpu.memory_space<vmem>>, vector<1x2x128xf32>
    %451 = vector.shape_cast %450 : vector<1x2x128xf32> to vector<2x128xf32>
    %452 = arith.truncf %403 : vector<2x32xf32> to vector<2x32xbf16>
    %cst_117 = arith.constant dense<0.000000e+00> : vector<2x128xf32>
    %453 = tpu.matmul %452, %1, %cst_117 {dimension_numbers = #tpu.dot_dimension_numbers<[1], [0], [0], [1], [0, 0, 1, 1], [], []>} : vector<2x32xbf16>, vector<32x128xbf16>, vector<2x128xf32> -> vector<2x128xf32>
    %454 = arith.addf %451, %453 : vector<2x128xf32>
    %455 = vector.extract_strided_slice %454 {offsets = [0, 0], sizes = [2, 32], strides = [1, 1]} : vector<2x128xf32> to vector<2x32xf32>
    %456 = arith.negf %455 : vector<2x32xf32>
    %457 = math.exp %456 : vector<2x32xf32>
    %cst_118 = arith.constant 1.000000e+00 : f32
    %458 = vector.broadcast %cst_118 : f32 to vector<2x32xf32>
    %459 = arith.addf %458, %457 : vector<2x32xf32>
    %460 = arith.divf %458, %459 : vector<2x32xf32>
    %461 = vector.extract_strided_slice %454 {offsets = [0, 32], sizes = [2, 32], strides = [1, 1]} : vector<2x128xf32> to vector<2x32xf32>
    %462 = arith.negf %461 : vector<2x32xf32>
    %463 = math.exp %462 : vector<2x32xf32>
    %cst_119 = arith.constant 1.000000e+00 : f32
    %464 = vector.broadcast %cst_119 : f32 to vector<2x32xf32>
    %465 = arith.addf %464, %463 : vector<2x32xf32>
    %466 = arith.divf %464, %465 : vector<2x32xf32>
    %467 = vector.extract_strided_slice %454 {offsets = [0, 64], sizes = [2, 32], strides = [1, 1]} : vector<2x128xf32> to vector<2x32xf32>
    %468 = math.tanh %467 : vector<2x32xf32>
    %469 = vector.extract_strided_slice %454 {offsets = [0, 96], sizes = [2, 32], strides = [1, 1]} : vector<2x128xf32> to vector<2x32xf32>
    %470 = arith.negf %469 : vector<2x32xf32>
    %471 = math.exp %470 : vector<2x32xf32>
    %cst_120 = arith.constant 1.000000e+00 : f32
    %472 = vector.broadcast %cst_120 : f32 to vector<2x32xf32>
    %473 = arith.addf %472, %471 : vector<2x32xf32>
    %474 = arith.divf %472, %473 : vector<2x32xf32>
    %475 = arith.mulf %466, %406 : vector<2x32xf32>
    %476 = arith.mulf %460, %468 : vector<2x32xf32>
    %477 = arith.addf %475, %476 : vector<2x32xf32>
    %478 = math.tanh %477 : vector<2x32xf32>
    %479 = arith.mulf %474, %478 : vector<2x32xf32>
    %cst_121 = arith.constant 0.000000e+00 : f32
    %480 = vector.shape_cast %411 : vector<2x1xi1> to vector<2x1xi1>
    %481 = vector.broadcast %480 : vector<2x1xi1> to vector<2x32xi1>
    %482 = vector.broadcast %cst_121 : f32 to vector<2x32xf32>
    %483 = arith.select %481, %442, %482 : vector<2x32xi1>, vector<2x32xf32>
    %484 = arith.index_cast %c4_i32 : i32 to index
    %c0_122 = arith.constant 0 : index
    %c0_123 = arith.constant 0 : index
    %485 = vector.load %arg6[%484, %c0_122, %c0_123] : memref<8x2x32xf32, #tpu.memory_space<vmem>>, vector<1x2x32xf32>
    %486 = vector.shape_cast %485 : vector<1x2x32xf32> to vector<2x32xf32>
    %487 = vector.shape_cast %483 : vector<2x32xf32> to vector<1x2x32xf32>
    tpu.vector_store %arg6[%484, %c0_122, %c0_123], %487 {strides = array<i32>} : memref<8x2x32xf32, #tpu.memory_space<vmem>>, vector<1x2x32xf32>,
    %cst_124 = arith.constant 0.000000e+00 : f32
    %488 = vector.shape_cast %448 : vector<2x1xi1> to vector<2x1xi1>
    %489 = vector.broadcast %488 : vector<2x1xi1> to vector<2x32xi1>
    %490 = vector.broadcast %cst_124 : f32 to vector<2x32xf32>
    %491 = arith.select %489, %479, %490 : vector<2x32xi1>, vector<2x32xf32>
    %492 = arith.index_cast %443 : i32 to index
    %c0_125 = arith.constant 0 : index
    %c0_126 = arith.constant 0 : index
    %493 = vector.load %arg7[%492, %c0_125, %c0_126] : memref<8x2x32xf32, #tpu.memory_space<vmem>>, vector<1x2x32xf32>
    %494 = vector.shape_cast %493 : vector<1x2x32xf32> to vector<2x32xf32>
    %495 = vector.shape_cast %491 : vector<2x32xf32> to vector<1x2x32xf32>
    tpu.vector_store %arg7[%492, %c0_125, %c0_126], %495 {strides = array<i32>} : memref<8x2x32xf32, #tpu.memory_space<vmem>>, vector<1x2x32xf32>,
    %496 = vector.shape_cast %411 : vector<2x1xi1> to vector<2x1xi1>
    %497 = vector.broadcast %496 : vector<2x1xi1> to vector<2x32xi1>
    %498 = arith.select %497, %442, %397 : vector<2x32xi1>, vector<2x32xf32>
    %499 = vector.shape_cast %411 : vector<2x1xi1> to vector<2x1xi1>
    %500 = vector.broadcast %499 : vector<2x1xi1> to vector<2x32xi1>
    %501 = arith.select %500, %440, %400 : vector<2x32xi1>, vector<2x32xf32>
    %502 = vector.shape_cast %448 : vector<2x1xi1> to vector<2x1xi1>
    %503 = vector.broadcast %502 : vector<2x1xi1> to vector<2x32xi1>
    %504 = arith.select %503, %479, %403 : vector<2x32xi1>, vector<2x32xf32>
    %505 = vector.shape_cast %448 : vector<2x1xi1> to vector<2x1xi1>
    %506 = vector.broadcast %505 : vector<2x1xi1> to vector<2x32xi1>
    %507 = arith.select %506, %477, %406 : vector<2x32xi1>, vector<2x32xf32>
    %c5_i32 = arith.constant 5 : i32
    %508 = arith.index_cast %c5_i32 : i32 to index
    %c0_127 = arith.constant 0 : index
    %c0_128 = arith.constant 0 : index
    %509 = vector.load %arg3[%508, %c0_127, %c0_128] : memref<8x2x1xf32, #tpu.memory_space<vmem>>, vector<1x2x1xf32>
    %510 = vector.shape_cast %509 : vector<1x2x1xf32> to vector<2x1xf32>
    %cst_129 = arith.constant 0.000000e+00 : f32
    %511 = vector.broadcast %cst_129 : f32 to vector<2x1xf32>
    %512 = arith.cmpf ogt, %510, %511 : vector<2x1xf32>
    %513 = arith.index_cast %c5_i32 : i32 to index
    %c0_130 = arith.constant 0 : index
    %c0_131 = arith.constant 0 : index
    %514 = vector.load %arg1[%513, %c0_130, %c0_131] : memref<8x2x128xf32, #tpu.memory_space<vmem>>, vector<1x2x128xf32>
    %515 = vector.shape_cast %514 : vector<1x2x128xf32> to vector<2x128xf32>
    %516 = arith.truncf %498 : vector<2x32xf32> to vector<2x32xbf16>
    %cst_132 = arith.constant dense<0.000000e+00> : vector<2x128xf32>
    %517 = tpu.matmul %516, %0, %cst_132 {dimension_numbers = #tpu.dot_dimension_numbers<[1], [0], [0], [1], [0, 0, 1, 1], [], []>} : vector<2x32xbf16>, vector<32x128xbf16>, vector<2x128xf32> -> vector<2x128xf32>
    %518 = arith.addf %515, %517 : vector<2x128xf32>
    %519 = vector.extract_strided_slice %518 {offsets = [0, 0], sizes = [2, 32], strides = [1, 1]} : vector<2x128xf32> to vector<2x32xf32>
    %520 = arith.negf %519 : vector<2x32xf32>
    %521 = math.exp %520 : vector<2x32xf32>
    %cst_133 = arith.constant 1.000000e+00 : f32
    %522 = vector.broadcast %cst_133 : f32 to vector<2x32xf32>
    %523 = arith.addf %522, %521 : vector<2x32xf32>
    %524 = arith.divf %522, %523 : vector<2x32xf32>
    %525 = vector.extract_strided_slice %518 {offsets = [0, 32], sizes = [2, 32], strides = [1, 1]} : vector<2x128xf32> to vector<2x32xf32>
    %526 = arith.negf %525 : vector<2x32xf32>
    %527 = math.exp %526 : vector<2x32xf32>
    %cst_134 = arith.constant 1.000000e+00 : f32
    %528 = vector.broadcast %cst_134 : f32 to vector<2x32xf32>
    %529 = arith.addf %528, %527 : vector<2x32xf32>
    %530 = arith.divf %528, %529 : vector<2x32xf32>
    %531 = vector.extract_strided_slice %518 {offsets = [0, 64], sizes = [2, 32], strides = [1, 1]} : vector<2x128xf32> to vector<2x32xf32>
    %532 = math.tanh %531 : vector<2x32xf32>
    %533 = vector.extract_strided_slice %518 {offsets = [0, 96], sizes = [2, 32], strides = [1, 1]} : vector<2x128xf32> to vector<2x32xf32>
    %534 = arith.negf %533 : vector<2x32xf32>
    %535 = math.exp %534 : vector<2x32xf32>
    %cst_135 = arith.constant 1.000000e+00 : f32
    %536 = vector.broadcast %cst_135 : f32 to vector<2x32xf32>
    %537 = arith.addf %536, %535 : vector<2x32xf32>
    %538 = arith.divf %536, %537 : vector<2x32xf32>
    %539 = arith.mulf %530, %501 : vector<2x32xf32>
    %540 = arith.mulf %524, %532 : vector<2x32xf32>
    %541 = arith.addf %539, %540 : vector<2x32xf32>
    %542 = math.tanh %541 : vector<2x32xf32>
    %543 = arith.mulf %538, %542 : vector<2x32xf32>
    %c7_i32_136 = arith.constant 7 : i32
    %544 = arith.subi %c7_i32_136, %c5_i32 : i32
    %545 = arith.index_cast %544 : i32 to index
    %c0_137 = arith.constant 0 : index
    %c0_138 = arith.constant 0 : index
    %546 = vector.load %arg3[%545, %c0_137, %c0_138] : memref<8x2x1xf32, #tpu.memory_space<vmem>>, vector<1x2x1xf32>
    %547 = vector.shape_cast %546 : vector<1x2x1xf32> to vector<2x1xf32>
    %cst_139 = arith.constant 0.000000e+00 : f32
    %548 = vector.broadcast %cst_139 : f32 to vector<2x1xf32>
    %549 = arith.cmpf ogt, %547, %548 : vector<2x1xf32>
    %550 = arith.index_cast %544 : i32 to index
    %c0_140 = arith.constant 0 : index
    %c0_141 = arith.constant 0 : index
    %551 = vector.load %arg2[%550, %c0_140, %c0_141] : memref<8x2x128xf32, #tpu.memory_space<vmem>>, vector<1x2x128xf32>
    %552 = vector.shape_cast %551 : vector<1x2x128xf32> to vector<2x128xf32>
    %553 = arith.truncf %504 : vector<2x32xf32> to vector<2x32xbf16>
    %cst_142 = arith.constant dense<0.000000e+00> : vector<2x128xf32>
    %554 = tpu.matmul %553, %1, %cst_142 {dimension_numbers = #tpu.dot_dimension_numbers<[1], [0], [0], [1], [0, 0, 1, 1], [], []>} : vector<2x32xbf16>, vector<32x128xbf16>, vector<2x128xf32> -> vector<2x128xf32>
    %555 = arith.addf %552, %554 : vector<2x128xf32>
    %556 = vector.extract_strided_slice %555 {offsets = [0, 0], sizes = [2, 32], strides = [1, 1]} : vector<2x128xf32> to vector<2x32xf32>
    %557 = arith.negf %556 : vector<2x32xf32>
    %558 = math.exp %557 : vector<2x32xf32>
    %cst_143 = arith.constant 1.000000e+00 : f32
    %559 = vector.broadcast %cst_143 : f32 to vector<2x32xf32>
    %560 = arith.addf %559, %558 : vector<2x32xf32>
    %561 = arith.divf %559, %560 : vector<2x32xf32>
    %562 = vector.extract_strided_slice %555 {offsets = [0, 32], sizes = [2, 32], strides = [1, 1]} : vector<2x128xf32> to vector<2x32xf32>
    %563 = arith.negf %562 : vector<2x32xf32>
    %564 = math.exp %563 : vector<2x32xf32>
    %cst_144 = arith.constant 1.000000e+00 : f32
    %565 = vector.broadcast %cst_144 : f32 to vector<2x32xf32>
    %566 = arith.addf %565, %564 : vector<2x32xf32>
    %567 = arith.divf %565, %566 : vector<2x32xf32>
    %568 = vector.extract_strided_slice %555 {offsets = [0, 64], sizes = [2, 32], strides = [1, 1]} : vector<2x128xf32> to vector<2x32xf32>
    %569 = math.tanh %568 : vector<2x32xf32>
    %570 = vector.extract_strided_slice %555 {offsets = [0, 96], sizes = [2, 32], strides = [1, 1]} : vector<2x128xf32> to vector<2x32xf32>
    %571 = arith.negf %570 : vector<2x32xf32>
    %572 = math.exp %571 : vector<2x32xf32>
    %cst_145 = arith.constant 1.000000e+00 : f32
    %573 = vector.broadcast %cst_145 : f32 to vector<2x32xf32>
    %574 = arith.addf %573, %572 : vector<2x32xf32>
    %575 = arith.divf %573, %574 : vector<2x32xf32>
    %576 = arith.mulf %567, %507 : vector<2x32xf32>
    %577 = arith.mulf %561, %569 : vector<2x32xf32>
    %578 = arith.addf %576, %577 : vector<2x32xf32>
    %579 = math.tanh %578 : vector<2x32xf32>
    %580 = arith.mulf %575, %579 : vector<2x32xf32>
    %cst_146 = arith.constant 0.000000e+00 : f32
    %581 = vector.shape_cast %512 : vector<2x1xi1> to vector<2x1xi1>
    %582 = vector.broadcast %581 : vector<2x1xi1> to vector<2x32xi1>
    %583 = vector.broadcast %cst_146 : f32 to vector<2x32xf32>
    %584 = arith.select %582, %543, %583 : vector<2x32xi1>, vector<2x32xf32>
    %585 = arith.index_cast %c5_i32 : i32 to index
    %c0_147 = arith.constant 0 : index
    %c0_148 = arith.constant 0 : index
    %586 = vector.load %arg6[%585, %c0_147, %c0_148] : memref<8x2x32xf32, #tpu.memory_space<vmem>>, vector<1x2x32xf32>
    %587 = vector.shape_cast %586 : vector<1x2x32xf32> to vector<2x32xf32>
    %588 = vector.shape_cast %584 : vector<2x32xf32> to vector<1x2x32xf32>
    tpu.vector_store %arg6[%585, %c0_147, %c0_148], %588 {strides = array<i32>} : memref<8x2x32xf32, #tpu.memory_space<vmem>>, vector<1x2x32xf32>,
    %cst_149 = arith.constant 0.000000e+00 : f32
    %589 = vector.shape_cast %549 : vector<2x1xi1> to vector<2x1xi1>
    %590 = vector.broadcast %589 : vector<2x1xi1> to vector<2x32xi1>
    %591 = vector.broadcast %cst_149 : f32 to vector<2x32xf32>
    %592 = arith.select %590, %580, %591 : vector<2x32xi1>, vector<2x32xf32>
    %593 = arith.index_cast %544 : i32 to index
    %c0_150 = arith.constant 0 : index
    %c0_151 = arith.constant 0 : index
    %594 = vector.load %arg7[%593, %c0_150, %c0_151] : memref<8x2x32xf32, #tpu.memory_space<vmem>>, vector<1x2x32xf32>
    %595 = vector.shape_cast %594 : vector<1x2x32xf32> to vector<2x32xf32>
    %596 = vector.shape_cast %592 : vector<2x32xf32> to vector<1x2x32xf32>
    tpu.vector_store %arg7[%593, %c0_150, %c0_151], %596 {strides = array<i32>} : memref<8x2x32xf32, #tpu.memory_space<vmem>>, vector<1x2x32xf32>,
    %597 = vector.shape_cast %512 : vector<2x1xi1> to vector<2x1xi1>
    %598 = vector.broadcast %597 : vector<2x1xi1> to vector<2x32xi1>
    %599 = arith.select %598, %543, %498 : vector<2x32xi1>, vector<2x32xf32>
    %600 = vector.shape_cast %512 : vector<2x1xi1> to vector<2x1xi1>
    %601 = vector.broadcast %600 : vector<2x1xi1> to vector<2x32xi1>
    %602 = arith.select %601, %541, %501 : vector<2x32xi1>, vector<2x32xf32>
    %603 = vector.shape_cast %549 : vector<2x1xi1> to vector<2x1xi1>
    %604 = vector.broadcast %603 : vector<2x1xi1> to vector<2x32xi1>
    %605 = arith.select %604, %580, %504 : vector<2x32xi1>, vector<2x32xf32>
    %606 = vector.shape_cast %549 : vector<2x1xi1> to vector<2x1xi1>
    %607 = vector.broadcast %606 : vector<2x1xi1> to vector<2x32xi1>
    %608 = arith.select %607, %578, %507 : vector<2x32xi1>, vector<2x32xf32>
    %c6_i32 = arith.constant 6 : i32
    %609 = arith.index_cast %c6_i32 : i32 to index
    %c0_152 = arith.constant 0 : index
    %c0_153 = arith.constant 0 : index
    %610 = vector.load %arg3[%609, %c0_152, %c0_153] : memref<8x2x1xf32, #tpu.memory_space<vmem>>, vector<1x2x1xf32>
    %611 = vector.shape_cast %610 : vector<1x2x1xf32> to vector<2x1xf32>
    %cst_154 = arith.constant 0.000000e+00 : f32
    %612 = vector.broadcast %cst_154 : f32 to vector<2x1xf32>
    %613 = arith.cmpf ogt, %611, %612 : vector<2x1xf32>
    %614 = arith.index_cast %c6_i32 : i32 to index
    %c0_155 = arith.constant 0 : index
    %c0_156 = arith.constant 0 : index
    %615 = vector.load %arg1[%614, %c0_155, %c0_156] : memref<8x2x128xf32, #tpu.memory_space<vmem>>, vector<1x2x128xf32>
    %616 = vector.shape_cast %615 : vector<1x2x128xf32> to vector<2x128xf32>
    %617 = arith.truncf %599 : vector<2x32xf32> to vector<2x32xbf16>
    %cst_157 = arith.constant dense<0.000000e+00> : vector<2x128xf32>
    %618 = tpu.matmul %617, %0, %cst_157 {dimension_numbers = #tpu.dot_dimension_numbers<[1], [0], [0], [1], [0, 0, 1, 1], [], []>} : vector<2x32xbf16>, vector<32x128xbf16>, vector<2x128xf32> -> vector<2x128xf32>
    %619 = arith.addf %616, %618 : vector<2x128xf32>
    %620 = vector.extract_strided_slice %619 {offsets = [0, 0], sizes = [2, 32], strides = [1, 1]} : vector<2x128xf32> to vector<2x32xf32>
    %621 = arith.negf %620 : vector<2x32xf32>
    %622 = math.exp %621 : vector<2x32xf32>
    %cst_158 = arith.constant 1.000000e+00 : f32
    %623 = vector.broadcast %cst_158 : f32 to vector<2x32xf32>
    %624 = arith.addf %623, %622 : vector<2x32xf32>
    %625 = arith.divf %623, %624 : vector<2x32xf32>
    %626 = vector.extract_strided_slice %619 {offsets = [0, 32], sizes = [2, 32], strides = [1, 1]} : vector<2x128xf32> to vector<2x32xf32>
    %627 = arith.negf %626 : vector<2x32xf32>
    %628 = math.exp %627 : vector<2x32xf32>
    %cst_159 = arith.constant 1.000000e+00 : f32
    %629 = vector.broadcast %cst_159 : f32 to vector<2x32xf32>
    %630 = arith.addf %629, %628 : vector<2x32xf32>
    %631 = arith.divf %629, %630 : vector<2x32xf32>
    %632 = vector.extract_strided_slice %619 {offsets = [0, 64], sizes = [2, 32], strides = [1, 1]} : vector<2x128xf32> to vector<2x32xf32>
    %633 = math.tanh %632 : vector<2x32xf32>
    %634 = vector.extract_strided_slice %619 {offsets = [0, 96], sizes = [2, 32], strides = [1, 1]} : vector<2x128xf32> to vector<2x32xf32>
    %635 = arith.negf %634 : vector<2x32xf32>
    %636 = math.exp %635 : vector<2x32xf32>
    %cst_160 = arith.constant 1.000000e+00 : f32
    %637 = vector.broadcast %cst_160 : f32 to vector<2x32xf32>
    %638 = arith.addf %637, %636 : vector<2x32xf32>
    %639 = arith.divf %637, %638 : vector<2x32xf32>
    %640 = arith.mulf %631, %602 : vector<2x32xf32>
    %641 = arith.mulf %625, %633 : vector<2x32xf32>
    %642 = arith.addf %640, %641 : vector<2x32xf32>
    %643 = math.tanh %642 : vector<2x32xf32>
    %644 = arith.mulf %639, %643 : vector<2x32xf32>
    %c7_i32_161 = arith.constant 7 : i32
    %645 = arith.subi %c7_i32_161, %c6_i32 : i32
    %646 = arith.index_cast %645 : i32 to index
    %c0_162 = arith.constant 0 : index
    %c0_163 = arith.constant 0 : index
    %647 = vector.load %arg3[%646, %c0_162, %c0_163] : memref<8x2x1xf32, #tpu.memory_space<vmem>>, vector<1x2x1xf32>
    %648 = vector.shape_cast %647 : vector<1x2x1xf32> to vector<2x1xf32>
    %cst_164 = arith.constant 0.000000e+00 : f32
    %649 = vector.broadcast %cst_164 : f32 to vector<2x1xf32>
    %650 = arith.cmpf ogt, %648, %649 : vector<2x1xf32>
    %651 = arith.index_cast %645 : i32 to index
    %c0_165 = arith.constant 0 : index
    %c0_166 = arith.constant 0 : index
    %652 = vector.load %arg2[%651, %c0_165, %c0_166] : memref<8x2x128xf32, #tpu.memory_space<vmem>>, vector<1x2x128xf32>
    %653 = vector.shape_cast %652 : vector<1x2x128xf32> to vector<2x128xf32>
    %654 = arith.truncf %605 : vector<2x32xf32> to vector<2x32xbf16>
    %cst_167 = arith.constant dense<0.000000e+00> : vector<2x128xf32>
    %655 = tpu.matmul %654, %1, %cst_167 {dimension_numbers = #tpu.dot_dimension_numbers<[1], [0], [0], [1], [0, 0, 1, 1], [], []>} : vector<2x32xbf16>, vector<32x128xbf16>, vector<2x128xf32> -> vector<2x128xf32>
    %656 = arith.addf %653, %655 : vector<2x128xf32>
    %657 = vector.extract_strided_slice %656 {offsets = [0, 0], sizes = [2, 32], strides = [1, 1]} : vector<2x128xf32> to vector<2x32xf32>
    %658 = arith.negf %657 : vector<2x32xf32>
    %659 = math.exp %658 : vector<2x32xf32>
    %cst_168 = arith.constant 1.000000e+00 : f32
    %660 = vector.broadcast %cst_168 : f32 to vector<2x32xf32>
    %661 = arith.addf %660, %659 : vector<2x32xf32>
    %662 = arith.divf %660, %661 : vector<2x32xf32>
    %663 = vector.extract_strided_slice %656 {offsets = [0, 32], sizes = [2, 32], strides = [1, 1]} : vector<2x128xf32> to vector<2x32xf32>
    %664 = arith.negf %663 : vector<2x32xf32>
    %665 = math.exp %664 : vector<2x32xf32>
    %cst_169 = arith.constant 1.000000e+00 : f32
    %666 = vector.broadcast %cst_169 : f32 to vector<2x32xf32>
    %667 = arith.addf %666, %665 : vector<2x32xf32>
    %668 = arith.divf %666, %667 : vector<2x32xf32>
    %669 = vector.extract_strided_slice %656 {offsets = [0, 64], sizes = [2, 32], strides = [1, 1]} : vector<2x128xf32> to vector<2x32xf32>
    %670 = math.tanh %669 : vector<2x32xf32>
    %671 = vector.extract_strided_slice %656 {offsets = [0, 96], sizes = [2, 32], strides = [1, 1]} : vector<2x128xf32> to vector<2x32xf32>
    %672 = arith.negf %671 : vector<2x32xf32>
    %673 = math.exp %672 : vector<2x32xf32>
    %cst_170 = arith.constant 1.000000e+00 : f32
    %674 = vector.broadcast %cst_170 : f32 to vector<2x32xf32>
    %675 = arith.addf %674, %673 : vector<2x32xf32>
    %676 = arith.divf %674, %675 : vector<2x32xf32>
    %677 = arith.mulf %668, %608 : vector<2x32xf32>
    %678 = arith.mulf %662, %670 : vector<2x32xf32>
    %679 = arith.addf %677, %678 : vector<2x32xf32>
    %680 = math.tanh %679 : vector<2x32xf32>
    %681 = arith.mulf %676, %680 : vector<2x32xf32>
    %cst_171 = arith.constant 0.000000e+00 : f32
    %682 = vector.shape_cast %613 : vector<2x1xi1> to vector<2x1xi1>
    %683 = vector.broadcast %682 : vector<2x1xi1> to vector<2x32xi1>
    %684 = vector.broadcast %cst_171 : f32 to vector<2x32xf32>
    %685 = arith.select %683, %644, %684 : vector<2x32xi1>, vector<2x32xf32>
    %686 = arith.index_cast %c6_i32 : i32 to index
    %c0_172 = arith.constant 0 : index
    %c0_173 = arith.constant 0 : index
    %687 = vector.load %arg6[%686, %c0_172, %c0_173] : memref<8x2x32xf32, #tpu.memory_space<vmem>>, vector<1x2x32xf32>
    %688 = vector.shape_cast %687 : vector<1x2x32xf32> to vector<2x32xf32>
    %689 = vector.shape_cast %685 : vector<2x32xf32> to vector<1x2x32xf32>
    tpu.vector_store %arg6[%686, %c0_172, %c0_173], %689 {strides = array<i32>} : memref<8x2x32xf32, #tpu.memory_space<vmem>>, vector<1x2x32xf32>,
    %cst_174 = arith.constant 0.000000e+00 : f32
    %690 = vector.shape_cast %650 : vector<2x1xi1> to vector<2x1xi1>
    %691 = vector.broadcast %690 : vector<2x1xi1> to vector<2x32xi1>
    %692 = vector.broadcast %cst_174 : f32 to vector<2x32xf32>
    %693 = arith.select %691, %681, %692 : vector<2x32xi1>, vector<2x32xf32>
    %694 = arith.index_cast %645 : i32 to index
    %c0_175 = arith.constant 0 : index
    %c0_176 = arith.constant 0 : index
    %695 = vector.load %arg7[%694, %c0_175, %c0_176] : memref<8x2x32xf32, #tpu.memory_space<vmem>>, vector<1x2x32xf32>
    %696 = vector.shape_cast %695 : vector<1x2x32xf32> to vector<2x32xf32>
    %697 = vector.shape_cast %693 : vector<2x32xf32> to vector<1x2x32xf32>
    tpu.vector_store %arg7[%694, %c0_175, %c0_176], %697 {strides = array<i32>} : memref<8x2x32xf32, #tpu.memory_space<vmem>>, vector<1x2x32xf32>,
    %698 = vector.shape_cast %613 : vector<2x1xi1> to vector<2x1xi1>
    %699 = vector.broadcast %698 : vector<2x1xi1> to vector<2x32xi1>
    %700 = arith.select %699, %644, %599 : vector<2x32xi1>, vector<2x32xf32>
    %701 = vector.shape_cast %613 : vector<2x1xi1> to vector<2x1xi1>
    %702 = vector.broadcast %701 : vector<2x1xi1> to vector<2x32xi1>
    %703 = arith.select %702, %642, %602 : vector<2x32xi1>, vector<2x32xf32>
    %704 = vector.shape_cast %650 : vector<2x1xi1> to vector<2x1xi1>
    %705 = vector.broadcast %704 : vector<2x1xi1> to vector<2x32xi1>
    %706 = arith.select %705, %681, %605 : vector<2x32xi1>, vector<2x32xf32>
    %707 = vector.shape_cast %650 : vector<2x1xi1> to vector<2x1xi1>
    %708 = vector.broadcast %707 : vector<2x1xi1> to vector<2x32xi1>
    %709 = arith.select %708, %679, %608 : vector<2x32xi1>, vector<2x32xf32>
    %c7_i32_177 = arith.constant 7 : i32
    %710 = arith.index_cast %c7_i32_177 : i32 to index
    %c0_178 = arith.constant 0 : index
    %c0_179 = arith.constant 0 : index
    %711 = vector.load %arg3[%710, %c0_178, %c0_179] : memref<8x2x1xf32, #tpu.memory_space<vmem>>, vector<1x2x1xf32>
    %712 = vector.shape_cast %711 : vector<1x2x1xf32> to vector<2x1xf32>
    %cst_180 = arith.constant 0.000000e+00 : f32
    %713 = vector.broadcast %cst_180 : f32 to vector<2x1xf32>
    %714 = arith.cmpf ogt, %712, %713 : vector<2x1xf32>
    %715 = arith.index_cast %c7_i32_177 : i32 to index
    %c0_181 = arith.constant 0 : index
    %c0_182 = arith.constant 0 : index
    %716 = vector.load %arg1[%715, %c0_181, %c0_182] : memref<8x2x128xf32, #tpu.memory_space<vmem>>, vector<1x2x128xf32>
    %717 = vector.shape_cast %716 : vector<1x2x128xf32> to vector<2x128xf32>
    %718 = arith.truncf %700 : vector<2x32xf32> to vector<2x32xbf16>
    %cst_183 = arith.constant dense<0.000000e+00> : vector<2x128xf32>
    %719 = tpu.matmul %718, %0, %cst_183 {dimension_numbers = #tpu.dot_dimension_numbers<[1], [0], [0], [1], [0, 0, 1, 1], [], []>} : vector<2x32xbf16>, vector<32x128xbf16>, vector<2x128xf32> -> vector<2x128xf32>
    %720 = arith.addf %717, %719 : vector<2x128xf32>
    %721 = vector.extract_strided_slice %720 {offsets = [0, 0], sizes = [2, 32], strides = [1, 1]} : vector<2x128xf32> to vector<2x32xf32>
    %722 = arith.negf %721 : vector<2x32xf32>
    %723 = math.exp %722 : vector<2x32xf32>
    %cst_184 = arith.constant 1.000000e+00 : f32
    %724 = vector.broadcast %cst_184 : f32 to vector<2x32xf32>
    %725 = arith.addf %724, %723 : vector<2x32xf32>
    %726 = arith.divf %724, %725 : vector<2x32xf32>
    %727 = vector.extract_strided_slice %720 {offsets = [0, 32], sizes = [2, 32], strides = [1, 1]} : vector<2x128xf32> to vector<2x32xf32>
    %728 = arith.negf %727 : vector<2x32xf32>
    %729 = math.exp %728 : vector<2x32xf32>
    %cst_185 = arith.constant 1.000000e+00 : f32
    %730 = vector.broadcast %cst_185 : f32 to vector<2x32xf32>
    %731 = arith.addf %730, %729 : vector<2x32xf32>
    %732 = arith.divf %730, %731 : vector<2x32xf32>
    %733 = vector.extract_strided_slice %720 {offsets = [0, 64], sizes = [2, 32], strides = [1, 1]} : vector<2x128xf32> to vector<2x32xf32>
    %734 = math.tanh %733 : vector<2x32xf32>
    %735 = vector.extract_strided_slice %720 {offsets = [0, 96], sizes = [2, 32], strides = [1, 1]} : vector<2x128xf32> to vector<2x32xf32>
    %736 = arith.negf %735 : vector<2x32xf32>
    %737 = math.exp %736 : vector<2x32xf32>
    %cst_186 = arith.constant 1.000000e+00 : f32
    %738 = vector.broadcast %cst_186 : f32 to vector<2x32xf32>
    %739 = arith.addf %738, %737 : vector<2x32xf32>
    %740 = arith.divf %738, %739 : vector<2x32xf32>
    %741 = arith.mulf %732, %703 : vector<2x32xf32>
    %742 = arith.mulf %726, %734 : vector<2x32xf32>
    %743 = arith.addf %741, %742 : vector<2x32xf32>
    %744 = math.tanh %743 : vector<2x32xf32>
    %745 = arith.mulf %740, %744 : vector<2x32xf32>
    %c7_i32_187 = arith.constant 7 : i32
    %746 = arith.subi %c7_i32_187, %c7_i32_177 : i32
    %747 = arith.index_cast %746 : i32 to index
    %c0_188 = arith.constant 0 : index
    %c0_189 = arith.constant 0 : index
    %748 = vector.load %arg3[%747, %c0_188, %c0_189] : memref<8x2x1xf32, #tpu.memory_space<vmem>>, vector<1x2x1xf32>
    %749 = vector.shape_cast %748 : vector<1x2x1xf32> to vector<2x1xf32>
    %cst_190 = arith.constant 0.000000e+00 : f32
    %750 = vector.broadcast %cst_190 : f32 to vector<2x1xf32>
    %751 = arith.cmpf ogt, %749, %750 : vector<2x1xf32>
    %752 = arith.index_cast %746 : i32 to index
    %c0_191 = arith.constant 0 : index
    %c0_192 = arith.constant 0 : index
    %753 = vector.load %arg2[%752, %c0_191, %c0_192] : memref<8x2x128xf32, #tpu.memory_space<vmem>>, vector<1x2x128xf32>
    %754 = vector.shape_cast %753 : vector<1x2x128xf32> to vector<2x128xf32>
    %755 = arith.truncf %706 : vector<2x32xf32> to vector<2x32xbf16>
    %cst_193 = arith.constant dense<0.000000e+00> : vector<2x128xf32>
    %756 = tpu.matmul %755, %1, %cst_193 {dimension_numbers = #tpu.dot_dimension_numbers<[1], [0], [0], [1], [0, 0, 1, 1], [], []>} : vector<2x32xbf16>, vector<32x128xbf16>, vector<2x128xf32> -> vector<2x128xf32>
    %757 = arith.addf %754, %756 : vector<2x128xf32>
    %758 = vector.extract_strided_slice %757 {offsets = [0, 0], sizes = [2, 32], strides = [1, 1]} : vector<2x128xf32> to vector<2x32xf32>
    %759 = arith.negf %758 : vector<2x32xf32>
    %760 = math.exp %759 : vector<2x32xf32>
    %cst_194 = arith.constant 1.000000e+00 : f32
    %761 = vector.broadcast %cst_194 : f32 to vector<2x32xf32>
    %762 = arith.addf %761, %760 : vector<2x32xf32>
    %763 = arith.divf %761, %762 : vector<2x32xf32>
    %764 = vector.extract_strided_slice %757 {offsets = [0, 32], sizes = [2, 32], strides = [1, 1]} : vector<2x128xf32> to vector<2x32xf32>
    %765 = arith.negf %764 : vector<2x32xf32>
    %766 = math.exp %765 : vector<2x32xf32>
    %cst_195 = arith.constant 1.000000e+00 : f32
    %767 = vector.broadcast %cst_195 : f32 to vector<2x32xf32>
    %768 = arith.addf %767, %766 : vector<2x32xf32>
    %769 = arith.divf %767, %768 : vector<2x32xf32>
    %770 = vector.extract_strided_slice %757 {offsets = [0, 64], sizes = [2, 32], strides = [1, 1]} : vector<2x128xf32> to vector<2x32xf32>
    %771 = math.tanh %770 : vector<2x32xf32>
    %772 = vector.extract_strided_slice %757 {offsets = [0, 96], sizes = [2, 32], strides = [1, 1]} : vector<2x128xf32> to vector<2x32xf32>
    %773 = arith.negf %772 : vector<2x32xf32>
    %774 = math.exp %773 : vector<2x32xf32>
    %cst_196 = arith.constant 1.000000e+00 : f32
    %775 = vector.broadcast %cst_196 : f32 to vector<2x32xf32>
    %776 = arith.addf %775, %774 : vector<2x32xf32>
    %777 = arith.divf %775, %776 : vector<2x32xf32>
    %778 = arith.mulf %769, %709 : vector<2x32xf32>
    %779 = arith.mulf %763, %771 : vector<2x32xf32>
    %780 = arith.addf %778, %779 : vector<2x32xf32>
    %781 = math.tanh %780 : vector<2x32xf32>
    %782 = arith.mulf %777, %781 : vector<2x32xf32>
    %cst_197 = arith.constant 0.000000e+00 : f32
    %783 = vector.shape_cast %714 : vector<2x1xi1> to vector<2x1xi1>
    %784 = vector.broadcast %783 : vector<2x1xi1> to vector<2x32xi1>
    %785 = vector.broadcast %cst_197 : f32 to vector<2x32xf32>
    %786 = arith.select %784, %745, %785 : vector<2x32xi1>, vector<2x32xf32>
    %787 = arith.index_cast %c7_i32_177 : i32 to index
    %c0_198 = arith.constant 0 : index
    %c0_199 = arith.constant 0 : index
    %788 = vector.load %arg6[%787, %c0_198, %c0_199] : memref<8x2x32xf32, #tpu.memory_space<vmem>>, vector<1x2x32xf32>
    %789 = vector.shape_cast %788 : vector<1x2x32xf32> to vector<2x32xf32>
    %790 = vector.shape_cast %786 : vector<2x32xf32> to vector<1x2x32xf32>
    tpu.vector_store %arg6[%787, %c0_198, %c0_199], %790 {strides = array<i32>} : memref<8x2x32xf32, #tpu.memory_space<vmem>>, vector<1x2x32xf32>,
    %cst_200 = arith.constant 0.000000e+00 : f32
    %791 = vector.shape_cast %751 : vector<2x1xi1> to vector<2x1xi1>
    %792 = vector.broadcast %791 : vector<2x1xi1> to vector<2x32xi1>
    %793 = vector.broadcast %cst_200 : f32 to vector<2x32xf32>
    %794 = arith.select %792, %782, %793 : vector<2x32xi1>, vector<2x32xf32>
    %795 = arith.index_cast %746 : i32 to index
    %c0_201 = arith.constant 0 : index
    %c0_202 = arith.constant 0 : index
    %796 = vector.load %arg7[%795, %c0_201, %c0_202] : memref<8x2x32xf32, #tpu.memory_space<vmem>>, vector<1x2x32xf32>
    %797 = vector.shape_cast %796 : vector<1x2x32xf32> to vector<2x32xf32>
    %798 = vector.shape_cast %794 : vector<2x32xf32> to vector<1x2x32xf32>
    tpu.vector_store %arg7[%795, %c0_201, %c0_202], %798 {strides = array<i32>} : memref<8x2x32xf32, #tpu.memory_space<vmem>>, vector<1x2x32xf32>,
    %799 = vector.shape_cast %714 : vector<2x1xi1> to vector<2x1xi1>
    %800 = vector.broadcast %799 : vector<2x1xi1> to vector<2x32xi1>
    %801 = arith.select %800, %745, %700 : vector<2x32xi1>, vector<2x32xf32>
    %802 = vector.shape_cast %714 : vector<2x1xi1> to vector<2x1xi1>
    %803 = vector.broadcast %802 : vector<2x1xi1> to vector<2x32xi1>
    %804 = arith.select %803, %743, %703 : vector<2x32xi1>, vector<2x32xf32>
    %805 = vector.shape_cast %751 : vector<2x1xi1> to vector<2x1xi1>
    %806 = vector.broadcast %805 : vector<2x1xi1> to vector<2x32xi1>
    %807 = arith.select %806, %782, %706 : vector<2x32xi1>, vector<2x32xf32>
    %808 = vector.shape_cast %751 : vector<2x1xi1> to vector<2x1xi1>
    %809 = vector.broadcast %808 : vector<2x1xi1> to vector<2x32xi1>
    %810 = arith.select %809, %780, %709 : vector<2x32xi1>, vector<2x32xf32>
    %c8_i32 = arith.constant 8 : i32
    %c0_203 = arith.constant 0 : index
    %c0_204 = arith.constant 0 : index
    %811 = vector.load %arg8[%c0_203, %c0_204] : memref<2x32xf32, #tpu.memory_space<vmem>>, vector<2x32xf32>
    tpu.vector_store %arg8[%c0_203, %c0_204], %801 {strides = array<i32>} : memref<2x32xf32, #tpu.memory_space<vmem>>, vector<2x32xf32>,
    %c0_205 = arith.constant 0 : index
    %c0_206 = arith.constant 0 : index
    %812 = vector.load %arg9[%c0_205, %c0_206] : memref<2x32xf32, #tpu.memory_space<vmem>>, vector<2x32xf32>
    tpu.vector_store %arg9[%c0_205, %c0_206], %804 {strides = array<i32>} : memref<2x32xf32, #tpu.memory_space<vmem>>, vector<2x32xf32>,
    %c0_207 = arith.constant 0 : index
    %c0_208 = arith.constant 0 : index
    %813 = vector.load %arg10[%c0_207, %c0_208] : memref<2x32xf32, #tpu.memory_space<vmem>>, vector<2x32xf32>
    tpu.vector_store %arg10[%c0_207, %c0_208], %807 {strides = array<i32>} : memref<2x32xf32, #tpu.memory_space<vmem>>, vector<2x32xf32>,
    %c0_209 = arith.constant 0 : index
    %c0_210 = arith.constant 0 : index
    %814 = vector.load %arg11[%c0_209, %c0_210] : memref<2x32xf32, #tpu.memory_space<vmem>>, vector<2x32xf32>
    tpu.vector_store %arg11[%c0_209, %c0_210], %810 {strides = array<i32>} : memref<2x32xf32, #tpu.memory_space<vmem>>, vector<2x32xf32>,
    return
  }
  func.func @transform_0(%arg0: i32) -> (i32, i32, i32) {
    %c0_i32 = arith.constant 0 : i32
    %c0_i32_0 = arith.constant 0 : i32
    %c0_i32_1 = arith.constant 0 : i32
    return %c0_i32, %arg0, %c0_i32_0 : i32, i32, i32
  }
  func.func @transform_1(%arg0: i32) -> (i32, i32, i32) {
    %c0_i32 = arith.constant 0 : i32
    %c0_i32_0 = arith.constant 0 : i32
    %c0_i32_1 = arith.constant 0 : i32
    return %c0_i32, %arg0, %c0_i32_0 : i32, i32, i32
  }
  func.func @transform_2(%arg0: i32) -> (i32, i32, i32) {
    %c0_i32 = arith.constant 0 : i32
    %c0_i32_0 = arith.constant 0 : i32
    %c0_i32_1 = arith.constant 0 : i32
    return %c0_i32, %arg0, %c0_i32_0 : i32, i32, i32
  }
  func.func @transform_3(%arg0: i32) -> (i32, i32) {
    %c0_i32 = arith.constant 0 : i32
    %c0_i32_0 = arith.constant 0 : i32
    %c0_i32_1 = arith.constant 0 : i32
    return %c0_i32, %c0_i32_0 : i32, i32
  }
  func.func @transform_4(%arg0: i32) -> (i32, i32) {
    %c0_i32 = arith.constant 0 : i32
    %c0_i32_0 = arith.constant 0 : i32
    %c0_i32_1 = arith.constant 0 : i32
    return %c0_i32, %c0_i32_0 : i32, i32
  }
  func.func @transform_5(%arg0: i32) -> (i32, i32, i32) {
    %c0_i32 = arith.constant 0 : i32
    %c0_i32_0 = arith.constant 0 : i32
    %c0_i32_1 = arith.constant 0 : i32
    return %c0_i32, %arg0, %c0_i32_0 : i32, i32, i32
  }
  func.func @transform_6(%arg0: i32) -> (i32, i32, i32) {
    %c0_i32 = arith.constant 0 : i32
    %c0_i32_0 = arith.constant 0 : i32
    %c0_i32_1 = arith.constant 0 : i32
    return %c0_i32, %arg0, %c0_i32_0 : i32, i32, i32
  }
  func.func @transform_7(%arg0: i32) -> (i32, i32) {
    %c0_i32 = arith.constant 0 : i32
    %c0_i32_0 = arith.constant 0 : i32
    return %arg0, %c0_i32 : i32, i32
  }
  func.func @transform_8(%arg0: i32) -> (i32, i32) {
    %c0_i32 = arith.constant 0 : i32
    %c0_i32_0 = arith.constant 0 : i32
    return %arg0, %c0_i32 : i32, i32
  }
  func.func @transform_9(%arg0: i32) -> (i32, i32) {
    %c0_i32 = arith.constant 0 : i32
    %c0_i32_0 = arith.constant 0 : i32
    return %arg0, %c0_i32 : i32, i32
  }
  func.func @transform_10(%arg0: i32) -> (i32, i32) {
    %c0_i32 = arith.constant 0 : i32
    %c0_i32_0 = arith.constant 0 : i32
    return %arg0, %c0_i32 : i32, i32
  }
}

</mosaic_0001>

<bundles_post_ra>
// kernel: tpu_custom_call.1
= control target key start
LH: loop header
LB: loop body
LE: loop exit
PB: predicated region body
PF: predicated region fallthrough
CT: control target
= control target key end

     0   :  { %16 = vsyncpa [#allocation3], 0  ;;  %s2604_s0 = inlined_call_operand.vmem [shape: f32[8,2,128], index: 0, kind: input, shape index: {}]   ;;  %s2605_s1 = inlined_call_operand.hbm [shape: f32[8,2,128], index: 1, kind: input, shape index: {}]   ;;  %s2606_s2 = inlined_call_operand.vmem [shape: f32[8,2,1], index: 2, kind: input, shape index: {}]   ;;  %s2607_s3 = inlined_call_operand.hbm [shape: bf16[32,128], index: 3, kind: input, shape index: {}]   ;;  %s2608_s4 = inlined_call_operand.hbm [shape: bf16[32,128], index: 4, kind: input, shape index: {}]   ;;  %s2609_s5 = inlined_call_operand.hbm [shape: f32[8,2,32], index: 5, kind: output, shape index: {0}]   ;;  %s2610_s6 = inlined_call_operand.hbm [shape: f32[8,2,32], index: 6, kind: output, shape index: {1}]   ;;  %s2611_s7 = inlined_call_operand.hbm [shape: f32[2,32], index: 7, kind: output, shape index: {2}]   ;;  %s2612_s8 = inlined_call_operand.hbm [shape: f32[2,32], index: 8, kind: output, shape index: {3}]   ;;  %s2613_s9 = inlined_call_operand.hbm [shape: f32[2,32], index: 9, kind: output, shape index: {4}]   ;;  %s2614_s10 = inlined_call_operand.hbm [shape: f32[2,32], index: 10, kind: output, shape index: {5}]  }
   0x1   :  { %17 = vsyncpa [#allocation6], 0 }
   0x2   :  { %18 = vsyncpa [#allocation4], 0 }
   0x3   :  { %19 = vsyncpa [#allocation10], 0 }
   0x4   :  { %20 = vsyncpa [#allocation13], 0  ;;  %s43_s15 = sshll.u32 %s2607_s3, 4  ;;  %s44_s15 = int_to_ptr.hbm [resolvable:$true] %s43_s15 }
   0x5   :  { %21 = vsyncpa [#allocation16], 0  ;;  %s1883_s16 = smov [#allocation5]   ;;  %s28_s20 = sshll.u32 %s2605_s1, 4  ;;  %s29_s20 = int_to_ptr.hbm [resolvable:$true] %s28_s20 }
   0x6   :  { %s45_s17 = sshll.u32 %s1883_s16, 4  ;;  %s1884_s21 = smov 64   ;;  %s46_s17 = int_to_ptr.vmem [resolvable:$true] %s45_s17 }
   0x7   :  { %s1885_s22 = smov 4   ;;  %s1886_s23 = smov [#allocation2]  }
   0x8   :  { %51 = dma.hbm_to_vmem [thread:$0]  %s44_s15, 256, %s46_s17, [#allocation6], %s1884_s21, %s1884_s21, %s1885_s22  }
   0x9   :  { %s30_s24 = sshll.u32 %s1886_s23, 4  ;;  %s1887_s25 = smov 32   ;;  %s31_s24 = int_to_ptr.vmem [resolvable:$true] %s30_s24 }
   0xa   :  { %s1888_s3 = smov 2   ;;  %s56_s28 = sshll.u32 %s2608_s4, 4  ;;  %s57_s28 = int_to_ptr.hbm [resolvable:$true] %s56_s28 }
   0xb   :  { %36 = dma.hbm_to_vmem [thread:$0]  %s29_s20, 256, %s31_s24, [#allocation3], %s1887_s25, %s1887_s25, %s1888_s3  }
   0xc   :  { %s1889_s1 = smov [#allocation7]  }
   0xd   :  { %s58_s29 = sshll.u32 %s1889_s1, 4  ;;  %s59_s29 = int_to_ptr.vmem [resolvable:$true] %s58_s29 }
   0xe   :  { %64 = dma.hbm_to_vmem [thread:$0]  %s57_s28, 256, %s59_s29, [#allocation6], %s1884_s21, %s1884_s21, %s1885_s22  }
   0xf   :  { %1871 = dma.done.wait [#allocation3], 256  }
  0x10   :  { %1872 = vsyncadd [#allocation3], 4294967040 }
  0x11   :  { %1873 = dma.done.wait [#allocation6], 512  }
  0x12   :  { %1874 = vsyncadd [#allocation6], 4294966784  ;;  %v1890_v0 = vmov 0   ;;  %v1972_v1 = vld [vmem:[#allocation5 + $0x8] sm:$0xff]  ;;  %v1974_v2 = vld [vmem:[#allocation7 + $0x8] sm:$0xff]  ;;  %vm101_vm12 = vcmask 261120  }
  0x13   :  { %1524 = vset.pattern.permute.xlu0 %v1890_v0  ;;  %1525 = vset.pattern.permute.xlu1 %v1890_v0  ;;  %v1978_v3 = vld [vmem:[#allocation5] sm:$0xff]  ;;  %v1980_v4 = vld [vmem:[#allocation7] sm:$0xff]  ;;  %v160_v5 = vld [vmem:[#allocation2 + $0xe] sm:$0x3]  ;;  %s1382_s19 = sshll.u32 %s2612_s8, 4  ;;  %s1893_s20 = smov [#allocation14]   ;;  %s1383_s19 = int_to_ptr.hbm [resolvable:$true] %s1382_s19 }
  0x14   :  { %1526 = vset.pattern.permute.xlu2 %v1890_v0  ;;  %111 = vmatpush.bf16.msra.mxu0 %v1972_v1  ;;  %v88_v9 = vld [vmem:[%s2604_s0] sm:$0x3]  ;;  %v1447_v19 = vld [vmem:[%s2606_s2 + $0xe] sm:$0x3]  ;;  %s1391_s22 = sshll.u32 %s1893_s20, 4  ;;  %s1393_s26 = sshll.u32 %s2613_s9, 4  ;;  %s1392_s22 = int_to_ptr.vmem [resolvable:$true] %s1391_s22  ;;  %s1394_s26 = int_to_ptr.hbm [resolvable:$true] %s1393_s26 }
  0x15   :  { %179 = vmatpush.bf16.msra.mxu1 %v1974_v2  ;;  %331 = vmatpush.bf16.msra.mxu3 %v1974_v2  ;;  %vm158_vm0 = vcmp.gt.f32.partialorder %v1447_v19, 0.0  ;;  %v86_v47 = vld [vmem:[%s2606_s2] sm:$0x3]  ;;  %s1894_s27 = smov [#allocation9]   ;;  %s1357_s8 = sshll.u32 %s2610_s6, 4  ;;  %s1358_s8 = int_to_ptr.hbm [resolvable:$true] %s1357_s8 }
  0x16   :  { %268 = vmatpush.bf16.msra.mxu2 %v1972_v1  ;;  %v236_v20 = vsel %vm158_vm0, 1, %v1890_v0  ;;  %vm87_vm9 = vcmp.gt.f32.partialorder %v86_v47, 0.0  ;;  %s1355_s28 = sshll.u32 %s1894_s27, 4  ;;  %s1895_s9 = smov [#allocation8]   ;;  %s1356_s28 = int_to_ptr.vmem [resolvable:$true] %s1355_s28 }
  0x17   :  { %v224_v48 = vsel %vm87_vm9, 1, %v1890_v0  ;;  %s1342_s4 = sshll.u32 %s1895_s9, 4  ;;  %s1344_s6 = sshll.u32 %s2609_s5, 4  ;;  %s1343_s4 = int_to_ptr.vmem [resolvable:$true] %s1342_s4  ;;  %s1345_s6 = int_to_ptr.hbm [resolvable:$true] %s1344_s6 }
  0x18   :  { %112 = vmatpush.bf16.msra.mxu0 %v1978_v3  ;;  %s1896_s12 = smov [#allocation15]   ;;  %s1404_s15 = sshll.u32 %s2614_s10, 4  ;;  %s1405_s15 = int_to_ptr.hbm [resolvable:$true] %s1404_s15 }
  0x19   :  { %180 = vmatpush.bf16.msra.mxu1 %v1980_v4  ;;  %332 = vmatpush.bf16.msra.mxu3 %v1980_v4  ;;  %s1402_s13 = sshll.u32 %s1896_s12, 4  ;;  %s1897_s5 = smov [#allocation11]   ;;  %s1403_s13 = int_to_ptr.vmem [resolvable:$true] %s1402_s13 }
  0x1a   :  { %269 = vmatpush.bf16.msra.mxu2 %v1978_v3  ;;  %s1371_s17 = sshll.u32 %s2611_s7, 4  ;;  %s1372_s17 = int_to_ptr.hbm [resolvable:$true] %s1371_s17 }
  0x1b   :  { %113 = vmatmul.bf16.vlgmr.msra.gmra.mxu0 %v1890_v0 }
  0x1c   :  { %422 = vmatpush.bf16.msrb.mxu0 %v1972_v1  ;;  %181 = vmatmul.bf16.vlgmr.msra.gmra.mxu1 %v1890_v0 }
  0x1d   :  { %485 = vmatpush.bf16.msrb.mxu1 %v1974_v2  ;;  %639 = vmatpush.bf16.msrb.mxu3 %v1974_v2 }
  0x1e   :  { %576 = vmatpush.bf16.msrb.mxu2 %v1972_v1 }
  0x20   :  { %423 = vmatpush.bf16.msrb.mxu0 %v1978_v3 }
  0x21   :  { %486 = vmatpush.bf16.msrb.mxu1 %v1980_v4  ;;  %640 = vmatpush.bf16.msrb.mxu3 %v1980_v4 }
  0x22   :  { %577 = vmatpush.bf16.msrb.mxu2 %v1978_v3 }
  0x24   :  { %729 = vmatpush.bf16.msra.mxu0 %v1972_v1 }
  0x25   :  { %791 = vmatpush.bf16.msra.mxu1 %v1974_v2 }
  0x28   :  { %730 = vmatpush.bf16.msra.mxu0 %v1978_v3 }
  0x29   :  { %792 = vmatpush.bf16.msra.mxu1 %v1980_v4 }
  0x98   :  { %v114_v6 = vpop.f32.mrf.mxu0 }
  0x99   :  { %v182_v7 = vpop.f32.mrf.mxu1  ;;  %v118_v10 = vadd.f32 %v114_v6, %v88_v9 }
  0x9a   :  { %v186_v8 = vadd.f32 %v182_v7, %v160_v5 }
  0x9b   :  { %v1446_v16 = vmul.f32 -1.442695, %v118_v10 }
  0x9c   :  { %1527 = vtanh.f32 %v186_v8  ;;  %v1456_v15 = vmul.f32 -1.442695, %v186_v8 }
  0x9d   :  { %1529 = vtanh.f32 %v118_v10  ;;  %v317_v10 = vld [vmem:[#allocation2 + $0xc] sm:$0x3] }
  0x9e   :  { %1531 = vpow2.f32 %v1456_v15  ;;  %v1458_v15 = vld [vmem:[%s2604_s0 + $0x2] sm:$0x3] }
  0x9f   :  { %1533 = vpow2.f32 %v1446_v16 }
  0xa0   :  { %v116_v11 = vpop.f32.mrf.mxu0 }
  0xa1   :  { %v184_v12 = vpop.f32.mrf.mxu1 }
  0xa2   :  { %v1528_v13 = vpop.eup %1527 }
  0xa3   :  { %209 = vrot.lane.b32.xlu0 %v1528_v13, %s1884_s21  ;;  %v1530_v14 = vpop.eup %1529 }
  0xa4   :  { %v1532_v17 = vpop.eup %1531 }
  0xa5   :  { %v190_v18 = vadd.f32 1.0, %v1532_v17  ;;  %v1534_v21 = vpop.eup %1533 }
  0xa6   :  { %v122_v22 = vadd.f32 1.0, %v1534_v21 }
  0xa7   :  { %1535 = vrcp.f32 %v190_v18  ;;  %v202_v31 = vand.u32 2147483648, %v190_v18  ;;  %vm196_vm2 = vweird.f32 %v190_v18  ;;  %v200_v32 = vand.u32 2147483647, %v190_v18 }
  0xa8   :  { %1537 = vrcp.f32 %v122_v22  ;;  %vm128_vm5 = vweird.f32 %v122_v22  ;;  %v134_v40 = vand.u32 2147483648, %v122_v22  ;;  %v132_v41 = vand.u32 2147483647, %v122_v22 }
  0xa9   :  { %v203_v35 = vor.u32 1.1754944e-38, %v202_v31  ;;  %vm201_vm4 = vcmp.eq.f32.partialorder %v200_v32, 8.507059e+37 }
  0xaa   :  { %v135_v43 = vor.u32 1.1754944e-38, %v134_v40  ;;  %vm133_vm8 = vcmp.eq.f32.partialorder %v132_v41, 8.507059e+37 }
  0xab   :  { %141 = vrot.lane.b32.xlu0 %v1530_v14, %s1884_s21 }
  0xad   :  { %v1536_v23 = vpop.eup %1535 }
  0xae   :  { %v192_v24 = vmul.f32 %v1536_v23, %v190_v18  ;;  %v1538_v26 = vpop.eup %1537  ;;  %vm197_vm1 = vweird.f32 %v1536_v23 }
  0xaf   :  { %v124_v28 = vmul.f32 %v1538_v26, %v122_v22  ;;  %vm198_vm3 = vmor %vm196_vm2, %vm197_vm1  ;;  %vm129_vm6 = vweird.f32 %v1538_v26 }
  0xb0   :  { %v193_v25 = vsub.f32 1.0, %v192_v24  ;;  %vm130_vm7 = vmor %vm128_vm5, %vm129_vm6 }
  0xb1   :  { %v125_v30 = vsub.f32 1.0, %v124_v28 }
  0xb2   :  { %v194_v27 = vmul.f32 %v1536_v23, %v193_v25 }
  0xb3   :  { %238 = vperm.xlu0 %1524, %v236_v20   ;;  %v126_v34 = vmul.f32 %v1538_v26, %v125_v30 }
  0xb4   :  { %v195_v29 = vadd.f32 %v1536_v23, %v194_v27 }
  0xb5   :  { %v127_v39 = vadd.f32 %v1538_v26, %v126_v34 }
  0xb6   :  { %v199_v33 = vsel %vm198_vm3, %v1536_v23, %v195_v29 }
  0xb7   :  { %v204_v37 = vsel %vm201_vm4, %v203_v35, %v199_v33  ;;  %v131_v42 = vsel %vm130_vm7, %v1538_v26, %v127_v39 }
  0xb8   :  { %v136_v45 = vsel %vm133_vm8, %v135_v43, %v131_v42  ;;  %v207_v49 = vmul.f32 0.0, %v204_v37 }
  0xb9   :  { %v139_v52 = vmul.f32 0.0, %v136_v45 }
 0x115   :  { %v210_v36 = vpop.permute.xlu0 %209 }
 0x116   :  { %v212_v38 = vmul.f32 %v210_v36, %v204_v37 }
 0x118   :  { %214 = vrot.lane.b32.xlu1 %v212_v38, %s1887_s25 }
 0x11d   :  { %v142_v44 = vpop.permute.xlu0 %141 }
 0x11e   :  { %v144_v46 = vmul.f32 %v142_v44, %v136_v45 }
 0x120   :  { %146 = vrot.lane.b32.xlu1 %v144_v46, %s1887_s25 }
 0x125   :  { %v2025_v57 = vpop.permute.xlu0 %238 }
 0x126   :  { %vm240_vm10 = vcmp.eq.s32.totalorder %v2025_v57, 1 }
 0x128   :  { %226 = vperm.xlu1 %1525, %v224_v48  }
 0x18a   :  { %v215_v50 = vpop.permute.xlu1 %214 }
 0x18b   :  { %v2017_v51 = vadd.f32 %v215_v50, %v207_v49  ;;  %v1461_v50 = vld [vmem:[%s2606_s2 + $0xc] sm:$0x3] }
 0x18c   :  { %vm315_vm5 = vcmp.gt.f32.partialorder %v1461_v50, 0.0 }
 0x18d   :  { %1539 = vtanh.f32 %v2017_v51 }
 0x192   :  { %v147_v53 = vpop.permute.xlu1 %146 }
 0x193   :  { %v1540_v54 = vpop.eup %1539  ;;  %v2020_v55 = vadd.f32 %v147_v53, %v139_v52  ;;  %v388_v52 = vsel %vm315_vm5, 1, %v1890_v0  ;;  %v2065_v53 = vsel %vm240_vm10, %v2017_v51, 0.0 }
 0x194   :  { %220 = vrot.lane.b32.xlu2 %v1540_v54, %s1884_s21 }
 0x195   :  { %1541 = vtanh.f32 %v2020_v55 }
 0x19a   :  { %v2035_v62 = vpop.permute.xlu1 %226 }
 0x19b   :  { %v1542_v56 = vpop.eup %1541  ;;  %vm228_vm11 = vcmp.eq.s32.totalorder %v2035_v62, 1 }
 0x19c   :  { %152 = vrot.lane.b32.xlu2 %v1542_v56, %s1884_s21  ;;  %v2079_v51 = vsel %vm228_vm11, %v2020_v55, 0.0 }
 0x1ee   :  { %v221_v58 = vpop.permute.xlu2 %220 }
 0x1ef   :  { %v223_v59 = vmul.f32 %v221_v58, %v204_v37 }
 0x1f1   :  { %v2030_v60 = vsel %vm240_vm10, %v223_v59, 0.0 }
 0x1f2   :  { %v318_v61 = vpack.c.bf16 %v2030_v60, %v2030_v60 }
 0x1f4   :  { %320 = vrot.lane.b32.xlu2 %v318_v61, %s1887_s25  ;;  %v1457_v61 = vld [vmem:[%s2606_s2 + $0x2] sm:$0x3] }
 0x1f5   :  { %vm252_vm6 = vcmp.gt.f32.partialorder %v1457_v61, 0.0 }
 0x1f6   :  { %v153_v63 = vpop.permute.xlu2 %152 }
 0x1f7   :  { %v155_v5 = vmul.f32 %v153_v63, %v136_v45  ;;  %v376_v63 = vsel %vm252_vm6, 1, %v1890_v0 }
 0x1f9   :  { %v2040_v6 = vsel %vm228_vm11, %v155_v5, 0.0 }
 0x1fa   :  { %v255_v7 = vpack.c.bf16 %v2040_v6, %v2040_v6 }
 0x1fc   :  { %257 = vrot.lane.b32.xlu1 %v255_v7, %s1887_s25 }
 0x24e   :  { %v321_v8 = vpop.permute.xlu2 %320 }
 0x24f   :  { %1462 = vmatmul.msk.bf16.vlgmr.msra.gmra.mxu3 %vm101_vm12, %v321_v8 }
 0x250   :  { %943 = vmatpush.bf16.msra.mxu3 %v1974_v2 }
 0x254   :  { %944 = vmatpush.bf16.msra.mxu3 %v1980_v4 }
 0x26e   :  { %v258_v9 = vpop.permute.xlu1 %257 }
 0x26f   :  { %1459 = vmatmul.msk.bf16.vlgmr.msra.gmra.mxu2 %vm101_vm12, %v258_v9 }
 0x270   :  { %881 = vmatpush.bf16.msra.mxu2 %v1972_v1 }
 0x274   :  { %882 = vmatpush.bf16.msra.mxu2 %v1978_v3 }
 0x2d2   :  { %v334_v11 = vpop.f32.mrf.mxu3 }
 0x2d3   :  { %v338_v12 = vadd.f32 %v334_v11, %v317_v10 }
 0x2d5   :  { %1543 = vtanh.f32 %v338_v12  ;;  %v1463_v20 = vmul.f32 -1.442695, %v338_v12 }
 0x2da   :  { %v336_v13 = vpop.f32.mrf.mxu3 }
 0x2db   :  { %v1544_v14 = vpop.eup %1543 }
 0x2dc   :  { %361 = vrot.lane.b32.xlu2 %v1544_v14, %s1884_s21 }
 0x2f2   :  { %v271_v16 = vpop.f32.mrf.mxu2 }
 0x2f3   :  { %v275_v17 = vadd.f32 %v1458_v15, %v271_v16 }
 0x2f5   :  { %1545 = vtanh.f32 %v275_v17  ;;  %v1460_v35 = vmul.f32 -1.442695, %v275_v17 }
 0x2f6   :  { %1547 = vpow2.f32 %v1463_v20  ;;  %v471_v20 = vld [vmem:[#allocation2 + $0xa] sm:$0x3] }
 0x2fa   :  { %v273_v18 = vpop.f32.mrf.mxu2 }
 0x2fb   :  { %v1546_v19 = vpop.eup %1545 }
 0x2fc   :  { %298 = vrot.lane.b32.xlu0 %v1546_v19, %s1884_s21  ;;  %v1548_v21 = vpop.eup %1547 }
 0x2fd   :  { %v342_v22 = vadd.f32 1.0, %v1548_v21 }
 0x2ff   :  { %1549 = vrcp.f32 %v342_v22  ;;  %v354_v28 = vand.u32 2147483648, %v342_v22  ;;  %vm348_vm14 = vweird.f32 %v342_v22  ;;  %v352_v29 = vand.u32 2147483647, %v342_v22 }
 0x300   :  { %1551 = vpow2.f32 %v1460_v35 }
 0x301   :  { %v355_v31 = vor.u32 1.1754944e-38, %v354_v28  ;;  %vm353_vm0 = vcmp.eq.f32.partialorder %v352_v29, 8.507059e+37 }
 0x305   :  { %v1550_v23 = vpop.eup %1549 }
 0x306   :  { %v344_v24 = vmul.f32 %v1550_v23, %v342_v22  ;;  %vm349_vm13 = vweird.f32 %v1550_v23  ;;  %v1552_v36 = vpop.eup %1551 }
 0x307   :  { %vm350_vm15 = vmor %vm348_vm14, %vm349_vm13  ;;  %v279_v37 = vadd.f32 1.0, %v1552_v36 }
 0x308   :  { %v345_v25 = vsub.f32 1.0, %v344_v24 }
 0x309   :  { %1553 = vrcp.f32 %v279_v37  ;;  %v291_v43 = vand.u32 2147483648, %v279_v37  ;;  %vm285_vm2 = vweird.f32 %v279_v37  ;;  %v289_v44 = vand.u32 2147483647, %v279_v37 }
 0x30a   :  { %v346_v26 = vmul.f32 %v1550_v23, %v345_v25 }
 0x30b   :  { %v292_v46 = vor.u32 1.1754944e-38, %v291_v43  ;;  %vm290_vm4 = vcmp.eq.f32.partialorder %v289_v44, 8.507059e+37 }
 0x30c   :  { %v347_v27 = vadd.f32 %v1550_v23, %v346_v26 }
 0x30e   :  { %v351_v30 = vsel %vm350_vm15, %v1550_v23, %v347_v27  ;;  %v1465_v23 = vld [vmem:[%s2604_s0 + $0x4] sm:$0x3] }
 0x30f   :  { %v356_v33 = vsel %vm353_vm0, %v355_v31, %v351_v30  ;;  %v1554_v38 = vpop.eup %1553 }
 0x310   :  { %v281_v39 = vmul.f32 %v1554_v38, %v279_v37  ;;  %vm286_vm1 = vweird.f32 %v1554_v38  ;;  %v359_v54 = vmul.f32 %v356_v33, %v2065_v53 }
 0x311   :  { %vm287_vm3 = vmor %vm285_vm2, %vm286_vm1 }
 0x312   :  { %v282_v40 = vsub.f32 1.0, %v281_v39 }
 0x314   :  { %v283_v41 = vmul.f32 %v1554_v38, %v282_v40 }
 0x316   :  { %v284_v42 = vadd.f32 %v1554_v38, %v283_v41 }
 0x318   :  { %v288_v45 = vsel %vm287_vm3, %v1554_v38, %v284_v42 }
 0x319   :  { %v293_v48 = vsel %vm290_vm4, %v292_v46, %v288_v45 }
 0x31a   :  { %v296_v57 = vmul.f32 %v293_v48, %v2079_v51 }
 0x336   :  { %v362_v32 = vpop.permute.xlu2 %361 }
 0x337   :  { %v364_v34 = vmul.f32 %v362_v32, %v356_v33 }
 0x339   :  { %366 = vrot.lane.b32.xlu1 %v364_v34, %s1887_s25 }
 0x36e   :  { %v299_v47 = vpop.permute.xlu0 %298 }
 0x36f   :  { %v301_v49 = vmul.f32 %v299_v47, %v293_v48 }
 0x371   :  { %303 = vrot.lane.b32.xlu2 %v301_v49, %s1887_s25 }
 0x379   :  { %390 = vperm.xlu2 %1526, %v388_v52  }
 0x3ab   :  { %v367_v56 = vpop.permute.xlu1 %366 }
 0x3ac   :  { %v2068_v58 = vadd.f32 %v367_v56, %v359_v54 }
 0x3ae   :  { %1555 = vtanh.f32 %v2068_v58 }
 0x3b4   :  { %v1556_v59 = vpop.eup %1555 }
 0x3b5   :  { %372 = vrot.lane.b32.xlu0 %v1556_v59, %s1884_s21 }
 0x3bd   :  { %378 = vperm.xlu0 %1524, %v376_v63  }
 0x3cb   :  { %v304_v5 = vpop.permute.xlu2 %303 }
 0x3cc   :  { %v2082_v7 = vadd.f32 %v304_v5, %v296_v57 }
 0x3ce   :  { %1557 = vtanh.f32 %v2082_v7 }
 0x3d3   :  { %v2086_v9 = vpop.permute.xlu2 %390 }
 0x3d4   :  { %v1558_v8 = vpop.eup %1557  ;;  %vm392_vm7 = vcmp.eq.s32.totalorder %v2086_v9, 1 }
 0x3d5   :  { %309 = vrot.lane.b32.xlu1 %v1558_v8, %s1884_s21 }
 0x427   :  { %v373_v10 = vpop.permute.xlu0 %372 }
 0x428   :  { %v2088_v11 = vmul.f32 %v373_v10, %v356_v33  ;;  %v1468_v10 = vld [vmem:[%s2606_s2 + $0xa] sm:$0x3] }
 0x429   :  { %vm469_vm2 = vcmp.gt.f32.partialorder %v1468_v10, 0.0 }
 0x42a   :  { %v2095_v55 = vsel %vm392_vm7, %v2088_v11, %v2030_v60 }
 0x42b   :  { %v472_v62 = vpack.c.bf16 %v2095_v55, %v2095_v55 }
 0x42d   :  { %474 = vrot.lane.b32.xlu1 %v472_v62, %s1887_s25  ;;  %v542_v62 = vsel %vm469_vm2, 1, %v1890_v0 }
 0x42f   :  { %v2100_v12 = vpop.permute.xlu0 %378 }
 0x430   :  { %vm380_vm8 = vcmp.eq.s32.totalorder %v2100_v12, 1 }
 0x447   :  { %v310_v13 = vpop.permute.xlu1 %309 }
 0x448   :  { %v312_v14 = vmul.f32 %v310_v13, %v293_v48  ;;  %v2136_v13 = vsel %vm392_vm7, %v2068_v58, %v2065_v53  ;;  %v2151_v53 = vsel %vm380_vm8, %v2082_v7, %v2079_v51 }
 0x44a   :  { %v2106_v15 = vsel %vm380_vm8, %v312_v14, %v2040_v6  ;;  %v2110_v16 = vsel %vm380_vm8, %v312_v14, 0.0 }
 0x44b   :  { %v409_v17 = vpack.c.bf16 %v2106_v15, %v2106_v15 }
 0x44d   :  { %411 = vrot.lane.b32.xlu2 %v409_v17, %s1887_s25 }
 0x49f   :  { %v475_v18 = vpop.permute.xlu1 %474 }
 0x4a0   :  { %1469 = vmatmul.msk.bf16.vlgmr.msrb.gmra.mxu1 %vm101_vm12, %v475_v18 }
 0x4a1   :  { %1095 = vmatpush.bf16.msrb.mxu1 %v1974_v2 }
 0x4a5   :  { %1096 = vmatpush.bf16.msrb.mxu1 %v1980_v4 }
 0x4a7   :  { %v412_v19 = vpop.permute.xlu2 %411 }
 0x4a8   :  { %1466 = vmatmul.msk.bf16.vlgmr.msrb.gmra.mxu0 %vm101_vm12, %v412_v19 }
 0x4a9   :  { %1033 = vmatpush.bf16.msrb.mxu0 %v1972_v1 }
 0x4ad   :  { %1034 = vmatpush.bf16.msrb.mxu0 %v1978_v3 }
 0x51d   :  { %v488_v21 = vpop.f32.mrf.mxu1 }
 0x51e   :  { %v492_v22 = vadd.f32 %v488_v21, %v471_v20  ;;  %v1464_v20 = vld [vmem:[%s2606_s2 + $0x4] sm:$0x3] }
 0x51f   :  { %vm406_vm3 = vcmp.gt.f32.partialorder %v1464_v20, 0.0 }
 0x520   :  { %1559 = vtanh.f32 %v492_v22  ;;  %v1470_v30 = vmul.f32 -1.442695, %v492_v22  ;;  %v530_v21 = vsel %vm406_vm3, 1, %v1890_v0 }
 0x525   :  { %v425_v24 = vpop.f32.mrf.mxu0  ;;  %v490_v25 = vpop.f32.mrf.mxu1 }
 0x526   :  { %v1560_v26 = vpop.eup %1559  ;;  %v429_v27 = vadd.f32 %v1465_v23, %v425_v24 }
 0x527   :  { %515 = vrot.lane.b32.xlu0 %v1560_v26, %s1884_s21 }
 0x528   :  { %1561 = vtanh.f32 %v429_v27  ;;  %v1467_v31 = vmul.f32 -1.442695, %v429_v27 }
 0x529   :  { %1563 = vpow2.f32 %v1470_v30 }
 0x52a   :  { %1565 = vpow2.f32 %v1467_v31 }
 0x52d   :  { %v427_v28 = vpop.f32.mrf.mxu0 }
 0x52e   :  { %v1562_v29 = vpop.eup %1561 }
 0x52f   :  { %452 = vrot.lane.b32.xlu1 %v1562_v29, %s1884_s21  ;;  %v1564_v32 = vpop.eup %1563 }
 0x530   :  { %v496_v33 = vadd.f32 1.0, %v1564_v32  ;;  %v1566_v34 = vpop.eup %1565 }
 0x531   :  { %v433_v35 = vadd.f32 1.0, %v1566_v34 }
 0x532   :  { %1567 = vrcp.f32 %v496_v33  ;;  %v508_v44 = vand.u32 2147483648, %v496_v33  ;;  %vm502_vm10 = vweird.f32 %v496_v33  ;;  %v506_v45 = vand.u32 2147483647, %v496_v33 }
 0x533   :  { %1569 = vrcp.f32 %v433_v35  ;;  %v445_v56 = vand.u32 2147483648, %v433_v35  ;;  %vm439_vm15 = vweird.f32 %v433_v35  ;;  %v443_v59 = vand.u32 2147483647, %v433_v35 }
 0x534   :  { %v509_v48 = vor.u32 1.1754944e-38, %v508_v44  ;;  %vm507_vm13 = vcmp.eq.f32.partialorder %v506_v45, 8.507059e+37 }
 0x535   :  { %v446_v63 = vor.u32 1.1754944e-38, %v445_v56  ;;  %vm444_vm1 = vcmp.eq.f32.partialorder %v443_v59, 8.507059e+37 }
 0x538   :  { %v1568_v36 = vpop.eup %1567 }
 0x539   :  { %v498_v37 = vmul.f32 %v1568_v36, %v496_v33  ;;  %v1570_v39 = vpop.eup %1569  ;;  %vm503_vm9 = vweird.f32 %v1568_v36 }
 0x53a   :  { %v435_v41 = vmul.f32 %v1570_v39, %v433_v35  ;;  %vm504_vm11 = vmor %vm502_vm10, %vm503_vm9  ;;  %vm440_vm14 = vweird.f32 %v1570_v39 }
 0x53b   :  { %v499_v38 = vsub.f32 1.0, %v498_v37  ;;  %vm441_vm0 = vmor %vm439_vm15, %vm440_vm14 }
 0x53c   :  { %v436_v43 = vsub.f32 1.0, %v435_v41 }
 0x53d   :  { %v500_v40 = vmul.f32 %v1568_v36, %v499_v38 }
 0x53e   :  { %v437_v47 = vmul.f32 %v1570_v39, %v436_v43 }
 0x53f   :  { %v501_v42 = vadd.f32 %v1568_v36, %v500_v40 }
 0x540   :  { %v438_v54 = vadd.f32 %v1570_v39, %v437_v47 }
 0x541   :  { %v505_v46 = vsel %vm504_vm11, %v1568_v36, %v501_v42 }
 0x542   :  { %v510_v49 = vsel %vm507_vm13, %v509_v48, %v505_v46  ;;  %v442_v61 = vsel %vm441_vm0, %v1570_v39, %v438_v54 }
 0x543   :  { %v447_v5 = vsel %vm444_vm1, %v446_v63, %v442_v61  ;;  %v513_v14 = vmul.f32 %v510_v49, %v2136_v13 }
 0x544   :  { %v450_v58 = vmul.f32 %v447_v5, %v2151_v53 }
 0x599   :  { %v516_v50 = vpop.permute.xlu0 %515 }
 0x59a   :  { %v518_v52 = vmul.f32 %v516_v50, %v510_v49 }
 0x59c   :  { %520 = vrot.lane.b32.xlu2 %v518_v52, %s1887_s25 }
 0x5a1   :  { %v453_v57 = vpop.permute.xlu1 %452 }
 0x5a2   :  { %v455_v8 = vmul.f32 %v453_v57, %v447_v5 }
 0x5a4   :  { %457 = vrot.lane.b32.xlu0 %v455_v8, %s1887_s25 }
 0x5ac   :  { %544 = vperm.xlu0 %1524, %v542_v62  }
 0x5f6   :  { %v521_v17 = vpop.permute.xlu2 %520 }
 0x5f7   :  { %v2139_v18 = vadd.f32 %v521_v17, %v513_v14 }
 0x5f9   :  { %1571 = vtanh.f32 %v2139_v18 }
 0x5ff   :  { %v1572_v19 = vpop.eup %1571 }
 0x600   :  { %526 = vrot.lane.b32.xlu1 %v1572_v19, %s1884_s21 }
 0x608   :  { %532 = vperm.xlu1 %1525, %v530_v21  }
 0x616   :  { %v458_v22 = vpop.permute.xlu0 %457 }
 0x617   :  { %v2154_v23 = vadd.f32 %v458_v22, %v450_v58 }
 0x619   :  { %1573 = vtanh.f32 %v2154_v23 }
 0x61e   :  { %v2158_v25 = vpop.permute.xlu0 %544 }
 0x61f   :  { %v1574_v24 = vpop.eup %1573  ;;  %vm546_vm4 = vcmp.eq.s32.totalorder %v2158_v25, 1 }
 0x620   :  { %463 = vrot.lane.b32.xlu2 %v1574_v24, %s1884_s21  ;;  %v1475_v24 = vld [vmem:[%s2606_s2 + $0x8] sm:$0x3] }
 0x621   :  { %vm623_vm0 = vcmp.gt.f32.partialorder %v1475_v24, 0.0 }
 0x672   :  { %v527_v26 = vpop.permute.xlu1 %526 }
 0x673   :  { %v2160_v27 = vmul.f32 %v527_v26, %v510_v49  ;;  %v696_v26 = vsel %vm623_vm0, 1, %v1890_v0 }
 0x675   :  { %v2167_v51 = vsel %vm546_vm4, %v2160_v27, %v2095_v55 }
 0x676   :  { %v626_v7 = vpack.c.bf16 %v2167_v51, %v2167_v51 }
 0x678   :  { %628 = vrot.lane.b32.xlu2 %v626_v7, %s1887_s25  ;;  %v2208_v7 = vsel %vm546_vm4, %v2139_v18, %v2136_v13  ;;  %v1471_v13 = vld [vmem:[%s2606_s2 + $0x6] sm:$0x3] }
 0x679   :  { %vm560_vm1 = vcmp.gt.f32.partialorder %v1471_v13, 0.0 }
 0x67a   :  { %v2172_v12 = vpop.permute.xlu1 %532  ;;  %v464_v28 = vpop.permute.xlu2 %463  ;;  %v684_v18 = vsel %vm560_vm1, 1, %v1890_v0 }
 0x67b   :  { %vm534_vm5 = vcmp.eq.s32.totalorder %v2172_v12, 1  ;;  %v466_v29 = vmul.f32 %v464_v28, %v447_v5 }
 0x67d   :  { %v2178_v30 = vsel %vm534_vm5, %v466_v29, %v2106_v15  ;;  %v2182_v55 = vsel %vm534_vm5, %v466_v29, 0.0  ;;  %v625_v15 = vld [vmem:[#allocation2 + $0x8] sm:$0x3] }
 0x67e   :  { %v563_v31 = vpack.c.bf16 %v2178_v30, %v2178_v30 }
 0x680   :  { %565 = vrot.lane.b32.xlu0 %v563_v31, %s1887_s25 }
 0x6d2   :  { %v629_v32 = vpop.permute.xlu2 %628 }
 0x6d3   :  { %1476 = vmatmul.msk.bf16.vlgmr.msrb.gmra.mxu3 %vm101_vm12, %v629_v32  ;;  %v2218_v32 = vsel %vm534_vm5, %v2154_v23, %v2151_v53 }
 0x6d4   :  { %1246 = vmatpush.bf16.msrb.mxu3 %v1974_v2  ;;  %v1472_v2 = vld [vmem:[%s2604_s0 + $0x6] sm:$0x3] }
 0x6d8   :  { %1247 = vmatpush.bf16.msrb.mxu3 %v1980_v4 }
 0x6f2   :  { %v566_v33 = vpop.permute.xlu0 %565 }
 0x6f3   :  { %1473 = vmatmul.msk.bf16.vlgmr.msrb.gmra.mxu2 %vm101_vm12, %v566_v33 }
 0x6f4   :  { %1185 = vmatpush.bf16.msrb.mxu2 %v1972_v1 }
 0x6f8   :  { %1186 = vmatpush.bf16.msrb.mxu2 %v1978_v3 }
 0x756   :  { %v642_v34 = vpop.f32.mrf.mxu3 }
 0x757   :  { %v646_v35 = vadd.f32 %v642_v34, %v625_v15 }
 0x759   :  { %1575 = vtanh.f32 %v646_v35  ;;  %v1477_v1 = vmul.f32 -1.442695, %v646_v35 }
 0x75e   :  { %v644_v36 = vpop.f32.mrf.mxu3 }
 0x75f   :  { %v1576_v37 = vpop.eup %1575 }
 0x760   :  { %669 = vrot.lane.b32.xlu1 %v1576_v37, %s1884_s21 }
 0x776   :  { %v579_v4 = vpop.f32.mrf.mxu2 }
 0x777   :  { %v583_v38 = vadd.f32 %v1472_v2, %v579_v4 }
 0x779   :  { %1577 = vtanh.f32 %v583_v38  ;;  %v1474_v3 = vmul.f32 -1.442695, %v583_v38 }
 0x77a   :  { %1579 = vpow2.f32 %v1477_v1 }
 0x77b   :  { %1581 = vpow2.f32 %v1474_v3 }
 0x77e   :  { %v581_v39 = vpop.f32.mrf.mxu2 }
 0x77f   :  { %v1578_v40 = vpop.eup %1577 }
 0x780   :  { %606 = vrot.lane.b32.xlu2 %v1578_v40, %s1884_s21  ;;  %v1580_v41 = vpop.eup %1579 }
 0x781   :  { %v650_v42 = vadd.f32 1.0, %v1580_v41  ;;  %v1582_v43 = vpop.eup %1581 }
 0x782   :  { %v587_v44 = vadd.f32 1.0, %v1582_v43 }
 0x783   :  { %1583 = vrcp.f32 %v650_v42  ;;  %v662_v56 = vand.u32 2147483648, %v650_v42  ;;  %vm656_vm8 = vweird.f32 %v650_v42  ;;  %v660_v59 = vand.u32 2147483647, %v650_v42 }
 0x784   :  { %1585 = vrcp.f32 %v587_v44  ;;  %v599_v14 = vand.u32 2147483648, %v587_v44  ;;  %vm593_vm13 = vweird.f32 %v587_v44  ;;  %v597_v17 = vand.u32 2147483647, %v587_v44 }
 0x785   :  { %v663_v57 = vor.u32 1.1754944e-38, %v662_v56  ;;  %vm661_vm10 = vcmp.eq.f32.partialorder %v660_v59, 8.507059e+37 }
 0x786   :  { %v600_v20 = vor.u32 1.1754944e-38, %v599_v14  ;;  %vm598_vm15 = vcmp.eq.f32.partialorder %v597_v17, 8.507059e+37 }
 0x789   :  { %v1584_v45 = vpop.eup %1583 }
 0x78a   :  { %v652_v46 = vmul.f32 %v1584_v45, %v650_v42  ;;  %v1586_v48 = vpop.eup %1585  ;;  %vm657_vm6 = vweird.f32 %v1584_v45  ;;  %v777_v42 = vld [vmem:[#allocation2 + $0x6] sm:$0x3] }
 0x78b   :  { %v589_v50 = vmul.f32 %v1586_v48, %v587_v44  ;;  %vm658_vm9 = vmor %vm656_vm8, %vm657_vm6  ;;  %vm594_vm11 = vweird.f32 %v1586_v48 }
 0x78c   :  { %v653_v47 = vsub.f32 1.0, %v652_v46  ;;  %vm595_vm14 = vmor %vm593_vm13, %vm594_vm11  ;;  %v1479_v46 = vld [vmem:[%s2604_s0 + $0x8] sm:$0x3] }
 0x78d   :  { %v590_v54 = vsub.f32 1.0, %v589_v50 }
 0x78e   :  { %v654_v49 = vmul.f32 %v1584_v45, %v653_v47 }
 0x78f   :  { %v591_v63 = vmul.f32 %v1586_v48, %v590_v54 }
 0x790   :  { %v655_v52 = vadd.f32 %v1584_v45, %v654_v49 }
 0x791   :  { %v592_v62 = vadd.f32 %v1586_v48, %v591_v63 }
 0x792   :  { %v659_v61 = vsel %vm658_vm9, %v1584_v45, %v655_v52 }
 0x793   :  { %v664_v8 = vsel %vm661_vm10, %v663_v57, %v659_v61  ;;  %v596_v19 = vsel %vm595_vm14, %v1586_v48, %v592_v62 }
 0x794   :  { %v601_v21 = vsel %vm598_vm15, %v600_v20, %v596_v19  ;;  %v667_v28 = vmul.f32 %v664_v8, %v2208_v7 }
 0x795   :  { %v604_v33 = vmul.f32 %v601_v21, %v2218_v32 }
 0x7d2   :  { %v670_v5 = vpop.permute.xlu1 %669 }
 0x7d3   :  { %v672_v10 = vmul.f32 %v670_v5, %v664_v8 }
 0x7d5   :  { %674 = vrot.lane.b32.xlu0 %v672_v10, %s1887_s25 }
 0x7da   :  { %v607_v58 = vpop.permute.xlu2 %606 }
 0x7db   :  { %v609_v22 = vmul.f32 %v607_v58, %v601_v21 }
 0x7dd   :  { %611 = vrot.lane.b32.xlu1 %v609_v22, %s1887_s25 }
 0x7e5   :  { %698 = vperm.xlu1 %1525, %v696_v26  }
 0x847   :  { %v675_v29 = vpop.permute.xlu0 %674 }
 0x848   :  { %v2211_v31 = vadd.f32 %v675_v29, %v667_v28 }
 0x84a   :  { %1587 = vtanh.f32 %v2211_v31 }
 0x84f   :  { %v612_v15 = vpop.permute.xlu1 %611 }
 0x850   :  { %v1588_v34 = vpop.eup %1587  ;;  %v2221_v35 = vadd.f32 %v612_v15, %v604_v33 }
 0x851   :  { %680 = vrot.lane.b32.xlu2 %v1588_v34, %s1884_s21 }
 0x852   :  { %1589 = vtanh.f32 %v2221_v35 }
 0x857   :  { %v2230_v53 = vpop.permute.xlu1 %698 }
 0x858   :  { %v1590_v12 = vpop.eup %1589  ;;  %vm700_vm2 = vcmp.eq.s32.totalorder %v2230_v53, 1 }
 0x859   :  { %686 = vperm.xlu2 %1526, %v684_v18   ;;  %617 = vrot.lane.b32.xlu0 %v1590_v12, %s1884_s21 }
 0x8ab   :  { %v681_v23 = vpop.permute.xlu2 %680 }
 0x8ac   :  { %v2232_v36 = vmul.f32 %v681_v23, %v664_v8 }
 0x8ae   :  { %v2239_v37 = vsel %vm700_vm2, %v2232_v36, %v2167_v51 }
 0x8af   :  { %v778_v2 = vpack.c.bf16 %v2239_v37, %v2239_v37 }
 0x8b1   :  { %780 = vrot.lane.b32.xlu0 %v778_v2, %s1887_s25 }
 0x8b3   :  { %v2244_v4 = vpop.permute.xlu2 %686 }
 0x8b4   :  { %vm688_vm3 = vcmp.eq.s32.totalorder %v2244_v4, 1 }
 0x8cb   :  { %v618_v38 = vpop.permute.xlu0 %617 }
 0x8cc   :  { %v620_v39 = vmul.f32 %v618_v38, %v601_v21  ;;  %v1482_v38 = vld [vmem:[%s2606_s2 + $0x6] sm:$0x3] }
 0x8cd   :  { %vm775_vm15 = vcmp.gt.f32.partialorder %v1482_v38, 0.0 }
 0x8ce   :  { %v2250_v40 = vsel %vm688_vm3, %v620_v39, %v2178_v30  ;;  %v2254_v51 = vsel %vm688_vm3, %v620_v39, 0.0  ;;  %v848_v39 = vsel %vm775_vm15, 1, %v1890_v0 }
 0x8cf   :  { %v716_v1 = vpack.c.bf16 %v2250_v40, %v2250_v40 }
 0x8d1   :  { %718 = vrot.lane.b32.xlu1 %v716_v1, %s1887_s25  ;;  %v2276_v1 = vsel %vm700_vm2, %v2211_v31, %v2208_v7  ;;  %v2291_v7 = vsel %vm688_vm3, %v2221_v35, %v2218_v32 }
 0x923   :  { %v781_v3 = vpop.permute.xlu0 %780 }
 0x924   :  { %1483 = vmatmul.msk.bf16.vlgmr.msra.gmra.mxu1 %vm101_vm12, %v781_v3 }
 0x943   :  { %v719_v41 = vpop.permute.xlu1 %718 }
 0x944   :  { %1480 = vmatmul.msk.bf16.vlgmr.msra.gmra.mxu0 %vm101_vm12, %v719_v41 }
 0x9a1   :  { %v794_v43 = vpop.f32.mrf.mxu1 }
 0x9a2   :  { %v798_v44 = vadd.f32 %v794_v43, %v777_v42 }
 0x9a4   :  { %1591 = vtanh.f32 %v798_v44  ;;  %v1484_v52 = vmul.f32 -1.442695, %v798_v44  ;;  %v1478_v44 = vld [vmem:[%s2606_s2 + $0x8] sm:$0x3] }
 0x9a5   :  { %vm713_vm0 = vcmp.gt.f32.partialorder %v1478_v44, 0.0 }
 0x9a9   :  { %v796_v30 = vpop.f32.mrf.mxu1 }
 0x9aa   :  { %v1592_v45 = vpop.eup %1591  ;;  %v836_v30 = vsel %vm713_vm0, 1, %v1890_v0 }
 0x9ab   :  { %821 = vrot.lane.b32.xlu2 %v1592_v45, %s1884_s21 }
 0x9c1   :  { %v732_v47 = vpop.f32.mrf.mxu0 }
 0x9c2   :  { %v736_v48 = vadd.f32 %v1479_v46, %v732_v47 }
 0x9c4   :  { %1593 = vtanh.f32 %v736_v48  ;;  %v1481_v21 = vmul.f32 -1.442695, %v736_v48 }
 0x9c5   :  { %1595 = vpow2.f32 %v1484_v52 }
 0x9c9   :  { %v734_v49 = vpop.f32.mrf.mxu0 }
 0x9ca   :  { %v1594_v50 = vpop.eup %1593 }
 0x9cb   :  { %759 = vrot.lane.b32.xlu0 %v1594_v50, %s1884_s21  ;;  %v1596_v54 = vpop.eup %1595 }
 0x9cc   :  { %v802_v56 = vadd.f32 1.0, %v1596_v54 }
 0x9ce   :  { %1597 = vrcp.f32 %v802_v56  ;;  %v814_v8 = vand.u32 2147483648, %v802_v56  ;;  %vm808_vm6 = vweird.f32 %v802_v56  ;;  %v812_v10 = vand.u32 2147483647, %v802_v56 }
 0x9cf   :  { %1599 = vpow2.f32 %v1481_v21 }
 0x9d0   :  { %v815_v14 = vor.u32 1.1754944e-38, %v814_v8  ;;  %vm813_vm9 = vcmp.eq.f32.partialorder %v812_v10, 8.507059e+37 }
 0x9d4   :  { %v1598_v59 = vpop.eup %1597 }
 0x9d5   :  { %v804_v61 = vmul.f32 %v1598_v59, %v802_v56  ;;  %vm809_vm5 = vweird.f32 %v1598_v59  ;;  %v1600_v58 = vpop.eup %1599 }
 0x9d6   :  { %vm810_vm8 = vmor %vm808_vm6, %vm809_vm5  ;;  %v740_v22 = vadd.f32 1.0, %v1600_v58 }
 0x9d7   :  { %v805_v63 = vsub.f32 1.0, %v804_v61 }
 0x9d8   :  { %1601 = vrcp.f32 %v740_v22  ;;  %v752_v15 = vand.u32 2147483648, %v740_v22  ;;  %vm746_vm11 = vweird.f32 %v740_v22  ;;  %v750_v34 = vand.u32 2147483647, %v740_v22 }
 0x9d9   :  { %v806_v57 = vmul.f32 %v1598_v59, %v805_v63 }
 0x9da   :  { %v753_v18 = vor.u32 1.1754944e-38, %v752_v15  ;;  %vm751_vm14 = vcmp.eq.f32.partialorder %v750_v34, 8.507059e+37 }
 0x9db   :  { %v807_v5 = vadd.f32 %v1598_v59, %v806_v57  ;;  %v929_v57 = vld [vmem:[#allocation2 + $0x4] sm:$0x3] }
 0x9dd   :  { %v811_v62 = vsel %vm810_vm8, %v1598_v59, %v807_v5 }
 0x9de   :  { %v816_v17 = vsel %vm813_vm9, %v815_v14, %v811_v62  ;;  %v1602_v24 = vpop.eup %1601 }
 0x9df   :  { %v742_v26 = vmul.f32 %v1602_v24, %v740_v22  ;;  %vm747_vm10 = vweird.f32 %v1602_v24  ;;  %v819_v3 = vmul.f32 %v816_v17, %v2276_v1 }
 0x9e0   :  { %vm748_vm13 = vmor %vm746_vm11, %vm747_vm10 }
 0x9e1   :  { %v743_v28 = vsub.f32 1.0, %v742_v26 }
 0x9e3   :  { %v744_v29 = vmul.f32 %v1602_v24, %v743_v28 }
 0x9e5   :  { %v745_v33 = vadd.f32 %v1602_v24, %v744_v29 }
 0x9e7   :  { %v749_v13 = vsel %vm748_vm13, %v1602_v24, %v745_v33 }
 0x9e8   :  { %v754_v23 = vsel %vm751_vm14, %v753_v18, %v749_v13 }
 0x9e9   :  { %v757_v31 = vmul.f32 %v754_v23, %v2291_v7 }
 0xa05   :  { %v822_v19 = vpop.permute.xlu2 %821 }
 0xa06   :  { %v824_v20 = vmul.f32 %v822_v19, %v816_v17 }
 0xa08   :  { %826 = vrot.lane.b32.xlu1 %v824_v20, %s1887_s25 }
 0xa3d   :  { %v760_v12 = vpop.permute.xlu0 %759 }
 0xa3e   :  { %v762_v2 = vmul.f32 %v760_v12, %v754_v23 }
 0xa40   :  { %764 = vrot.lane.b32.xlu2 %v762_v2, %s1887_s25 }
 0xa48   :  { %850 = vperm.xlu2 %1526, %v848_v39  }
 0xa7a   :  { %v827_v41 = vpop.permute.xlu1 %826 }
 0xa7b   :  { %v2279_v42 = vadd.f32 %v827_v41, %v819_v3 }
 0xa7d   :  { %1603 = vtanh.f32 %v2279_v42 }
 0xa83   :  { %v1604_v43 = vpop.eup %1603 }
 0xa84   :  { %832 = vrot.lane.b32.xlu0 %v1604_v43, %s1884_s21 }
 0xa8c   :  { %838 = vperm.xlu0 %1524, %v836_v30  }
 0xa9a   :  { %v765_v45 = vpop.permute.xlu2 %764 }
 0xa9b   :  { %v2294_v46 = vadd.f32 %v765_v45, %v757_v31 }
 0xa9d   :  { %1605 = vtanh.f32 %v2294_v46 }
 0xaa2   :  { %v2298_v48 = vpop.permute.xlu2 %850 }
 0xaa3   :  { %v1606_v47 = vpop.eup %1605  ;;  %vm852_vm1 = vcmp.eq.s32.totalorder %v2298_v48, 1 }
 0xaa4   :  { %770 = vrot.lane.b32.xlu1 %v1606_v47, %s1884_s21 }
 0xaf6   :  { %v833_v49 = vpop.permute.xlu0 %832 }
 0xaf7   :  { %v2300_v50 = vmul.f32 %v833_v49, %v816_v17 }
 0xaf9   :  { %v2307_v32 = vsel %vm852_vm1, %v2300_v50, %v2239_v37 }
 0xafa   :  { %v930_v35 = vpack.c.bf16 %v2307_v32, %v2307_v32 }
 0xafc   :  { %932 = vrot.lane.b32.xlu1 %v930_v35, %s1887_s25 }
 0xafe   :  { %v2312_v4 = vpop.permute.xlu0 %838 }
 0xaff   :  { %vm840_vm3 = vcmp.eq.s32.totalorder %v2312_v4, 1 }
 0xb16   :  { %v771_v52 = vpop.permute.xlu1 %770 }
 0xb17   :  { %v773_v54 = vmul.f32 %v771_v52, %v754_v23 }
 0xb19   :  { %v2318_v56 = vsel %vm840_vm3, %v773_v54, %v2250_v40  ;;  %v2322_v37 = vsel %vm840_vm3, %v773_v54, 0.0  ;;  %v1486_v40 = vld [vmem:[%s2604_s0 + $0xa] sm:$0x3] }
 0xb1a   :  { %v868_v59 = vpack.c.bf16 %v2318_v56, %v2318_v56 }
 0xb1c   :  { %870 = vrot.lane.b32.xlu2 %v868_v59, %s1887_s25 }
 0xb6e   :  { %v933_v61 = vpop.permute.xlu1 %932 }
 0xb6f   :  { %1490 = vmatmul.msk.bf16.vlgmr.msra.gmra.mxu3 %vm101_vm12, %v933_v61  ;;  %v1489_v61 = vld [vmem:[%s2606_s2 + $0x4] sm:$0x3] }
 0xb70   :  { %vm927_vm15 = vcmp.gt.f32.partialorder %v1489_v61, 0.0 }
 0xb76   :  { %v871_v63 = vpop.permute.xlu2 %870 }
 0xb77   :  { %1487 = vmatmul.msk.bf16.vlgmr.msra.gmra.mxu2 %vm101_vm12, %v871_v63  ;;  %v1000_v63 = vsel %vm927_vm15, 1, %v1890_v0 }
 0xbf2   :  { %v946_v5 = vpop.f32.mrf.mxu3 }
 0xbf3   :  { %v950_v8 = vadd.f32 %v946_v5, %v929_v57  ;;  %v2344_v57 = vsel %vm852_vm1, %v2279_v42, %v2276_v1  ;;  %v2359_v1 = vsel %vm840_vm3, %v2294_v46, %v2291_v7 }
 0xbf5   :  { %1607 = vtanh.f32 %v950_v8  ;;  %v1491_v21 = vmul.f32 -1.442695, %v950_v8 }
 0xbfa   :  { %v884_v10 = vpop.f32.mrf.mxu2  ;;  %v948_v62 = vpop.f32.mrf.mxu3 }
 0xbfb   :  { %v1608_v14 = vpop.eup %1607  ;;  %v888_v17 = vadd.f32 %v1486_v40, %v884_v10  ;;  %v1485_v62 = vld [vmem:[%s2606_s2 + $0xa] sm:$0x3] }
 0xbfc   :  { %973 = vrot.lane.b32.xlu0 %v1608_v14, %s1884_s21  ;;  %vm865_vm0 = vcmp.gt.f32.partialorder %v1485_v62, 0.0 }
 0xbfd   :  { %1609 = vtanh.f32 %v888_v17  ;;  %v1488_v58 = vmul.f32 -1.442695, %v888_v17  ;;  %v988_v14 = vsel %vm865_vm0, 1, %v1890_v0 }
 0xbfe   :  { %1611 = vpow2.f32 %v1491_v21 }
 0xbff   :  { %1613 = vpow2.f32 %v1488_v58 }
 0xc02   :  { %v886_v19 = vpop.f32.mrf.mxu2 }
 0xc03   :  { %v1610_v20 = vpop.eup %1609 }
 0xc04   :  { %911 = vrot.lane.b32.xlu1 %v1610_v20, %s1884_s21  ;;  %v1612_v22 = vpop.eup %1611 }
 0xc05   :  { %v954_v24 = vadd.f32 1.0, %v1612_v22  ;;  %v1614_v26 = vpop.eup %1613 }
 0xc06   :  { %v892_v28 = vadd.f32 1.0, %v1614_v26 }
 0xc07   :  { %1615 = vrcp.f32 %v954_v24  ;;  %v966_v2 = vand.u32 2147483648, %v954_v24  ;;  %vm960_vm6 = vweird.f32 %v954_v24  ;;  %v964_v38 = vand.u32 2147483647, %v954_v24 }
 0xc08   :  { %1617 = vrcp.f32 %v892_v28  ;;  %v904_v45 = vand.u32 2147483648, %v892_v28  ;;  %vm898_vm11 = vweird.f32 %v892_v28  ;;  %v902_v47 = vand.u32 2147483647, %v892_v28 }
 0xc09   :  { %v967_v41 = vor.u32 1.1754944e-38, %v966_v2  ;;  %vm965_vm9 = vcmp.eq.f32.partialorder %v964_v38, 8.507059e+37 }
 0xc0a   :  { %v905_v35 = vor.u32 1.1754944e-38, %v904_v45  ;;  %vm903_vm14 = vcmp.eq.f32.partialorder %v902_v47, 8.507059e+37 }
 0xc0d   :  { %v1616_v29 = vpop.eup %1615 }
 0xc0e   :  { %v956_v33 = vmul.f32 %v1616_v29, %v954_v24  ;;  %v1618_v34 = vpop.eup %1617  ;;  %vm961_vm5 = vweird.f32 %v1616_v29 }
 0xc0f   :  { %v894_v18 = vmul.f32 %v1618_v34, %v892_v28  ;;  %vm962_vm8 = vmor %vm960_vm6, %vm961_vm5  ;;  %vm899_vm10 = vweird.f32 %v1618_v34 }
 0xc10   :  { %v957_v15 = vsub.f32 1.0, %v956_v33  ;;  %vm900_vm13 = vmor %vm898_vm11, %vm899_vm10 }
 0xc11   :  { %v895_v23 = vsub.f32 1.0, %v894_v18 }
 0xc12   :  { %v958_v13 = vmul.f32 %v1616_v29, %v957_v15 }
 0xc13   :  { %v896_v3 = vmul.f32 %v1618_v34, %v895_v23  ;;  %v1493_v23 = vld [vmem:[%s2604_s0 + $0xc] sm:$0x3] }
 0xc14   :  { %v959_v12 = vadd.f32 %v1616_v29, %v958_v13 }
 0xc15   :  { %v897_v31 = vadd.f32 %v1618_v34, %v896_v3 }
 0xc16   :  { %v963_v39 = vsel %vm962_vm8, %v1616_v29, %v959_v12 }
 0xc17   :  { %v968_v44 = vsel %vm965_vm9, %v967_v41, %v963_v39  ;;  %v901_v49 = vsel %vm900_vm13, %v1618_v34, %v897_v31  ;;  %v1081_v34 = vld [vmem:[#allocation2 + $0x2] sm:$0x3] }
 0xc18   :  { %v906_v52 = vsel %vm903_vm14, %v905_v35, %v901_v49  ;;  %v971_v5 = vmul.f32 %v968_v44, %v2344_v57 }
 0xc19   :  { %v909_v42 = vmul.f32 %v906_v52, %v2359_v1 }
 0xc6e   :  { %v974_v43 = vpop.permute.xlu0 %973 }
 0xc6f   :  { %v976_v30 = vmul.f32 %v974_v43, %v968_v44 }
 0xc71   :  { %978 = vrot.lane.b32.xlu2 %v976_v30, %s1887_s25 }
 0xc76   :  { %v912_v54 = vpop.permute.xlu1 %911 }
 0xc77   :  { %v914_v59 = vmul.f32 %v912_v54, %v906_v52 }
 0xc79   :  { %916 = vrot.lane.b32.xlu0 %v914_v59, %s1887_s25 }
 0xc81   :  { %1002 = vperm.xlu0 %1524, %v1000_v63  }
 0xccb   :  { %v979_v8 = vpop.permute.xlu2 %978 }
 0xccc   :  { %v2347_v40 = vadd.f32 %v979_v8, %v971_v5 }
 0xcce   :  { %1619 = vtanh.f32 %v2347_v40 }
 0xcd4   :  { %v1620_v10 = vpop.eup %1619 }
 0xcd5   :  { %984 = vrot.lane.b32.xlu1 %v1620_v10, %s1884_s21 }
 0xcdd   :  { %990 = vperm.xlu1 %1525, %v988_v14  }
 0xceb   :  { %v917_v17 = vpop.permute.xlu0 %916 }
 0xcec   :  { %v2362_v19 = vadd.f32 %v917_v17, %v909_v42 }
 0xcee   :  { %1621 = vtanh.f32 %v2362_v19 }
 0xcf3   :  { %v2366_v21 = vpop.permute.xlu0 %1002 }
 0xcf4   :  { %v1622_v20 = vpop.eup %1621  ;;  %vm1004_vm5 = vcmp.eq.s32.totalorder %v2366_v21, 1 }
 0xcf5   :  { %922 = vrot.lane.b32.xlu2 %v1622_v20, %s1884_s21 }
 0xd47   :  { %v985_v58 = vpop.permute.xlu1 %984 }
 0xd48   :  { %v2368_v22 = vmul.f32 %v985_v58, %v968_v44 }
 0xd4a   :  { %v2375_v7 = vsel %vm1004_vm5, %v2368_v22, %v2307_v32 }
 0xd4b   :  { %v1082_v46 = vpack.c.bf16 %v2375_v7, %v2375_v7 }
 0xd4d   :  { %1084 = vrot.lane.b32.xlu2 %v1082_v46, %s1887_s25 }
 0xd4f   :  { %v923_v4 = vpop.permute.xlu2 %922  ;;  %v2380_v24 = vpop.permute.xlu1 %990 }
 0xd50   :  { %v925_v26 = vmul.f32 %v923_v4, %v906_v52  ;;  %vm992_vm3 = vcmp.eq.s32.totalorder %v2380_v24, 1 }
 0xd52   :  { %v2386_v28 = vsel %vm992_vm3, %v925_v26, %v2318_v56  ;;  %v2390_v32 = vsel %vm992_vm3, %v925_v26, 0.0 }
 0xd53   :  { %v1020_v29 = vpack.c.bf16 %v2386_v28, %v2386_v28 }
 0xd55   :  { %1022 = vrot.lane.b32.xlu0 %v1020_v29, %s1887_s25 }
 0xda7   :  { %v1085_v33 = vpop.permute.xlu2 %1084 }
 0xda8   :  { %1497 = vmatmul.msk.bf16.vlgmr.msrb.gmra.mxu1 %vm101_vm12, %v1085_v33 }
 0xdc7   :  { %v1023_v15 = vpop.permute.xlu0 %1022 }
 0xdc8   :  { %1494 = vmatmul.msk.bf16.vlgmr.msrb.gmra.mxu0 %vm101_vm12, %v1023_v15 }
 0xe25   :  { %v1098_v13 = vpop.f32.mrf.mxu1 }
 0xe26   :  { %v1102_v18 = vadd.f32 %v1098_v13, %v1081_v34  ;;  %v1496_v13 = vld [vmem:[%s2606_s2 + $0x2] sm:$0x3] }
 0xe27   :  { %vm1079_vm0 = vcmp.gt.f32.partialorder %v1496_v13, 0.0 }
 0xe28   :  { %1623 = vtanh.f32 %v1102_v18  ;;  %v1498_v41 = vmul.f32 -1.442695, %v1102_v18  ;;  %v1152_v18 = vsel %vm1079_vm0, 1, %v1890_v0 }
 0xe2d   :  { %v1100_v56 = vpop.f32.mrf.mxu1 }
 0xe2e   :  { %v1624_v12 = vpop.eup %1623  ;;  %v2412_v56 = vsel %vm1004_vm5, %v2347_v40, %v2344_v57  ;;  %v1492_v57 = vld [vmem:[%s2606_s2 + $0xc] sm:$0x3] }
 0xe2f   :  { %1125 = vrot.lane.b32.xlu1 %v1624_v12, %s1884_s21 }
 0xe45   :  { %v1036_v2 = vpop.f32.mrf.mxu0 }
 0xe46   :  { %v1040_v38 = vadd.f32 %v1493_v23, %v1036_v2 }
 0xe48   :  { %1625 = vtanh.f32 %v1040_v38  ;;  %v1495_v43 = vmul.f32 -1.442695, %v1040_v38  ;;  %v2422_v38 = vsel %vm992_vm3, %v2362_v19, %v2359_v1 }
 0xe49   :  { %1627 = vpow2.f32 %v1498_v41 }
 0xe4a   :  { %1629 = vpow2.f32 %v1495_v43 }
 0xe4d   :  { %v1038_v39 = vpop.f32.mrf.mxu0 }
 0xe4e   :  { %v1626_v3 = vpop.eup %1625 }
 0xe4f   :  { %1063 = vrot.lane.b32.xlu2 %v1626_v3, %s1884_s21  ;;  %v1628_v44 = vpop.eup %1627 }
 0xe50   :  { %v1106_v30 = vadd.f32 1.0, %v1628_v44  ;;  %v1630_v31 = vpop.eup %1629 }
 0xe51   :  { %v1044_v45 = vadd.f32 1.0, %v1630_v31 }
 0xe52   :  { %1631 = vrcp.f32 %v1106_v30  ;;  %v1118_v5 = vand.u32 2147483648, %v1106_v30  ;;  %vm1112_vm8 = vweird.f32 %v1106_v30  ;;  %v1116_v8 = vand.u32 2147483647, %v1106_v30 }
 0xe53   :  { %1633 = vrcp.f32 %v1044_v45  ;;  %v1056_v46 = vand.u32 2147483648, %v1044_v45  ;;  %vm1050_vm13 = vweird.f32 %v1044_v45  ;;  %v1054_v4 = vand.u32 2147483647, %v1044_v45 }
 0xe54   :  { %v1119_v14 = vor.u32 1.1754944e-38, %v1118_v5  ;;  %vm1117_vm10 = vcmp.eq.f32.partialorder %v1116_v8, 8.507059e+37 }
 0xe55   :  { %v1057_v29 = vor.u32 1.1754944e-38, %v1056_v46  ;;  %vm1055_vm15 = vcmp.eq.f32.partialorder %v1054_v4, 8.507059e+37 }
 0xe58   :  { %v1632_v47 = vpop.eup %1631 }
 0xe59   :  { %v1108_v49 = vmul.f32 %v1632_v47, %v1106_v30  ;;  %v1634_v52 = vpop.eup %1633  ;;  %vm1113_vm6 = vweird.f32 %v1632_v47 }
 0xe5a   :  { %v1046_v59 = vmul.f32 %v1634_v52, %v1044_v45  ;;  %vm1114_vm9 = vmor %vm1112_vm8, %vm1113_vm6  ;;  %vm1051_vm11 = vweird.f32 %v1634_v52  ;;  %vm1017_vm6 = vcmp.gt.f32.partialorder %v1492_v57, 0.0 }
 0xe5b   :  { %v1109_v35 = vsub.f32 1.0, %v1108_v49  ;;  %vm1052_vm14 = vmor %vm1050_vm13, %vm1051_vm11  ;;  %v1140_v40 = vsel %vm1017_vm6, 1, %v1890_v0 }
 0xe5c   :  { %v1047_v63 = vsub.f32 1.0, %v1046_v59 }
 0xe5d   :  { %v1110_v54 = vmul.f32 %v1632_v47, %v1109_v35 }
 0xe5e   :  { %v1048_v62 = vmul.f32 %v1634_v52, %v1047_v63 }
 0xe5f   :  { %v1111_v61 = vadd.f32 %v1632_v47, %v1110_v54 }
 0xe60   :  { %v1049_v58 = vadd.f32 %v1634_v52, %v1048_v62 }
 0xe61   :  { %v1115_v10 = vsel %vm1114_vm9, %v1632_v47, %v1111_v61  ;;  %v1232_v61 = vld [vmem:[#allocation2] sm:$0x3] }
 0xe62   :  { %v1120_v42 = vsel %vm1117_vm10, %v1119_v14, %v1115_v10  ;;  %v1053_v26 = vsel %vm1052_vm14, %v1634_v52, %v1049_v58  ;;  %v1500_v10 = vld [vmem:[%s2604_s0 + $0xe] sm:$0x3] }
 0xe63   :  { %v1058_v15 = vsel %vm1055_vm15, %v1057_v29, %v1053_v26  ;;  %v1123_v12 = vmul.f32 %v1120_v42, %v2412_v56 }
 0xe64   :  { %v1061_v39 = vmul.f32 %v1058_v15, %v2422_v38 }
 0xea1   :  { %v1126_v17 = vpop.permute.xlu1 %1125 }
 0xea2   :  { %v1128_v20 = vmul.f32 %v1126_v17, %v1120_v42 }
 0xea4   :  { %1130 = vrot.lane.b32.xlu0 %v1128_v20, %s1887_s25  ;;  %v1230_v20 = vld [vmem:[%s2606_s2] sm:$0x3] }
 0xea9   :  { %v1064_v33 = vpop.permute.xlu2 %1063 }
 0xeaa   :  { %v1066_v34 = vmul.f32 %v1064_v33, %v1058_v15 }
 0xeac   :  { %1068 = vrot.lane.b32.xlu1 %v1066_v34, %s1887_s25 }
 0xeb4   :  { %1154 = vperm.xlu1 %1525, %v1152_v18  }
 0xf16   :  { %v1131_v23 = vpop.permute.xlu0 %1130 }
 0xf17   :  { %v2415_v2 = vadd.f32 %v1131_v23, %v1123_v12 }
 0xf19   :  { %1635 = vtanh.f32 %v2415_v2 }
 0xf1e   :  { %v1069_v3 = vpop.permute.xlu1 %1068 }
 0xf1f   :  { %v1636_v41 = vpop.eup %1635  ;;  %v2425_v43 = vadd.f32 %v1069_v3, %v1061_v39 }
 0xf20   :  { %1136 = vrot.lane.b32.xlu2 %v1636_v41, %s1884_s21 }
 0xf21   :  { %1637 = vtanh.f32 %v2425_v43 }
 0xf26   :  { %v2434_v1 = vpop.permute.xlu1 %1154 }
 0xf27   :  { %v1638_v24 = vpop.eup %1637  ;;  %vm1156_vm3 = vcmp.eq.s32.totalorder %v2434_v1, 1 }
 0xf28   :  { %1142 = vperm.xlu2 %1526, %v1140_v40   ;;  %1074 = vrot.lane.b32.xlu0 %v1638_v24, %s1884_s21 }
 0xf7a   :  { %v1137_v19 = vpop.permute.xlu2 %1136 }
 0xf7b   :  { %v2436_v44 = vmul.f32 %v1137_v19, %v1120_v42 }
 0xf7d   :  { %v2443_v30 = vsel %vm1156_vm3, %v2436_v44, %v2375_v7 }
 0xf7e   :  { %v1233_v31 = vpack.c.bf16 %v2443_v30, %v2443_v30 }
 0xf80   :  { %1235 = vrot.lane.b32.xlu0 %v1233_v31, %s1887_s25 }
 0xf82   :  { %v2448_v45 = vpop.permute.xlu2 %1142 }
 0xf83   :  { %vm1144_vm8 = vcmp.eq.s32.totalorder %v2448_v45, 1 }
 0xf9a   :  { %v1075_v47 = vpop.permute.xlu0 %1074 }
 0xf9b   :  { %v1077_v49 = vmul.f32 %v1075_v47, %v1058_v15 }
 0xf9d   :  { %v2454_v35 = vsel %vm1144_vm8, %v1077_v49, %v2386_v28  ;;  %v2458_v7 = vsel %vm1144_vm8, %v1077_v49, 0.0 }
 0xf9e   :  { %v1172_v52 = vpack.c.bf16 %v2454_v35, %v2454_v35 }
 0xfa0   :  { %1174 = vrot.lane.b32.xlu1 %v1172_v52, %s1887_s25 }
 0xff2   :  { %v1236_v54 = vpop.permute.xlu0 %1235 }
 0xff3   :  { %1503 = vmatmul.msk.bf16.vlgmr.msrb.gmra.mxu3 %vm101_vm12, %v1236_v54 }
0x1012   :  { %v1175_v59 = vpop.permute.xlu1 %1174 }
0x1013   :  { %1501 = vmatmul.msk.bf16.vlgmr.msrb.gmra.mxu2 %vm101_vm12, %v1175_v59  ;;  %vm1231_vm12 = vcmp.gt.f32.partialorder %v1230_v20, 0.0  ;;  %v853_v20 = vsel %vm852_vm1, %v2300_v50, 0.0 }
0x1014   :  { %v1303_v58 = vsel %vm1231_vm12, 1, %v1890_v0 }
0x1076   :  { %v1249_v63 = vpop.f32.mrf.mxu3 }
0x1077   :  { %v1253_v5 = vadd.f32 %v1249_v63, %v1232_v61 }
0x1079   :  { %1639 = vtanh.f32 %v1253_v5  ;;  %v1504_v46 = vmul.f32 -1.442695, %v1253_v5 }
0x107e   :  { %v1251_v28 = vpop.f32.mrf.mxu3 }
0x107f   :  { %v1640_v8 = vpop.eup %1639 }
0x1080   :  { %1276 = vrot.lane.b32.xlu2 %v1640_v8, %s1884_s21 }
0x1096   :  { %v1188_v62 = vpop.f32.mrf.mxu2 }
0x1097   :  { %v1192_v14 = vadd.f32 %v1500_v10, %v1188_v62  ;;  %v1499_v10 = vld [vmem:[%s2606_s2 + $0xe] sm:$0x3]  ;;  %s1891_s2 = smov 96  }
0x1098   :  { %vm1169_vm12 = vcmp.gt.f32.partialorder %v1499_v10, 0.0 }
0x1099   :  { %1641 = vtanh.f32 %v1192_v14  ;;  %v1502_v40 = vmul.f32 -1.442695, %v1192_v14  ;;  %v1291_v62 = vsel %vm1169_vm12, 1, %v1890_v0  ;;  %v701_v14 = vsel %vm700_vm2, %v2232_v36, 0.0 }
0x109a   :  { %1643 = vpow2.f32 %v1504_v46  ;;  %v2506_v0 = vsel %vm1156_vm3, %v2415_v2, %v2412_v56  ;;  %vm234_vm2 = vcmask 254976   ;;  %v1165_v56 = vsel %vm1144_vm8, %v2425_v43, %v2422_v38 }
0x109b   :  { %v393_v38 = vsel %vm392_vm7, %v2088_v11, 0.0 }
0x109e   :  { %v1190_v42 = vpop.f32.mrf.mxu2 }
0x109f   :  { %v1642_v17 = vpop.eup %1641  ;;  %v1157_v42 = vsel %vm1156_vm3, %v2436_v44, 0.0 }
0x10a0   :  { %1215 = vrot.lane.b32.xlu0 %v1642_v17, %s1884_s21  ;;  %v1644_v4 = vpop.eup %1643 }
0x10a1   :  { %v1257_v26 = vadd.f32 1.0, %v1644_v4 }
0x10a3   :  { %1645 = vrcp.f32 %v1257_v26  ;;  %v1269_v18 = vand.u32 2147483648, %v1257_v26  ;;  %vm1263_vm10 = vweird.f32 %v1257_v26  ;;  %v1267_v12 = vand.u32 2147483647, %v1257_v26 }
0x10a4   :  { %1647 = vpow2.f32 %v1502_v40 }
0x10a5   :  { %v1270_v39 = vor.u32 1.1754944e-38, %v1269_v18  ;;  %vm1268_vm13 = vcmp.eq.f32.partialorder %v1267_v12, 8.507059e+37 }
0x10a8   :  { %1305 = vperm.xlu0 %1524, %v1303_v58  }
0x10a9   :  { %v1646_v29 = vpop.eup %1645 }
0x10aa   :  { %v1259_v33 = vmul.f32 %v1646_v29, %v1257_v26  ;;  %vm1264_vm9 = vweird.f32 %v1646_v29  ;;  %v1648_v24 = vpop.eup %1647 }
0x10ab   :  { %vm1265_vm11 = vmor %vm1263_vm10, %vm1264_vm9  ;;  %v1196_v19 = vadd.f32 1.0, %v1648_v24 }
0x10ac   :  { %v1260_v15 = vsub.f32 1.0, %v1259_v33 }
0x10ad   :  { %1649 = vrcp.f32 %v1196_v19  ;;  %v1208_v59 = vand.u32 2147483648, %v1196_v19  ;;  %vm1202_vm15 = vweird.f32 %v1196_v19  ;;  %v1206_v61 = vand.u32 2147483647, %v1196_v19 }
0x10ae   :  { %v1261_v34 = vmul.f32 %v1646_v29, %v1260_v15 }
0x10af   :  { %v1209_v5 = vor.u32 1.1754944e-38, %v1208_v59  ;;  %vm1207_vm6 = vcmp.eq.f32.partialorder %v1206_v61, 8.507059e+37 }
0x10b0   :  { %v1262_v13 = vadd.f32 %v1646_v29, %v1261_v34 }
0x10b2   :  { %v1266_v23 = vsel %vm1265_vm11, %v1646_v29, %v1262_v13 }
0x10b3   :  { %v2474_v41 = vsel %vm1268_vm13, %v1270_v39, %v1266_v23  ;;  %v1650_v31 = vpop.eup %1649 }
0x10b4   :  { %v1198_v47 = vmul.f32 %v1650_v31, %v1196_v19  ;;  %vm1203_vm14 = vweird.f32 %v1650_v31 }
0x10b5   :  { %vm1204_vm0 = vmor %vm1202_vm15, %vm1203_vm14 }
0x10b6   :  { %v1199_v49 = vsub.f32 1.0, %v1198_v47 }
0x10b8   :  { %v1200_v52 = vmul.f32 %v1650_v31, %v1199_v49 }
0x10ba   :  { %v1201_v54 = vadd.f32 %v1650_v31, %v1200_v52 }
0x10bc   :  { %v1205_v63 = vsel %vm1204_vm0, %v1650_v31, %v1201_v54 }
0x10bd   :  { %v2480_v28 = vsel %vm1207_vm6, %v1209_v5, %v1205_v63 }
0x10be   :  { %v1213_v2 = vmul.f32 %v2480_v28, %v1165_v56 }
0x10da   :  { %v1277_v3 = vpop.permute.xlu2 %1276 }
0x10db   :  { %v1279_v57 = vmul.f32 %v1277_v3, %v2474_v41 }
0x10dd   :  { %1281 = vrot.lane.b32.xlu1 %v1279_v57, %s1887_s25 }
0x10e5   :  { %231 = vrot.lane.b32.xlu1 %v2040_v6, %s1887_s25 }
0x1112   :  { %v1216_v6 = vpop.permute.xlu0 %1215 }
0x1113   :  { %v1218_v8 = vmul.f32 %v1216_v6, %v2480_v28 }
0x1115   :  { %1220 = vrot.lane.b32.xlu2 %v1218_v8, %s1887_s25 }
0x111d   :  { %1293 = vperm.xlu2 %1526, %v1291_v62  }
0x1125   :  { %243 = vrot.lane.b32.xlu2 %v2030_v60, %s1887_s25  ;;  %v1274_v60 = vmul.f32 %v2474_v41, %v2506_v0 }
0x112d   :  { %537 = vrot.lane.b32.xlu2 %v2182_v55, %s1887_s25 }
0x1135   :  { %703 = vrot.lane.b32.xlu2 %v701_v14, %s1887_s25 }
0x113d   :  { %1159 = vrot.lane.b32.xlu2 %v1157_v42, %s1887_s25 }
0x1145   :  { %843 = vrot.lane.b32.xlu2 %v2322_v37, %s1887_s25  ;;  %v547_v37 = vsel %vm546_vm4, %v2160_v27, 0.0 }
0x114f   :  { %v1282_v55 = vpop.permute.xlu1 %1281 }
0x1150   :  { %v2510_v53 = vadd.f32 %v1282_v55, %v1274_v60 }
0x1152   :  { %1651 = vtanh.f32 %v2510_v53 }
0x1157   :  { %v232_v36 = vpop.permute.xlu1 %231 }
0x1158   :  { %v1652_v44 = vpop.eup %1651  ;;  %235 = vst.msk [vmem:[#allocation8] sm:$0x3] %vm234_vm2, %v232_v36 }
0x1159   :  { %1287 = vrot.lane.b32.xlu0 %v1652_v44, %s1884_s21 }
0x1161   :  { %383 = vrot.lane.b32.xlu0 %v2110_v16, %s1887_s25 }
0x1169   :  { %549 = vrot.lane.b32.xlu0 %v547_v37, %s1887_s25 }
0x116f   :  { %v1221_v1 = vpop.permute.xlu2 %1220 }
0x1170   :  { %v1223_v17 = vadd.f32 %v1221_v1, %v1213_v2 }
0x1171   :  { %855 = vrot.lane.b32.xlu0 %v853_v20, %s1887_s25 }
0x1172   :  { %1653 = vtanh.f32 %v1223_v17 }
0x1177   :  { %v1294_v16 = vpop.permute.xlu2 %1293 }
0x1178   :  { %v1654_v25 = vpop.eup %1653  ;;  %vm1295_vm4 = vcmp.eq.s32.totalorder %v1294_v16, 1 }
0x1179   :  { %995 = vrot.lane.b32.xlu0 %v2390_v32, %s1887_s25  ;;  %1226 = vrot.lane.b32.xlu1 %v1654_v25, %s1884_s21  ;;  %v1005_v32 = vsel %vm1004_vm5, %v2368_v22, 0.0  ;;  %v1315_v11 = vsel %vm1295_vm4, %v1223_v17, %v1165_v56  ;;  %s1892_s21 = smov [#allocation12]  }
0x117a   :  { %s1380_s16 = sshll.u32 %s1892_s21, 4  ;;  %s1381_s16 = int_to_ptr.vmem [resolvable:$true] %s1380_s16 }
0x117f   :  { %v244_v27 = vpop.permute.xlu2 %243 }
0x1180   :  { %247 = vst.msk [vmem:[#allocation9 + $0xe] sm:$0x3] %vm234_vm2, %v244_v27 }
0x1181   :  { %395 = vrot.lane.b32.xlu1 %v393_v38, %s1887_s25 }
0x1187   :  { %v538_v48 = vpop.permute.xlu2 %537 }
0x1188   :  { %541 = vst.msk [vmem:[#allocation8 + $0x4] sm:$0x3] %vm234_vm2, %v538_v48 }
0x1189   :  { %691 = vrot.lane.b32.xlu1 %v2254_v51, %s1887_s25  ;;  %v1306_v51 = vpop.permute.xlu0 %1305 }
0x118a   :  { %vm1307_vm7 = vcmp.eq.s32.totalorder %v1306_v51, 1 }
0x118b   :  { %v1317_v13 = vsel %vm1307_vm7, %v2510_v53, %v2506_v0 }
0x118f   :  { %v704_v50 = vpop.permute.xlu2 %703 }
0x1190   :  { %707 = vst.msk [vmem:[#allocation9 + $0x8] sm:$0x3] %vm234_vm2, %v704_v50 }
0x1191   :  { %1007 = vrot.lane.b32.xlu1 %v1005_v32, %s1887_s25 }
0x1197   :  { %v1160_v9 = vpop.permute.xlu2 %1159 }
0x1198   :  { %1163 = vst.msk [vmem:[#allocation9 + $0x2] sm:$0x3] %vm234_vm2, %v1160_v9 }
0x1199   :  { %1324 = vrot.lane.b32.xlu1 %v1315_v11, %s1891_s2 }
0x119f   :  { %v844_v43 = vpop.permute.xlu2 %843 }
0x11a0   :  { %847 = vst.msk [vmem:[#allocation8 + $0x8] sm:$0x3] %vm234_vm2, %v844_v43 }
0x11a1   :  { %1147 = vrot.lane.b32.xlu1 %v2458_v7, %s1887_s25 }
0x11cb   :  { %v1288_v45 = vpop.permute.xlu0 %1287 }
0x11cc   :  { %v1290_v21 = vmul.f32 %v1288_v45, %v2474_v41 }
0x11ce   :  { %v1316_v22 = vsel %vm1307_vm7, %v1290_v21, %v2443_v30  ;;  %v1308_v58 = vsel %vm1307_vm7, %v1290_v21, 0.0 }
0x11cf   :  { %1329 = vrot.lane.b32.xlu1 %v1316_v22, %s1887_s25  ;;  %1310 = vrot.lane.b32.xlu0 %v1308_v58, %s1887_s25 }
0x11d3   :  { %v384_v46 = vpop.permute.xlu0 %383 }
0x11d4   :  { %387 = vst.msk [vmem:[#allocation8 + $0x2] sm:$0x3] %vm234_vm2, %v384_v46 }
0x11db   :  { %v550_v4 = vpop.permute.xlu0 %549 }
0x11dc   :  { %553 = vst.msk [vmem:[#allocation9 + $0xa] sm:$0x3] %vm234_vm2, %v550_v4 }
0x11e3   :  { %v856_v7 = vpop.permute.xlu0 %855 }
0x11e4   :  { %859 = vst.msk [vmem:[#allocation9 + $0x6] sm:$0x3] %vm234_vm2, %v856_v7 }
0x11eb   :  { %v1227_v26 = vpop.permute.xlu1 %1226  ;;  %v996_v29 = vpop.permute.xlu0 %995 }
0x11ec   :  { %v1229_v33 = vmul.f32 %v1227_v26, %v2480_v28  ;;  %999 = vst.msk [vmem:[#allocation8 + $0xa] sm:$0x3] %vm234_vm2, %v996_v29 }
0x11ee   :  { %v1296_v30 = vsel %vm1295_vm4, %v1229_v33, 0.0  ;;  %v1314_v15 = vsel %vm1295_vm4, %v1229_v33, %v2454_v35 }
0x11ef   :  { %1298 = vrot.lane.b32.xlu2 %v1296_v30, %s1887_s25  ;;  %1319 = vrot.lane.b32.xlu0 %v1314_v15, %s1887_s25 }
0x11f3   :  { %v396_v34 = vpop.permute.xlu1 %395 }
0x11f4   :  { %399 = vst.msk [vmem:[#allocation9 + $0xc] sm:$0x3] %vm234_vm2, %v396_v34 }
0x11f7   :  { %1334 = vrot.lane.b32.xlu2 %v1317_v13, %s1891_s2  ;;  %s1369_s2 = sshll.u32 %s1897_s5, 4  ;;  %s1370_s2 = int_to_ptr.vmem [resolvable:$true] %s1369_s2 }
0x11fb   :  { %v692_v18 = vpop.permute.xlu1 %691 }
0x11fc   :  { %695 = vst.msk [vmem:[#allocation8 + $0x6] sm:$0x3] %vm234_vm2, %v692_v18 }
0x1203   :  { %v1008_v12 = vpop.permute.xlu1 %1007 }
0x1204   :  { %1011 = vst.msk [vmem:[#allocation9 + $0x4] sm:$0x3] %vm234_vm2, %v1008_v12 }
0x120b   :  { %v1325_v35 = vpop.permute.xlu1 %1324 }
0x120c   :  { %1327 = vst.msk [vmem:[#allocation12] sm:$0x3] %vm234_vm2, %v1325_v35 }
0x120d   :  { %1385 = dma.vmem_to_hbm [thread:$0]  %s1381_s16, 32, %s1383_s19, [#allocation13]  }
0x1213   :  { %v1148_v23 = vpop.permute.xlu1 %1147 }
0x1214   :  { %1151 = vst.msk [vmem:[#allocation8 + $0xc] sm:$0x3] %vm234_vm2, %v1148_v23 }
0x1241   :  { %v1330_v39 = vpop.permute.xlu1 %1329  ;;  %v1311_v3 = vpop.permute.xlu0 %1310 }
0x1242   :  { %1332 = vst.msk [vmem:[#allocation14] sm:$0x3] %vm234_vm2, %v1330_v39 }
0x1243   :  { %1313 = vst.msk [vmem:[#allocation9] sm:$0x3] %vm234_vm2, %v1311_v3  ;;  %1396 = dma.vmem_to_hbm [thread:$0]  %s1392_s22, 32, %s1394_s26, [#allocation13]  }
0x1244   :  { %1363 = dma.vmem_to_hbm [thread:$0]  %s1356_s28, 256, %s1358_s8, [#allocation10], %s1887_s25, %s1887_s25, %s1888_s3  }
0x1249   :  { %v1299_v41 = vpop.permute.xlu2 %1298 }
0x124a   :  { %1302 = vst.msk [vmem:[#allocation8 + $0xe] sm:$0x3] %vm234_vm2, %v1299_v41 }
0x124b   :  { %1350 = dma.vmem_to_hbm [thread:$0]  %s1343_s4, 256, %s1345_s6, [#allocation4], %s1887_s25, %s1887_s25, %s1888_s3  }
0x1251   :  { %v1335_v57 = vpop.permute.xlu2 %1334 }
0x1252   :  { %1337 = vst.msk [vmem:[#allocation15] sm:$0x3] %vm234_vm2, %v1335_v57 }
0x1253   :  { %1407 = dma.vmem_to_hbm [thread:$0]  %s1403_s13, 32, %s1405_s15, [#allocation16]  }
0x1261   :  { %v1320_v40 = vpop.permute.xlu0 %1319 }
0x1262   :  { %1322 = vst.msk [vmem:[#allocation11] sm:$0x3] %vm234_vm2, %v1320_v40 }
0x1263   :  { %1374 = dma.vmem_to_hbm [thread:$0]  %s1370_s2, 32, %s1372_s17, [#allocation10]  }
0x1264   :  { %1875 = dma.done.wait [#allocation4], 256  }
0x1265   :  { %1876 = vsyncadd [#allocation4], 4294967040 }
0x1266   :  { %1877 = dma.done.wait [#allocation10], 288  }
0x1267   :  { %1878 = vsyncadd [#allocation10], 4294967008 }
0x1268   :  { %1879 = dma.done.wait [#allocation13], 64  }
0x1269   :  { %1880 = vsyncadd [#allocation13], 4294967232 }
0x126a   :  { %1881 = dma.done.wait [#allocation16], 32  }
0x126b   :  { %1882 = vsyncadd [#allocation16], 4294967264 }
0x126c   :  { %1432 = vsyncpa [#allocation3], 1 }
0x126d   :  { %1433 = vsyncpa [#allocation6], 1 }
0x126e   :  { %1434 = vsyncpa [#allocation4], 1 }
0x126f   :  { %1435 = vsyncpa [#allocation10], 1 }
0x1270   :  { %1436 = vsyncpa [#allocation13], 1 }
0x1271   :  { %1437 = vsyncpa [#allocation16], 1 }

</bundles_post_ra>
